<compile_context>
chip_gen: v6e
topology: v6e:2x2x1
jax: 0.10.0
libtpu: 0.0.40
codegen_flags: <defaults>
</compile_context>

<pallas_src>
import numpy as np
import jax
import jax.numpy as jnp
from jax import lax
from jax.experimental import pallas as pl
from jax.experimental.pallas import tpu as pltpu


# --------------------------------------------------------------------------
# Model configuration (synthetic, matches the INN.__init__ branch structure)
# --------------------------------------------------------------------------
INPUT_SIZE = 4          # number of features / per-feature sub-networks
HIDDEN = 32             # hidden_size for the state-0 LSTM
OUT = 1                 # type == 2  ->  output_size = 1
EMBED_DIM = 8           # data['0'] embedding dim
VOCAB = 10
FNNF_OUT = 8            # Linear(in, 8) for states 1/3/4
H_S = 2 * FNNF_OUT      # LSTM hidden for states 1..3 (in_size * 2 = 16)
STATES = [0, 3, 1, 4]   # data['state'][0]


# --------------------------------------------------------------------------
# Pallas mega-kernel
# --------------------------------------------------------------------------

def _lstm_unrolled(gx, whh, T, B, H):
    """Run an unrolled LSTM recurrence.

    gx:  (T*B, 4H) time-major, precomputed x @ Wih + b (bias hoisted).
    whh: (H, 4H).  Gate order follows PyTorch: i | f | g | o.
    Returns the hidden sequence as (T*B, H), time-major.
    """
    # Hoisted lane masks: sigmoid full-width, tanh on the g-quarter via
    # tanh(x) = 2*sigmoid(2x) - 1.
    lane = lax.broadcasted_iota(jnp.int32, (1, 4 * H), 1)
    is_g = (lane >= 2 * H) & (lane < 3 * H)
    pre = jnp.where(is_g, 2.0, 1.0).astype(jnp.float32)
    post = jnp.where(is_g, -1.0, 0.0).astype(jnp.float32)

    h = jnp.zeros((B, H), jnp.float32)
    c = jnp.zeros((B, H), jnp.float32)
    hs = []
    for t in range(T):                                   # static unroll (T=8)
        g = gx[t * B:(t + 1) * B, :] + jnp.dot(
            h, whh, preferred_element_type=jnp.float32)  # (B, 4H)
        acts = jax.nn.sigmoid(g * pre) * pre + post      # sigmoid(i,f,o), tanh(g)
        i_g = acts[:, 0 * H:1 * H]
        f_g = acts[:, 1 * H:2 * H]
        g_g = acts[:, 2 * H:3 * H]
        o_g = acts[:, 3 * H:4 * H]
        c = f_g * c + i_g * g_g
        h = o_g * jnp.tanh(c)
        hs.append(h)
    return jnp.concatenate(hs, axis=0)                   # (T*B, H)


def make_inn_kernel(T, B):
    def inn_kernel(emb_ref, xf_ref,
                   wih1_ref, whh1_ref, b1_ref, wf1_ref, bf1_ref, wo1_ref, bo1_ref,
                   wff_ref, bff_ref, wihS_ref, whhS_ref, blS_ref,
                   wfnS_ref, bfnS_ref, woS_ref, boS_ref,
                   out_ref):
        f32 = jnp.float32

        # ---- i = 0, state 0: (embedded xi) -> LSTM(E, 32) -> fnn1 -> out1
        H1 = whh1_ref.shape[0]
        gx1 = jnp.dot(emb_ref[...], wih1_ref[...],
                      preferred_element_type=f32) + b1_ref[...]       # (T*B, 4H1)
        seq1 = _lstm_unrolled(gx1, whh1_ref[...], T, B, H1)           # (T*B, H1)
        f1 = jnp.dot(seq1, wf1_ref[...], preferred_element_type=f32) + bf1_ref[...]
        nn_out = jnp.dot(f1, wo1_ref[...], preferred_element_type=f32) + bo1_ref[...]
        outs = [nn_out]                                               # (T*B, 1)

        # ---- i = 1..3, states 3/1/4: fnnf -> LSTM(8, 16) -> fnn -> out
        H2 = whhS_ref.shape[1]
        for s in range(xf_ref.shape[1]):
            xi = xf_ref[:, s:s + 1]                                   # (T*B, 1)
            wff = wff_ref[s]                                          # (2, 8)
            # cat([nn_out.detach(), xi], -1) @ Wff + bff, fused as broadcasts
            x2 = nn_out * wff[0:1, :] + xi * wff[1:2, :] + bff_ref[s]  # (T*B, 8)
            gx = jnp.dot(x2, wihS_ref[s],
                         preferred_element_type=f32) + blS_ref[s]     # (T*B, 4H2)
            seq = _lstm_unrolled(gx, whhS_ref[s], T, B, H2)           # (T*B, H2)
            fs = jnp.dot(seq, wfnS_ref[s], preferred_element_type=f32) + bfnS_ref[s]
            nn_out = jnp.dot(fs, woS_ref[s], preferred_element_type=f32) + boS_ref[s]
            outs.append(nn_out)

        # single writeback of all per-state outputs
        out_ref[...] = jnp.concatenate(outs, axis=1)                  # (T*B, F)

    return inn_kernel


# --------------------------------------------------------------------------
# Wrapper: glue (embedding gather, layout) + one pallas_call
# --------------------------------------------------------------------------

def _full_block(a):
    nd = a.ndim
    return pl.BlockSpec(a.shape, lambda i, _nd=nd: (0,) * _nd)


def inn_forward(x, params):
    """x: (B, T, F) float32, feature 0 carries integer category ids."""
    B, T, F = x.shape
    E = params['embed1'].shape[1]

    # JAX glue: embedding lookup + time-major flattening (everything else
    # runs inside the single Pallas kernel).
    ids = x[:, :, 0].astype(jnp.int32)                               # (B, T)
    emb = jnp.take(params['embed1'], ids, axis=0)                    # (B, T, E)
    emb_tm = jnp.transpose(emb, (1, 0, 2)).reshape(T * B, E)
    xf_tm = jnp.transpose(x[:, :, 1:], (1, 0, 2)).reshape(T * B, F - 1)
    xf_tm = xf_tm.astype(jnp.float32)

    args = (emb_tm, xf_tm,
            params['wih1'], params['whh1'], params['b1'],
            params['wf1'], params['bf1'], params['wo1'], params['bo1'],
            params['wff'], params['bff'],
            params['wihS'], params['whhS'], params['blS'],
            params['wfnS'], params['bfnS'], params['woS'], params['boS'])

    out_slab = pl.pallas_call(
        make_inn_kernel(T, B),
        out_shape=jax.ShapeDtypeStruct((T * B, F), jnp.float32),
        grid=(1,),
        in_specs=[_full_block(a) for a in args],
        out_specs=pl.BlockSpec((T * B, F), lambda i: (0, 0)),
        compiler_params=pltpu.CompilerParams(dimension_semantics=("arbitrary",)),
    )(*args)

    out_btf = out_slab.reshape(T, B, F).transpose(1, 0, 2)           # (B, T, F)
    outputs = [out_btf[:, :, i:i + 1] for i in range(F)]             # F x (B, T, 1)
    return outputs, outputs[-1]


# --------------------------------------------------------------------------
# Deterministic parameter init (shapes follow INN.__init__ for this config)
# --------------------------------------------------------------------------

def init_params(key):
    ks = iter(jax.random.split(key, 64))

    def u(shape, fan_in):
        b = 1.0 / np.sqrt(fan_in)
        return jax.random.uniform(next(ks), shape, jnp.float32, -b, b)

    p = {}
    # embedding table for feature 0 (data['0'])
    p['embed1'] = jax.random.normal(next(ks), (VOCAB, EMBED_DIM), jnp.float32)

    # i = 0, state 0
    p['wih1'] = u((EMBED_DIM, 4 * HIDDEN), HIDDEN)        # LSTM(E, 32)
    p['whh1'] = u((HIDDEN, 4 * HIDDEN), HIDDEN)
    p['b1'] = u((1, 4 * HIDDEN), HIDDEN)                  # b_ih + b_hh folded
    p['wf1'] = u((HIDDEN, HIDDEN // 2), HIDDEN)           # fnn1: 32 -> 16
    p['bf1'] = u((1, HIDDEN // 2), HIDDEN)
    p['wo1'] = u((HIDDEN // 2, OUT), HIDDEN // 2)         # out1: 16 -> 1
    p['bo1'] = u((1, OUT), HIDDEN // 2)

    # i = 1..3 (states 3, 1, 4): identical structure, stacked on a leading axis
    NS = INPUT_SIZE - 1
    p['wff'] = u((NS, OUT + 1, FNNF_OUT), OUT + 1)        # fnnf: 2 -> 8
    p['bff'] = u((NS, 1, FNNF_OUT), OUT + 1)
    p['wihS'] = u((NS, FNNF_OUT, 4 * H_S), H_S)           # LSTM(8, 16)
    p['whhS'] = u((NS, H_S, 4 * H_S), H_S)
    p['blS'] = u((NS, 1, 4 * H_S), H_S)                   # b_ih + b_hh folded
    p['wfnS'] = u((NS, H_S, FNNF_OUT), H_S)               # fnn: 16 -> 8
    p['bfnS'] = u((NS, 1, FNNF_OUT), H_S)
    p['woS'] = u((NS, FNNF_OUT, OUT), FNNF_OUT)           # out: 8 -> 1
    p['boS'] = u((NS, 1, OUT), FNNF_OUT)
    return p


# --------------------------------------------------------------------------
# Pure-JAX reference (for correctness check only)
# --------------------------------------------------------------------------

def _ref_lstm(x_bti, wih, whh, b):
    B, T, _ = x_bti.shape
    H = whh.shape[0]
    h = jnp.zeros((B, H), jnp.float32)
    c = jnp.zeros((B, H), jnp.float32)
    ys = []
    for t in range(T):
        g = x_bti[:, t, :] @ wih + h @ whh + b
        i_g = jax.nn.sigmoid(g[:, :H])
        f_g = jax.nn.sigmoid(g[:, H:2 * H])
        g_g = jnp.tanh(g[:, 2 * H:3 * H])
        o_g = jax.nn.sigmoid(g[:, 3 * H:])
        c = f_g * c + i_g * g_g
        h = o_g * jnp.tanh(c)
        ys.append(h)
    return jnp.stack(ys, axis=1)                          # (B, T, H)


def _ref_forward(x, p):
    B, T, F = x.shape
    ids = x[:, :, 0].astype(jnp.int32)
    emb = jnp.take(p['embed1'], ids, axis=0)
    seq = _ref_lstm(emb, p['wih1'], p['whh1'], p['b1'])
    f1 = seq @ p['wf1'] + p['bf1']
    nn_out = f1 @ p['wo1'] + p['bo1']
    outs = [nn_out]
    for s in range(F - 1):
        xi = x[:, :, s + 1][..., None]
        x2 = jnp.concatenate([nn_out, xi], axis=2)
        x2 = jnp.einsum('bti,io->bto', x2, p['wff'][s]) + p['bff'][s]
        seq = _ref_lstm(x2, p['wihS'][s], p['whhS'][s], p['blS'][s])
        fs = jnp.einsum('bth,ho->bto', seq, p['wfnS'][s]) + p['bfnS'][s]
        nn_out = jnp.einsum('bth,ho->bto', fs, p['woS'][s]) + p['boS'][s]
        outs.append(nn_out)
    return outs, nn_out


# --------------------------------------------------------------------------
# Main
# --------------------------------------------------------------------------

if __name__ == "__main__":
    key = jax.random.PRNGKey(0)
    kp, kx1, kx2 = jax.random.split(key, 3)

    params = init_params(kp)

    B, T, F = 2, 8, INPUT_SIZE
    # feature 0 holds integer category ids (embedded); other features are floats
    ids = jax.random.randint(kx1, (B, T, 1), 0, VOCAB).astype(jnp.float32)
    rest = jax.random.normal(kx2, (B, T, F - 1), jnp.float32)
    x = jnp.concatenate([ids, rest], axis=2)              # (B, T, F) = (2, 8, 4)

    outputs, nn_out = jax.jit(inn_forward)(x, params)
    outputs = [jax.block_until_ready(o) for o in outputs]
    nn_out = jax.block_until_ready(nn_out)

    # shape / finiteness sanity checks
    assert len(outputs) == F
    for o in outputs:
        assert o.shape == (B, T, OUT), o.shape
        assert bool(jnp.all(jnp.isfinite(o)))
    assert nn_out.shape == (B, T, OUT)

    # numerical check against a pure-JAX reference of the same forward
    ref_outs, ref_nn_out = _ref_forward(x, params)
    for got, ref in zip(outputs, ref_outs):
        np.testing.assert_allclose(np.asarray(got), np.asarray(ref),
                                   rtol=2e-3, atol=2e-3)
    np.testing.assert_allclose(np.asarray(nn_out), np.asarray(ref_nn_out),
                               rtol=2e-3, atol=2e-3)

    print("KERNEL_OK")
</pallas_src>

<mosaic_0001>
module attributes {stable_mosaic.version = 11 : i64} {
  func.func @inn_kernel(%arg0: i32, %arg1: memref<16x8xf32, #tpu.memory_space<vmem>>, %arg2: memref<16x3xf32, #tpu.memory_space<vmem>>, %arg3: memref<8x128xf32, #tpu.memory_space<vmem>>, %arg4: memref<32x128xf32, #tpu.memory_space<vmem>>, %arg5: memref<1x128xf32, #tpu.memory_space<vmem>>, %arg6: memref<32x16xf32, #tpu.memory_space<vmem>>, %arg7: memref<1x16xf32, #tpu.memory_space<vmem>>, %arg8: memref<16x1xf32, #tpu.memory_space<vmem>>, %arg9: memref<1x1xf32, #tpu.memory_space<vmem>>, %arg10: memref<3x2x8xf32, #tpu.memory_space<vmem>>, %arg11: memref<3x1x8xf32, #tpu.memory_space<vmem>>, %arg12: memref<3x8x64xf32, #tpu.memory_space<vmem>>, %arg13: memref<3x16x64xf32, #tpu.memory_space<vmem>>, %arg14: memref<3x1x64xf32, #tpu.memory_space<vmem>>, %arg15: memref<3x16x8xf32, #tpu.memory_space<vmem>>, %arg16: memref<3x1x8xf32, #tpu.memory_space<vmem>>, %arg17: memref<3x8x1xf32, #tpu.memory_space<vmem>>, %arg18: memref<3x1x1xf32, #tpu.memory_space<vmem>>, %arg19: memref<16x4xf32, #tpu.memory_space<vmem>>) attributes {dimension_semantics = [#tpu.dimension_semantics<arbitrary>], iteration_bounds = array<i64: 1>, scalar_prefetch = 0 : i64, scratch_operands = 0 : i64, tpu.core_type = #tpu.core_type<tc>, window_params = [{pipeline_mode = #tpu.pipeline_mode<synchronous>, transform_indices = @transform_0, window_bounds = array<i64: 16, 8>}, {pipeline_mode = #tpu.pipeline_mode<synchronous>, transform_indices = @transform_1, window_bounds = array<i64: 16, 3>}, {pipeline_mode = #tpu.pipeline_mode<synchronous>, transform_indices = @transform_2, window_bounds = array<i64: 8, 128>}, {pipeline_mode = #tpu.pipeline_mode<synchronous>, transform_indices = @transform_3, window_bounds = array<i64: 32, 128>}, {pipeline_mode = #tpu.pipeline_mode<synchronous>, transform_indices = @transform_4, window_bounds = array<i64: 1, 128>}, {pipeline_mode = #tpu.pipeline_mode<synchronous>, transform_indices = @transform_5, window_bounds = array<i64: 32, 16>}, {pipeline_mode = #tpu.pipeline_mode<synchronous>, transform_indices = @transform_6, window_bounds = array<i64: 1, 16>}, {pipeline_mode = #tpu.pipeline_mode<synchronous>, transform_indices = @transform_7, window_bounds = array<i64: 16, 1>}, {pipeline_mode = #tpu.pipeline_mode<synchronous>, transform_indices = @transform_8, window_bounds = array<i64: 1, 1>}, {pipeline_mode = #tpu.pipeline_mode<synchronous>, transform_indices = @transform_9, window_bounds = array<i64: 3, 2, 8>}, {pipeline_mode = #tpu.pipeline_mode<synchronous>, transform_indices = @transform_10, window_bounds = array<i64: 3, 1, 8>}, {pipeline_mode = #tpu.pipeline_mode<synchronous>, transform_indices = @transform_11, window_bounds = array<i64: 3, 8, 64>}, {pipeline_mode = #tpu.pipeline_mode<synchronous>, transform_indices = @transform_12, window_bounds = array<i64: 3, 16, 64>}, {pipeline_mode = #tpu.pipeline_mode<synchronous>, transform_indices = @transform_13, window_bounds = array<i64: 3, 1, 64>}, {pipeline_mode = #tpu.pipeline_mode<synchronous>, transform_indices = @transform_14, window_bounds = array<i64: 3, 16, 8>}, {pipeline_mode = #tpu.pipeline_mode<synchronous>, transform_indices = @transform_15, window_bounds = array<i64: 3, 1, 8>}, {pipeline_mode = #tpu.pipeline_mode<synchronous>, transform_indices = @transform_16, window_bounds = array<i64: 3, 8, 1>}, {pipeline_mode = #tpu.pipeline_mode<synchronous>, transform_indices = @transform_17, window_bounds = array<i64: 3, 1, 1>}, {pipeline_mode = #tpu.pipeline_mode<synchronous>, transform_indices = @transform_18, window_bounds = array<i64: 16, 4>}]} {
    %c0 = arith.constant 0 : index
    %c0_0 = arith.constant 0 : index
    %0 = vector.load %arg1[%c0, %c0_0] : memref<16x8xf32, #tpu.memory_space<vmem>>, vector<16x8xf32>
    %c0_1 = arith.constant 0 : index
    %c0_2 = arith.constant 0 : index
    %1 = vector.load %arg3[%c0_1, %c0_2] : memref<8x128xf32, #tpu.memory_space<vmem>>, vector<8x128xf32>
    %cst = arith.constant dense<0.000000e+00> : vector<16x128xf32>
    %2 = tpu.matmul %0, %1, %cst {dimension_numbers = #tpu.dot_dimension_numbers<[1], [0], [0], [1], [0, 0, 1, 1], [], []>} : vector<16x8xf32>, vector<8x128xf32>, vector<16x128xf32> -> vector<16x128xf32>
    %c0_3 = arith.constant 0 : index
    %c0_4 = arith.constant 0 : index
    %3 = vector.load %arg5[%c0_3, %c0_4] : memref<1x128xf32, #tpu.memory_space<vmem>>, vector<1x128xf32>
    %4 = vector.broadcast %3 : vector<1x128xf32> to vector<16x128xf32>
    %5 = arith.addf %2, %4 : vector<16x128xf32>
    %c0_5 = arith.constant 0 : index
    %c0_6 = arith.constant 0 : index
    %6 = vector.load %arg4[%c0_5, %c0_6] : memref<32x128xf32, #tpu.memory_space<vmem>>, vector<32x128xf32>
    %7 = tpu.iota {dimensions = array<i32: 1>} : vector<1x128xi32>
    %c64_i32 = arith.constant 64 : i32
    %8 = vector.broadcast %c64_i32 : i32 to vector<1x128xi32>
    %9 = arith.cmpi sge, %7, %8 : vector<1x128xi32>
    %c96_i32 = arith.constant 96 : i32
    %10 = vector.broadcast %c96_i32 : i32 to vector<1x128xi32>
    %11 = arith.cmpi slt, %7, %10 : vector<1x128xi32>
    %12 = arith.andi %9, %11 : vector<1x128xi1>
    %cst_7 = arith.constant 2.000000e+00 : f32
    %cst_8 = arith.constant 1.000000e+00 : f32
    %13 = vector.broadcast %cst_7 : f32 to vector<1x128xf32>
    %14 = vector.broadcast %cst_8 : f32 to vector<1x128xf32>
    %15 = arith.select %12, %13, %14 : vector<1x128xi1>, vector<1x128xf32>
    %cst_9 = arith.constant -1.000000e+00 : f32
    %cst_10 = arith.constant 0.000000e+00 : f32
    %16 = vector.broadcast %cst_9 : f32 to vector<1x128xf32>
    %17 = vector.broadcast %cst_10 : f32 to vector<1x128xf32>
    %18 = arith.select %12, %16, %17 : vector<1x128xi1>, vector<1x128xf32>
    %cst_11 = arith.constant 0.000000e+00 : f32
    %19 = vector.broadcast %cst_11 : f32 to vector<2x32xf32>
    %cst_12 = arith.constant 0.000000e+00 : f32
    %20 = vector.broadcast %cst_12 : f32 to vector<2x32xf32>
    %21 = vector.extract_strided_slice %5 {offsets = [0, 0], sizes = [2, 128], strides = [1, 1]} : vector<16x128xf32> to vector<2x128xf32>
    %cst_13 = arith.constant dense<0.000000e+00> : vector<2x128xf32>
    %22 = tpu.matmul %19, %6, %cst_13 {dimension_numbers = #tpu.dot_dimension_numbers<[1], [0], [0], [1], [0, 0, 1, 1], [], []>} : vector<2x32xf32>, vector<32x128xf32>, vector<2x128xf32> -> vector<2x128xf32>
    %23 = arith.addf %21, %22 : vector<2x128xf32>
    %24 = vector.broadcast %15 : vector<1x128xf32> to vector<2x128xf32>
    %25 = arith.mulf %23, %24 : vector<2x128xf32>
    %26 = arith.negf %25 : vector<2x128xf32>
    %27 = math.exp %26 : vector<2x128xf32>
    %cst_14 = arith.constant 1.000000e+00 : f32
    %28 = vector.broadcast %cst_14 : f32 to vector<2x128xf32>
    %29 = arith.addf %28, %27 : vector<2x128xf32>
    %30 = arith.divf %28, %29 : vector<2x128xf32>
    %31 = vector.broadcast %15 : vector<1x128xf32> to vector<2x128xf32>
    %32 = arith.mulf %30, %31 : vector<2x128xf32>
    %33 = vector.broadcast %18 : vector<1x128xf32> to vector<2x128xf32>
    %34 = arith.addf %32, %33 : vector<2x128xf32>
    %35 = vector.extract_strided_slice %34 {offsets = [0, 0], sizes = [2, 32], strides = [1, 1]} : vector<2x128xf32> to vector<2x32xf32>
    %36 = vector.extract_strided_slice %34 {offsets = [0, 32], sizes = [2, 32], strides = [1, 1]} : vector<2x128xf32> to vector<2x32xf32>
    %37 = vector.extract_strided_slice %34 {offsets = [0, 64], sizes = [2, 32], strides = [1, 1]} : vector<2x128xf32> to vector<2x32xf32>
    %38 = vector.extract_strided_slice %34 {offsets = [0, 96], sizes = [2, 32], strides = [1, 1]} : vector<2x128xf32> to vector<2x32xf32>
    %39 = arith.mulf %36, %20 : vector<2x32xf32>
    %40 = arith.mulf %35, %37 : vector<2x32xf32>
    %41 = arith.addf %39, %40 : vector<2x32xf32>
    %42 = math.tanh %41 : vector<2x32xf32>
    %43 = arith.mulf %38, %42 : vector<2x32xf32>
    %44 = vector.extract_strided_slice %5 {offsets = [2, 0], sizes = [2, 128], strides = [1, 1]} : vector<16x128xf32> to vector<2x128xf32>
    %cst_15 = arith.constant dense<0.000000e+00> : vector<2x128xf32>
    %45 = tpu.matmul %43, %6, %cst_15 {dimension_numbers = #tpu.dot_dimension_numbers<[1], [0], [0], [1], [0, 0, 1, 1], [], []>} : vector<2x32xf32>, vector<32x128xf32>, vector<2x128xf32> -> vector<2x128xf32>
    %46 = arith.addf %44, %45 : vector<2x128xf32>
    %47 = vector.broadcast %15 : vector<1x128xf32> to vector<2x128xf32>
    %48 = arith.mulf %46, %47 : vector<2x128xf32>
    %49 = arith.negf %48 : vector<2x128xf32>
    %50 = math.exp %49 : vector<2x128xf32>
    %cst_16 = arith.constant 1.000000e+00 : f32
    %51 = vector.broadcast %cst_16 : f32 to vector<2x128xf32>
    %52 = arith.addf %51, %50 : vector<2x128xf32>
    %53 = arith.divf %51, %52 : vector<2x128xf32>
    %54 = vector.broadcast %15 : vector<1x128xf32> to vector<2x128xf32>
    %55 = arith.mulf %53, %54 : vector<2x128xf32>
    %56 = vector.broadcast %18 : vector<1x128xf32> to vector<2x128xf32>
    %57 = arith.addf %55, %56 : vector<2x128xf32>
    %58 = vector.extract_strided_slice %57 {offsets = [0, 0], sizes = [2, 32], strides = [1, 1]} : vector<2x128xf32> to vector<2x32xf32>
    %59 = vector.extract_strided_slice %57 {offsets = [0, 32], sizes = [2, 32], strides = [1, 1]} : vector<2x128xf32> to vector<2x32xf32>
    %60 = vector.extract_strided_slice %57 {offsets = [0, 64], sizes = [2, 32], strides = [1, 1]} : vector<2x128xf32> to vector<2x32xf32>
    %61 = vector.extract_strided_slice %57 {offsets = [0, 96], sizes = [2, 32], strides = [1, 1]} : vector<2x128xf32> to vector<2x32xf32>
    %62 = arith.mulf %59, %41 : vector<2x32xf32>
    %63 = arith.mulf %58, %60 : vector<2x32xf32>
    %64 = arith.addf %62, %63 : vector<2x32xf32>
    %65 = math.tanh %64 : vector<2x32xf32>
    %66 = arith.mulf %61, %65 : vector<2x32xf32>
    %67 = vector.extract_strided_slice %5 {offsets = [4, 0], sizes = [2, 128], strides = [1, 1]} : vector<16x128xf32> to vector<2x128xf32>
    %cst_17 = arith.constant dense<0.000000e+00> : vector<2x128xf32>
    %68 = tpu.matmul %66, %6, %cst_17 {dimension_numbers = #tpu.dot_dimension_numbers<[1], [0], [0], [1], [0, 0, 1, 1], [], []>} : vector<2x32xf32>, vector<32x128xf32>, vector<2x128xf32> -> vector<2x128xf32>
    %69 = arith.addf %67, %68 : vector<2x128xf32>
    %70 = vector.broadcast %15 : vector<1x128xf32> to vector<2x128xf32>
    %71 = arith.mulf %69, %70 : vector<2x128xf32>
    %72 = arith.negf %71 : vector<2x128xf32>
    %73 = math.exp %72 : vector<2x128xf32>
    %cst_18 = arith.constant 1.000000e+00 : f32
    %74 = vector.broadcast %cst_18 : f32 to vector<2x128xf32>
    %75 = arith.addf %74, %73 : vector<2x128xf32>
    %76 = arith.divf %74, %75 : vector<2x128xf32>
    %77 = vector.broadcast %15 : vector<1x128xf32> to vector<2x128xf32>
    %78 = arith.mulf %76, %77 : vector<2x128xf32>
    %79 = vector.broadcast %18 : vector<1x128xf32> to vector<2x128xf32>
    %80 = arith.addf %78, %79 : vector<2x128xf32>
    %81 = vector.extract_strided_slice %80 {offsets = [0, 0], sizes = [2, 32], strides = [1, 1]} : vector<2x128xf32> to vector<2x32xf32>
    %82 = vector.extract_strided_slice %80 {offsets = [0, 32], sizes = [2, 32], strides = [1, 1]} : vector<2x128xf32> to vector<2x32xf32>
    %83 = vector.extract_strided_slice %80 {offsets = [0, 64], sizes = [2, 32], strides = [1, 1]} : vector<2x128xf32> to vector<2x32xf32>
    %84 = vector.extract_strided_slice %80 {offsets = [0, 96], sizes = [2, 32], strides = [1, 1]} : vector<2x128xf32> to vector<2x32xf32>
    %85 = arith.mulf %82, %64 : vector<2x32xf32>
    %86 = arith.mulf %81, %83 : vector<2x32xf32>
    %87 = arith.addf %85, %86 : vector<2x32xf32>
    %88 = math.tanh %87 : vector<2x32xf32>
    %89 = arith.mulf %84, %88 : vector<2x32xf32>
    %90 = vector.extract_strided_slice %5 {offsets = [6, 0], sizes = [2, 128], strides = [1, 1]} : vector<16x128xf32> to vector<2x128xf32>
    %cst_19 = arith.constant dense<0.000000e+00> : vector<2x128xf32>
    %91 = tpu.matmul %89, %6, %cst_19 {dimension_numbers = #tpu.dot_dimension_numbers<[1], [0], [0], [1], [0, 0, 1, 1], [], []>} : vector<2x32xf32>, vector<32x128xf32>, vector<2x128xf32> -> vector<2x128xf32>
    %92 = arith.addf %90, %91 : vector<2x128xf32>
    %93 = vector.broadcast %15 : vector<1x128xf32> to vector<2x128xf32>
    %94 = arith.mulf %92, %93 : vector<2x128xf32>
    %95 = arith.negf %94 : vector<2x128xf32>
    %96 = math.exp %95 : vector<2x128xf32>
    %cst_20 = arith.constant 1.000000e+00 : f32
    %97 = vector.broadcast %cst_20 : f32 to vector<2x128xf32>
    %98 = arith.addf %97, %96 : vector<2x128xf32>
    %99 = arith.divf %97, %98 : vector<2x128xf32>
    %100 = vector.broadcast %15 : vector<1x128xf32> to vector<2x128xf32>
    %101 = arith.mulf %99, %100 : vector<2x128xf32>
    %102 = vector.broadcast %18 : vector<1x128xf32> to vector<2x128xf32>
    %103 = arith.addf %101, %102 : vector<2x128xf32>
    %104 = vector.extract_strided_slice %103 {offsets = [0, 0], sizes = [2, 32], strides = [1, 1]} : vector<2x128xf32> to vector<2x32xf32>
    %105 = vector.extract_strided_slice %103 {offsets = [0, 32], sizes = [2, 32], strides = [1, 1]} : vector<2x128xf32> to vector<2x32xf32>
    %106 = vector.extract_strided_slice %103 {offsets = [0, 64], sizes = [2, 32], strides = [1, 1]} : vector<2x128xf32> to vector<2x32xf32>
    %107 = vector.extract_strided_slice %103 {offsets = [0, 96], sizes = [2, 32], strides = [1, 1]} : vector<2x128xf32> to vector<2x32xf32>
    %108 = arith.mulf %105, %87 : vector<2x32xf32>
    %109 = arith.mulf %104, %106 : vector<2x32xf32>
    %110 = arith.addf %108, %109 : vector<2x32xf32>
    %111 = math.tanh %110 : vector<2x32xf32>
    %112 = arith.mulf %107, %111 : vector<2x32xf32>
    %113 = vector.extract_strided_slice %5 {offsets = [8, 0], sizes = [2, 128], strides = [1, 1]} : vector<16x128xf32> to vector<2x128xf32>
    %cst_21 = arith.constant dense<0.000000e+00> : vector<2x128xf32>
    %114 = tpu.matmul %112, %6, %cst_21 {dimension_numbers = #tpu.dot_dimension_numbers<[1], [0], [0], [1], [0, 0, 1, 1], [], []>} : vector<2x32xf32>, vector<32x128xf32>, vector<2x128xf32> -> vector<2x128xf32>
    %115 = arith.addf %113, %114 : vector<2x128xf32>
    %116 = vector.broadcast %15 : vector<1x128xf32> to vector<2x128xf32>
    %117 = arith.mulf %115, %116 : vector<2x128xf32>
    %118 = arith.negf %117 : vector<2x128xf32>
    %119 = math.exp %118 : vector<2x128xf32>
    %cst_22 = arith.constant 1.000000e+00 : f32
    %120 = vector.broadcast %cst_22 : f32 to vector<2x128xf32>
    %121 = arith.addf %120, %119 : vector<2x128xf32>
    %122 = arith.divf %120, %121 : vector<2x128xf32>
    %123 = vector.broadcast %15 : vector<1x128xf32> to vector<2x128xf32>
    %124 = arith.mulf %122, %123 : vector<2x128xf32>
    %125 = vector.broadcast %18 : vector<1x128xf32> to vector<2x128xf32>
    %126 = arith.addf %124, %125 : vector<2x128xf32>
    %127 = vector.extract_strided_slice %126 {offsets = [0, 0], sizes = [2, 32], strides = [1, 1]} : vector<2x128xf32> to vector<2x32xf32>
    %128 = vector.extract_strided_slice %126 {offsets = [0, 32], sizes = [2, 32], strides = [1, 1]} : vector<2x128xf32> to vector<2x32xf32>
    %129 = vector.extract_strided_slice %126 {offsets = [0, 64], sizes = [2, 32], strides = [1, 1]} : vector<2x128xf32> to vector<2x32xf32>
    %130 = vector.extract_strided_slice %126 {offsets = [0, 96], sizes = [2, 32], strides = [1, 1]} : vector<2x128xf32> to vector<2x32xf32>
    %131 = arith.mulf %128, %110 : vector<2x32xf32>
    %132 = arith.mulf %127, %129 : vector<2x32xf32>
    %133 = arith.addf %131, %132 : vector<2x32xf32>
    %134 = math.tanh %133 : vector<2x32xf32>
    %135 = arith.mulf %130, %134 : vector<2x32xf32>
    %136 = vector.extract_strided_slice %5 {offsets = [10, 0], sizes = [2, 128], strides = [1, 1]} : vector<16x128xf32> to vector<2x128xf32>
    %cst_23 = arith.constant dense<0.000000e+00> : vector<2x128xf32>
    %137 = tpu.matmul %135, %6, %cst_23 {dimension_numbers = #tpu.dot_dimension_numbers<[1], [0], [0], [1], [0, 0, 1, 1], [], []>} : vector<2x32xf32>, vector<32x128xf32>, vector<2x128xf32> -> vector<2x128xf32>
    %138 = arith.addf %136, %137 : vector<2x128xf32>
    %139 = vector.broadcast %15 : vector<1x128xf32> to vector<2x128xf32>
    %140 = arith.mulf %138, %139 : vector<2x128xf32>
    %141 = arith.negf %140 : vector<2x128xf32>
    %142 = math.exp %141 : vector<2x128xf32>
    %cst_24 = arith.constant 1.000000e+00 : f32
    %143 = vector.broadcast %cst_24 : f32 to vector<2x128xf32>
    %144 = arith.addf %143, %142 : vector<2x128xf32>
    %145 = arith.divf %143, %144 : vector<2x128xf32>
    %146 = vector.broadcast %15 : vector<1x128xf32> to vector<2x128xf32>
    %147 = arith.mulf %145, %146 : vector<2x128xf32>
    %148 = vector.broadcast %18 : vector<1x128xf32> to vector<2x128xf32>
    %149 = arith.addf %147, %148 : vector<2x128xf32>
    %150 = vector.extract_strided_slice %149 {offsets = [0, 0], sizes = [2, 32], strides = [1, 1]} : vector<2x128xf32> to vector<2x32xf32>
    %151 = vector.extract_strided_slice %149 {offsets = [0, 32], sizes = [2, 32], strides = [1, 1]} : vector<2x128xf32> to vector<2x32xf32>
    %152 = vector.extract_strided_slice %149 {offsets = [0, 64], sizes = [2, 32], strides = [1, 1]} : vector<2x128xf32> to vector<2x32xf32>
    %153 = vector.extract_strided_slice %149 {offsets = [0, 96], sizes = [2, 32], strides = [1, 1]} : vector<2x128xf32> to vector<2x32xf32>
    %154 = arith.mulf %151, %133 : vector<2x32xf32>
    %155 = arith.mulf %150, %152 : vector<2x32xf32>
    %156 = arith.addf %154, %155 : vector<2x32xf32>
    %157 = math.tanh %156 : vector<2x32xf32>
    %158 = arith.mulf %153, %157 : vector<2x32xf32>
    %159 = vector.extract_strided_slice %5 {offsets = [12, 0], sizes = [2, 128], strides = [1, 1]} : vector<16x128xf32> to vector<2x128xf32>
    %cst_25 = arith.constant dense<0.000000e+00> : vector<2x128xf32>
    %160 = tpu.matmul %158, %6, %cst_25 {dimension_numbers = #tpu.dot_dimension_numbers<[1], [0], [0], [1], [0, 0, 1, 1], [], []>} : vector<2x32xf32>, vector<32x128xf32>, vector<2x128xf32> -> vector<2x128xf32>
    %161 = arith.addf %159, %160 : vector<2x128xf32>
    %162 = vector.broadcast %15 : vector<1x128xf32> to vector<2x128xf32>
    %163 = arith.mulf %161, %162 : vector<2x128xf32>
    %164 = arith.negf %163 : vector<2x128xf32>
    %165 = math.exp %164 : vector<2x128xf32>
    %cst_26 = arith.constant 1.000000e+00 : f32
    %166 = vector.broadcast %cst_26 : f32 to vector<2x128xf32>
    %167 = arith.addf %166, %165 : vector<2x128xf32>
    %168 = arith.divf %166, %167 : vector<2x128xf32>
    %169 = vector.broadcast %15 : vector<1x128xf32> to vector<2x128xf32>
    %170 = arith.mulf %168, %169 : vector<2x128xf32>
    %171 = vector.broadcast %18 : vector<1x128xf32> to vector<2x128xf32>
    %172 = arith.addf %170, %171 : vector<2x128xf32>
    %173 = vector.extract_strided_slice %172 {offsets = [0, 0], sizes = [2, 32], strides = [1, 1]} : vector<2x128xf32> to vector<2x32xf32>
    %174 = vector.extract_strided_slice %172 {offsets = [0, 32], sizes = [2, 32], strides = [1, 1]} : vector<2x128xf32> to vector<2x32xf32>
    %175 = vector.extract_strided_slice %172 {offsets = [0, 64], sizes = [2, 32], strides = [1, 1]} : vector<2x128xf32> to vector<2x32xf32>
    %176 = vector.extract_strided_slice %172 {offsets = [0, 96], sizes = [2, 32], strides = [1, 1]} : vector<2x128xf32> to vector<2x32xf32>
    %177 = arith.mulf %174, %156 : vector<2x32xf32>
    %178 = arith.mulf %173, %175 : vector<2x32xf32>
    %179 = arith.addf %177, %178 : vector<2x32xf32>
    %180 = math.tanh %179 : vector<2x32xf32>
    %181 = arith.mulf %176, %180 : vector<2x32xf32>
    %182 = vector.extract_strided_slice %5 {offsets = [14, 0], sizes = [2, 128], strides = [1, 1]} : vector<16x128xf32> to vector<2x128xf32>
    %cst_27 = arith.constant dense<0.000000e+00> : vector<2x128xf32>
    %183 = tpu.matmul %181, %6, %cst_27 {dimension_numbers = #tpu.dot_dimension_numbers<[1], [0], [0], [1], [0, 0, 1, 1], [], []>} : vector<2x32xf32>, vector<32x128xf32>, vector<2x128xf32> -> vector<2x128xf32>
    %184 = arith.addf %182, %183 : vector<2x128xf32>
    %185 = vector.broadcast %15 : vector<1x128xf32> to vector<2x128xf32>
    %186 = arith.mulf %184, %185 : vector<2x128xf32>
    %187 = arith.negf %186 : vector<2x128xf32>
    %188 = math.exp %187 : vector<2x128xf32>
    %cst_28 = arith.constant 1.000000e+00 : f32
    %189 = vector.broadcast %cst_28 : f32 to vector<2x128xf32>
    %190 = arith.addf %189, %188 : vector<2x128xf32>
    %191 = arith.divf %189, %190 : vector<2x128xf32>
    %192 = vector.broadcast %15 : vector<1x128xf32> to vector<2x128xf32>
    %193 = arith.mulf %191, %192 : vector<2x128xf32>
    %194 = vector.broadcast %18 : vector<1x128xf32> to vector<2x128xf32>
    %195 = arith.addf %193, %194 : vector<2x128xf32>
    %196 = vector.extract_strided_slice %195 {offsets = [0, 0], sizes = [2, 32], strides = [1, 1]} : vector<2x128xf32> to vector<2x32xf32>
    %197 = vector.extract_strided_slice %195 {offsets = [0, 32], sizes = [2, 32], strides = [1, 1]} : vector<2x128xf32> to vector<2x32xf32>
    %198 = vector.extract_strided_slice %195 {offsets = [0, 64], sizes = [2, 32], strides = [1, 1]} : vector<2x128xf32> to vector<2x32xf32>
    %199 = vector.extract_strided_slice %195 {offsets = [0, 96], sizes = [2, 32], strides = [1, 1]} : vector<2x128xf32> to vector<2x32xf32>
    %200 = arith.mulf %197, %179 : vector<2x32xf32>
    %201 = arith.mulf %196, %198 : vector<2x32xf32>
    %202 = arith.addf %200, %201 : vector<2x32xf32>
    %203 = math.tanh %202 : vector<2x32xf32>
    %204 = arith.mulf %199, %203 : vector<2x32xf32>
    %205 = tpu.concatenate %43, %66, %89, %112, %135, %158, %181, %204 in 0 : vector<2x32xf32>, vector<2x32xf32>, vector<2x32xf32>, vector<2x32xf32>, vector<2x32xf32>, vector<2x32xf32>, vector<2x32xf32>, vector<2x32xf32> -> vector<16x32xf32>
    %c0_29 = arith.constant 0 : index
    %c0_30 = arith.constant 0 : index
    %206 = vector.load %arg6[%c0_29, %c0_30] : memref<32x16xf32, #tpu.memory_space<vmem>>, vector<32x16xf32>
    %cst_31 = arith.constant dense<0.000000e+00> : vector<16x16xf32>
    %207 = tpu.matmul %205, %206, %cst_31 {dimension_numbers = #tpu.dot_dimension_numbers<[1], [0], [0], [1], [0, 0, 1, 1], [], []>} : vector<16x32xf32>, vector<32x16xf32>, vector<16x16xf32> -> vector<16x16xf32>
    %c0_32 = arith.constant 0 : index
    %c0_33 = arith.constant 0 : index
    %208 = vector.load %arg7[%c0_32, %c0_33] : memref<1x16xf32, #tpu.memory_space<vmem>>, vector<1x16xf32>
    %209 = vector.broadcast %208 : vector<1x16xf32> to vector<16x16xf32>
    %210 = arith.addf %207, %209 : vector<16x16xf32>
    %c0_34 = arith.constant 0 : index
    %c0_35 = arith.constant 0 : index
    %211 = vector.load %arg8[%c0_34, %c0_35] : memref<16x1xf32, #tpu.memory_space<vmem>>, vector<16x1xf32>
    %cst_36 = arith.constant dense<0.000000e+00> : vector<16x1xf32>
    %212 = tpu.matmul %210, %211, %cst_36 {dimension_numbers = #tpu.dot_dimension_numbers<[1], [0], [0], [1], [0, 0, 1, 1], [], []>} : vector<16x16xf32>, vector<16x1xf32>, vector<16x1xf32> -> vector<16x1xf32>
    %c0_37 = arith.constant 0 : index
    %c0_38 = arith.constant 0 : index
    %213 = vector.load %arg9[%c0_37, %c0_38] : memref<1x1xf32, #tpu.memory_space<vmem>>, vector<1x1xf32>
    %214 = vector.broadcast %213 : vector<1x1xf32> to vector<16x1xf32>
    %215 = arith.addf %212, %214 : vector<16x1xf32>
    %c0_39 = arith.constant 0 : index
    %c0_40 = arith.constant 0 : index
    %216 = vector.load %arg2[%c0_39, %c0_40] : memref<16x3xf32, #tpu.memory_space<vmem>>, vector<16x1xf32>
    %c0_41 = arith.constant 0 : index
    %c0_42 = arith.constant 0 : index
    %c0_43 = arith.constant 0 : index
    %217 = vector.load %arg10[%c0_41, %c0_42, %c0_43] : memref<3x2x8xf32, #tpu.memory_space<vmem>>, vector<1x2x8xf32>
    %218 = vector.shape_cast %217 : vector<1x2x8xf32> to vector<2x8xf32>
    %219 = vector.extract_strided_slice %218 {offsets = [0, 0], sizes = [1, 8], strides = [1, 1]} : vector<2x8xf32> to vector<1x8xf32>
    %220 = vector.broadcast %215 : vector<16x1xf32> to vector<16x8xf32>
    %221 = vector.broadcast %219 : vector<1x8xf32> to vector<16x8xf32>
    %222 = arith.mulf %220, %221 : vector<16x8xf32>
    %223 = vector.extract_strided_slice %218 {offsets = [1, 0], sizes = [1, 8], strides = [1, 1]} : vector<2x8xf32> to vector<1x8xf32>
    %224 = vector.broadcast %216 : vector<16x1xf32> to vector<16x8xf32>
    %225 = vector.broadcast %223 : vector<1x8xf32> to vector<16x8xf32>
    %226 = arith.mulf %224, %225 : vector<16x8xf32>
    %227 = arith.addf %222, %226 : vector<16x8xf32>
    %c0_44 = arith.constant 0 : index
    %c0_45 = arith.constant 0 : index
    %c0_46 = arith.constant 0 : index
    %228 = vector.load %arg11[%c0_44, %c0_45, %c0_46] : memref<3x1x8xf32, #tpu.memory_space<vmem>>, vector<1x1x8xf32>
    %229 = vector.shape_cast %228 : vector<1x1x8xf32> to vector<1x8xf32>
    %230 = vector.broadcast %229 : vector<1x8xf32> to vector<16x8xf32>
    %231 = arith.addf %227, %230 : vector<16x8xf32>
    %c0_47 = arith.constant 0 : index
    %c0_48 = arith.constant 0 : index
    %c0_49 = arith.constant 0 : index
    %232 = vector.load %arg12[%c0_47, %c0_48, %c0_49] : memref<3x8x64xf32, #tpu.memory_space<vmem>>, vector<1x8x64xf32>
    %233 = vector.shape_cast %232 : vector<1x8x64xf32> to vector<8x64xf32>
    %cst_50 = arith.constant dense<0.000000e+00> : vector<16x64xf32>
    %234 = tpu.matmul %231, %233, %cst_50 {dimension_numbers = #tpu.dot_dimension_numbers<[1], [0], [0], [1], [0, 0, 1, 1], [], []>} : vector<16x8xf32>, vector<8x64xf32>, vector<16x64xf32> -> vector<16x64xf32>
    %c0_51 = arith.constant 0 : index
    %c0_52 = arith.constant 0 : index
    %c0_53 = arith.constant 0 : index
    %235 = vector.load %arg14[%c0_51, %c0_52, %c0_53] : memref<3x1x64xf32, #tpu.memory_space<vmem>>, vector<1x1x64xf32>
    %236 = vector.shape_cast %235 : vector<1x1x64xf32> to vector<1x64xf32>
    %237 = vector.broadcast %236 : vector<1x64xf32> to vector<16x64xf32>
    %238 = arith.addf %234, %237 : vector<16x64xf32>
    %c0_54 = arith.constant 0 : index
    %c0_55 = arith.constant 0 : index
    %c0_56 = arith.constant 0 : index
    %239 = vector.load %arg13[%c0_54, %c0_55, %c0_56] : memref<3x16x64xf32, #tpu.memory_space<vmem>>, vector<1x16x64xf32>
    %240 = vector.shape_cast %239 : vector<1x16x64xf32> to vector<16x64xf32>
    %241 = tpu.iota {dimensions = array<i32: 1>} : vector<1x64xi32>
    %c32_i32 = arith.constant 32 : i32
    %242 = vector.broadcast %c32_i32 : i32 to vector<1x64xi32>
    %243 = arith.cmpi sge, %241, %242 : vector<1x64xi32>
    %c48_i32 = arith.constant 48 : i32
    %244 = vector.broadcast %c48_i32 : i32 to vector<1x64xi32>
    %245 = arith.cmpi slt, %241, %244 : vector<1x64xi32>
    %246 = arith.andi %243, %245 : vector<1x64xi1>
    %cst_57 = arith.constant 2.000000e+00 : f32
    %cst_58 = arith.constant 1.000000e+00 : f32
    %247 = vector.broadcast %cst_57 : f32 to vector<1x64xf32>
    %248 = vector.broadcast %cst_58 : f32 to vector<1x64xf32>
    %249 = arith.select %246, %247, %248 : vector<1x64xi1>, vector<1x64xf32>
    %cst_59 = arith.constant -1.000000e+00 : f32
    %cst_60 = arith.constant 0.000000e+00 : f32
    %250 = vector.broadcast %cst_59 : f32 to vector<1x64xf32>
    %251 = vector.broadcast %cst_60 : f32 to vector<1x64xf32>
    %252 = arith.select %246, %250, %251 : vector<1x64xi1>, vector<1x64xf32>
    %cst_61 = arith.constant 0.000000e+00 : f32
    %253 = vector.broadcast %cst_61 : f32 to vector<2x16xf32>
    %cst_62 = arith.constant 0.000000e+00 : f32
    %254 = vector.broadcast %cst_62 : f32 to vector<2x16xf32>
    %255 = vector.extract_strided_slice %238 {offsets = [0, 0], sizes = [2, 64], strides = [1, 1]} : vector<16x64xf32> to vector<2x64xf32>
    %cst_63 = arith.constant dense<0.000000e+00> : vector<2x64xf32>
    %256 = tpu.matmul %253, %240, %cst_63 {dimension_numbers = #tpu.dot_dimension_numbers<[1], [0], [0], [1], [0, 0, 1, 1], [], []>} : vector<2x16xf32>, vector<16x64xf32>, vector<2x64xf32> -> vector<2x64xf32>
    %257 = arith.addf %255, %256 : vector<2x64xf32>
    %258 = vector.broadcast %249 : vector<1x64xf32> to vector<2x64xf32>
    %259 = arith.mulf %257, %258 : vector<2x64xf32>
    %260 = arith.negf %259 : vector<2x64xf32>
    %261 = math.exp %260 : vector<2x64xf32>
    %cst_64 = arith.constant 1.000000e+00 : f32
    %262 = vector.broadcast %cst_64 : f32 to vector<2x64xf32>
    %263 = arith.addf %262, %261 : vector<2x64xf32>
    %264 = arith.divf %262, %263 : vector<2x64xf32>
    %265 = vector.broadcast %249 : vector<1x64xf32> to vector<2x64xf32>
    %266 = arith.mulf %264, %265 : vector<2x64xf32>
    %267 = vector.broadcast %252 : vector<1x64xf32> to vector<2x64xf32>
    %268 = arith.addf %266, %267 : vector<2x64xf32>
    %269 = vector.extract_strided_slice %268 {offsets = [0, 0], sizes = [2, 16], strides = [1, 1]} : vector<2x64xf32> to vector<2x16xf32>
    %270 = vector.extract_strided_slice %268 {offsets = [0, 16], sizes = [2, 16], strides = [1, 1]} : vector<2x64xf32> to vector<2x16xf32>
    %271 = vector.extract_strided_slice %268 {offsets = [0, 32], sizes = [2, 16], strides = [1, 1]} : vector<2x64xf32> to vector<2x16xf32>
    %272 = vector.extract_strided_slice %268 {offsets = [0, 48], sizes = [2, 16], strides = [1, 1]} : vector<2x64xf32> to vector<2x16xf32>
    %273 = arith.mulf %270, %254 : vector<2x16xf32>
    %274 = arith.mulf %269, %271 : vector<2x16xf32>
    %275 = arith.addf %273, %274 : vector<2x16xf32>
    %276 = math.tanh %275 : vector<2x16xf32>
    %277 = arith.mulf %272, %276 : vector<2x16xf32>
    %278 = vector.extract_strided_slice %238 {offsets = [2, 0], sizes = [2, 64], strides = [1, 1]} : vector<16x64xf32> to vector<2x64xf32>
    %cst_65 = arith.constant dense<0.000000e+00> : vector<2x64xf32>
    %279 = tpu.matmul %277, %240, %cst_65 {dimension_numbers = #tpu.dot_dimension_numbers<[1], [0], [0], [1], [0, 0, 1, 1], [], []>} : vector<2x16xf32>, vector<16x64xf32>, vector<2x64xf32> -> vector<2x64xf32>
    %280 = arith.addf %278, %279 : vector<2x64xf32>
    %281 = vector.broadcast %249 : vector<1x64xf32> to vector<2x64xf32>
    %282 = arith.mulf %280, %281 : vector<2x64xf32>
    %283 = arith.negf %282 : vector<2x64xf32>
    %284 = math.exp %283 : vector<2x64xf32>
    %cst_66 = arith.constant 1.000000e+00 : f32
    %285 = vector.broadcast %cst_66 : f32 to vector<2x64xf32>
    %286 = arith.addf %285, %284 : vector<2x64xf32>
    %287 = arith.divf %285, %286 : vector<2x64xf32>
    %288 = vector.broadcast %249 : vector<1x64xf32> to vector<2x64xf32>
    %289 = arith.mulf %287, %288 : vector<2x64xf32>
    %290 = vector.broadcast %252 : vector<1x64xf32> to vector<2x64xf32>
    %291 = arith.addf %289, %290 : vector<2x64xf32>
    %292 = vector.extract_strided_slice %291 {offsets = [0, 0], sizes = [2, 16], strides = [1, 1]} : vector<2x64xf32> to vector<2x16xf32>
    %293 = vector.extract_strided_slice %291 {offsets = [0, 16], sizes = [2, 16], strides = [1, 1]} : vector<2x64xf32> to vector<2x16xf32>
    %294 = vector.extract_strided_slice %291 {offsets = [0, 32], sizes = [2, 16], strides = [1, 1]} : vector<2x64xf32> to vector<2x16xf32>
    %295 = vector.extract_strided_slice %291 {offsets = [0, 48], sizes = [2, 16], strides = [1, 1]} : vector<2x64xf32> to vector<2x16xf32>
    %296 = arith.mulf %293, %275 : vector<2x16xf32>
    %297 = arith.mulf %292, %294 : vector<2x16xf32>
    %298 = arith.addf %296, %297 : vector<2x16xf32>
    %299 = math.tanh %298 : vector<2x16xf32>
    %300 = arith.mulf %295, %299 : vector<2x16xf32>
    %301 = vector.extract_strided_slice %238 {offsets = [4, 0], sizes = [2, 64], strides = [1, 1]} : vector<16x64xf32> to vector<2x64xf32>
    %cst_67 = arith.constant dense<0.000000e+00> : vector<2x64xf32>
    %302 = tpu.matmul %300, %240, %cst_67 {dimension_numbers = #tpu.dot_dimension_numbers<[1], [0], [0], [1], [0, 0, 1, 1], [], []>} : vector<2x16xf32>, vector<16x64xf32>, vector<2x64xf32> -> vector<2x64xf32>
    %303 = arith.addf %301, %302 : vector<2x64xf32>
    %304 = vector.broadcast %249 : vector<1x64xf32> to vector<2x64xf32>
    %305 = arith.mulf %303, %304 : vector<2x64xf32>
    %306 = arith.negf %305 : vector<2x64xf32>
    %307 = math.exp %306 : vector<2x64xf32>
    %cst_68 = arith.constant 1.000000e+00 : f32
    %308 = vector.broadcast %cst_68 : f32 to vector<2x64xf32>
    %309 = arith.addf %308, %307 : vector<2x64xf32>
    %310 = arith.divf %308, %309 : vector<2x64xf32>
    %311 = vector.broadcast %249 : vector<1x64xf32> to vector<2x64xf32>
    %312 = arith.mulf %310, %311 : vector<2x64xf32>
    %313 = vector.broadcast %252 : vector<1x64xf32> to vector<2x64xf32>
    %314 = arith.addf %312, %313 : vector<2x64xf32>
    %315 = vector.extract_strided_slice %314 {offsets = [0, 0], sizes = [2, 16], strides = [1, 1]} : vector<2x64xf32> to vector<2x16xf32>
    %316 = vector.extract_strided_slice %314 {offsets = [0, 16], sizes = [2, 16], strides = [1, 1]} : vector<2x64xf32> to vector<2x16xf32>
    %317 = vector.extract_strided_slice %314 {offsets = [0, 32], sizes = [2, 16], strides = [1, 1]} : vector<2x64xf32> to vector<2x16xf32>
    %318 = vector.extract_strided_slice %314 {offsets = [0, 48], sizes = [2, 16], strides = [1, 1]} : vector<2x64xf32> to vector<2x16xf32>
    %319 = arith.mulf %316, %298 : vector<2x16xf32>
    %320 = arith.mulf %315, %317 : vector<2x16xf32>
    %321 = arith.addf %319, %320 : vector<2x16xf32>
    %322 = math.tanh %321 : vector<2x16xf32>
    %323 = arith.mulf %318, %322 : vector<2x16xf32>
    %324 = vector.extract_strided_slice %238 {offsets = [6, 0], sizes = [2, 64], strides = [1, 1]} : vector<16x64xf32> to vector<2x64xf32>
    %cst_69 = arith.constant dense<0.000000e+00> : vector<2x64xf32>
    %325 = tpu.matmul %323, %240, %cst_69 {dimension_numbers = #tpu.dot_dimension_numbers<[1], [0], [0], [1], [0, 0, 1, 1], [], []>} : vector<2x16xf32>, vector<16x64xf32>, vector<2x64xf32> -> vector<2x64xf32>
    %326 = arith.addf %324, %325 : vector<2x64xf32>
    %327 = vector.broadcast %249 : vector<1x64xf32> to vector<2x64xf32>
    %328 = arith.mulf %326, %327 : vector<2x64xf32>
    %329 = arith.negf %328 : vector<2x64xf32>
    %330 = math.exp %329 : vector<2x64xf32>
    %cst_70 = arith.constant 1.000000e+00 : f32
    %331 = vector.broadcast %cst_70 : f32 to vector<2x64xf32>
    %332 = arith.addf %331, %330 : vector<2x64xf32>
    %333 = arith.divf %331, %332 : vector<2x64xf32>
    %334 = vector.broadcast %249 : vector<1x64xf32> to vector<2x64xf32>
    %335 = arith.mulf %333, %334 : vector<2x64xf32>
    %336 = vector.broadcast %252 : vector<1x64xf32> to vector<2x64xf32>
    %337 = arith.addf %335, %336 : vector<2x64xf32>
    %338 = vector.extract_strided_slice %337 {offsets = [0, 0], sizes = [2, 16], strides = [1, 1]} : vector<2x64xf32> to vector<2x16xf32>
    %339 = vector.extract_strided_slice %337 {offsets = [0, 16], sizes = [2, 16], strides = [1, 1]} : vector<2x64xf32> to vector<2x16xf32>
    %340 = vector.extract_strided_slice %337 {offsets = [0, 32], sizes = [2, 16], strides = [1, 1]} : vector<2x64xf32> to vector<2x16xf32>
    %341 = vector.extract_strided_slice %337 {offsets = [0, 48], sizes = [2, 16], strides = [1, 1]} : vector<2x64xf32> to vector<2x16xf32>
    %342 = arith.mulf %339, %321 : vector<2x16xf32>
    %343 = arith.mulf %338, %340 : vector<2x16xf32>
    %344 = arith.addf %342, %343 : vector<2x16xf32>
    %345 = math.tanh %344 : vector<2x16xf32>
    %346 = arith.mulf %341, %345 : vector<2x16xf32>
    %347 = vector.extract_strided_slice %238 {offsets = [8, 0], sizes = [2, 64], strides = [1, 1]} : vector<16x64xf32> to vector<2x64xf32>
    %cst_71 = arith.constant dense<0.000000e+00> : vector<2x64xf32>
    %348 = tpu.matmul %346, %240, %cst_71 {dimension_numbers = #tpu.dot_dimension_numbers<[1], [0], [0], [1], [0, 0, 1, 1], [], []>} : vector<2x16xf32>, vector<16x64xf32>, vector<2x64xf32> -> vector<2x64xf32>
    %349 = arith.addf %347, %348 : vector<2x64xf32>
    %350 = vector.broadcast %249 : vector<1x64xf32> to vector<2x64xf32>
    %351 = arith.mulf %349, %350 : vector<2x64xf32>
    %352 = arith.negf %351 : vector<2x64xf32>
    %353 = math.exp %352 : vector<2x64xf32>
    %cst_72 = arith.constant 1.000000e+00 : f32
    %354 = vector.broadcast %cst_72 : f32 to vector<2x64xf32>
    %355 = arith.addf %354, %353 : vector<2x64xf32>
    %356 = arith.divf %354, %355 : vector<2x64xf32>
    %357 = vector.broadcast %249 : vector<1x64xf32> to vector<2x64xf32>
    %358 = arith.mulf %356, %357 : vector<2x64xf32>
    %359 = vector.broadcast %252 : vector<1x64xf32> to vector<2x64xf32>
    %360 = arith.addf %358, %359 : vector<2x64xf32>
    %361 = vector.extract_strided_slice %360 {offsets = [0, 0], sizes = [2, 16], strides = [1, 1]} : vector<2x64xf32> to vector<2x16xf32>
    %362 = vector.extract_strided_slice %360 {offsets = [0, 16], sizes = [2, 16], strides = [1, 1]} : vector<2x64xf32> to vector<2x16xf32>
    %363 = vector.extract_strided_slice %360 {offsets = [0, 32], sizes = [2, 16], strides = [1, 1]} : vector<2x64xf32> to vector<2x16xf32>
    %364 = vector.extract_strided_slice %360 {offsets = [0, 48], sizes = [2, 16], strides = [1, 1]} : vector<2x64xf32> to vector<2x16xf32>
    %365 = arith.mulf %362, %344 : vector<2x16xf32>
    %366 = arith.mulf %361, %363 : vector<2x16xf32>
    %367 = arith.addf %365, %366 : vector<2x16xf32>
    %368 = math.tanh %367 : vector<2x16xf32>
    %369 = arith.mulf %364, %368 : vector<2x16xf32>
    %370 = vector.extract_strided_slice %238 {offsets = [10, 0], sizes = [2, 64], strides = [1, 1]} : vector<16x64xf32> to vector<2x64xf32>
    %cst_73 = arith.constant dense<0.000000e+00> : vector<2x64xf32>
    %371 = tpu.matmul %369, %240, %cst_73 {dimension_numbers = #tpu.dot_dimension_numbers<[1], [0], [0], [1], [0, 0, 1, 1], [], []>} : vector<2x16xf32>, vector<16x64xf32>, vector<2x64xf32> -> vector<2x64xf32>
    %372 = arith.addf %370, %371 : vector<2x64xf32>
    %373 = vector.broadcast %249 : vector<1x64xf32> to vector<2x64xf32>
    %374 = arith.mulf %372, %373 : vector<2x64xf32>
    %375 = arith.negf %374 : vector<2x64xf32>
    %376 = math.exp %375 : vector<2x64xf32>
    %cst_74 = arith.constant 1.000000e+00 : f32
    %377 = vector.broadcast %cst_74 : f32 to vector<2x64xf32>
    %378 = arith.addf %377, %376 : vector<2x64xf32>
    %379 = arith.divf %377, %378 : vector<2x64xf32>
    %380 = vector.broadcast %249 : vector<1x64xf32> to vector<2x64xf32>
    %381 = arith.mulf %379, %380 : vector<2x64xf32>
    %382 = vector.broadcast %252 : vector<1x64xf32> to vector<2x64xf32>
    %383 = arith.addf %381, %382 : vector<2x64xf32>
    %384 = vector.extract_strided_slice %383 {offsets = [0, 0], sizes = [2, 16], strides = [1, 1]} : vector<2x64xf32> to vector<2x16xf32>
    %385 = vector.extract_strided_slice %383 {offsets = [0, 16], sizes = [2, 16], strides = [1, 1]} : vector<2x64xf32> to vector<2x16xf32>
    %386 = vector.extract_strided_slice %383 {offsets = [0, 32], sizes = [2, 16], strides = [1, 1]} : vector<2x64xf32> to vector<2x16xf32>
    %387 = vector.extract_strided_slice %383 {offsets = [0, 48], sizes = [2, 16], strides = [1, 1]} : vector<2x64xf32> to vector<2x16xf32>
    %388 = arith.mulf %385, %367 : vector<2x16xf32>
    %389 = arith.mulf %384, %386 : vector<2x16xf32>
    %390 = arith.addf %388, %389 : vector<2x16xf32>
    %391 = math.tanh %390 : vector<2x16xf32>
    %392 = arith.mulf %387, %391 : vector<2x16xf32>
    %393 = vector.extract_strided_slice %238 {offsets = [12, 0], sizes = [2, 64], strides = [1, 1]} : vector<16x64xf32> to vector<2x64xf32>
    %cst_75 = arith.constant dense<0.000000e+00> : vector<2x64xf32>
    %394 = tpu.matmul %392, %240, %cst_75 {dimension_numbers = #tpu.dot_dimension_numbers<[1], [0], [0], [1], [0, 0, 1, 1], [], []>} : vector<2x16xf32>, vector<16x64xf32>, vector<2x64xf32> -> vector<2x64xf32>
    %395 = arith.addf %393, %394 : vector<2x64xf32>
    %396 = vector.broadcast %249 : vector<1x64xf32> to vector<2x64xf32>
    %397 = arith.mulf %395, %396 : vector<2x64xf32>
    %398 = arith.negf %397 : vector<2x64xf32>
    %399 = math.exp %398 : vector<2x64xf32>
    %cst_76 = arith.constant 1.000000e+00 : f32
    %400 = vector.broadcast %cst_76 : f32 to vector<2x64xf32>
    %401 = arith.addf %400, %399 : vector<2x64xf32>
    %402 = arith.divf %400, %401 : vector<2x64xf32>
    %403 = vector.broadcast %249 : vector<1x64xf32> to vector<2x64xf32>
    %404 = arith.mulf %402, %403 : vector<2x64xf32>
    %405 = vector.broadcast %252 : vector<1x64xf32> to vector<2x64xf32>
    %406 = arith.addf %404, %405 : vector<2x64xf32>
    %407 = vector.extract_strided_slice %406 {offsets = [0, 0], sizes = [2, 16], strides = [1, 1]} : vector<2x64xf32> to vector<2x16xf32>
    %408 = vector.extract_strided_slice %406 {offsets = [0, 16], sizes = [2, 16], strides = [1, 1]} : vector<2x64xf32> to vector<2x16xf32>
    %409 = vector.extract_strided_slice %406 {offsets = [0, 32], sizes = [2, 16], strides = [1, 1]} : vector<2x64xf32> to vector<2x16xf32>
    %410 = vector.extract_strided_slice %406 {offsets = [0, 48], sizes = [2, 16], strides = [1, 1]} : vector<2x64xf32> to vector<2x16xf32>
    %411 = arith.mulf %408, %390 : vector<2x16xf32>
    %412 = arith.mulf %407, %409 : vector<2x16xf32>
    %413 = arith.addf %411, %412 : vector<2x16xf32>
    %414 = math.tanh %413 : vector<2x16xf32>
    %415 = arith.mulf %410, %414 : vector<2x16xf32>
    %416 = vector.extract_strided_slice %238 {offsets = [14, 0], sizes = [2, 64], strides = [1, 1]} : vector<16x64xf32> to vector<2x64xf32>
    %cst_77 = arith.constant dense<0.000000e+00> : vector<2x64xf32>
    %417 = tpu.matmul %415, %240, %cst_77 {dimension_numbers = #tpu.dot_dimension_numbers<[1], [0], [0], [1], [0, 0, 1, 1], [], []>} : vector<2x16xf32>, vector<16x64xf32>, vector<2x64xf32> -> vector<2x64xf32>
    %418 = arith.addf %416, %417 : vector<2x64xf32>
    %419 = vector.broadcast %249 : vector<1x64xf32> to vector<2x64xf32>
    %420 = arith.mulf %418, %419 : vector<2x64xf32>
    %421 = arith.negf %420 : vector<2x64xf32>
    %422 = math.exp %421 : vector<2x64xf32>
    %cst_78 = arith.constant 1.000000e+00 : f32
    %423 = vector.broadcast %cst_78 : f32 to vector<2x64xf32>
    %424 = arith.addf %423, %422 : vector<2x64xf32>
    %425 = arith.divf %423, %424 : vector<2x64xf32>
    %426 = vector.broadcast %249 : vector<1x64xf32> to vector<2x64xf32>
    %427 = arith.mulf %425, %426 : vector<2x64xf32>
    %428 = vector.broadcast %252 : vector<1x64xf32> to vector<2x64xf32>
    %429 = arith.addf %427, %428 : vector<2x64xf32>
    %430 = vector.extract_strided_slice %429 {offsets = [0, 0], sizes = [2, 16], strides = [1, 1]} : vector<2x64xf32> to vector<2x16xf32>
    %431 = vector.extract_strided_slice %429 {offsets = [0, 16], sizes = [2, 16], strides = [1, 1]} : vector<2x64xf32> to vector<2x16xf32>
    %432 = vector.extract_strided_slice %429 {offsets = [0, 32], sizes = [2, 16], strides = [1, 1]} : vector<2x64xf32> to vector<2x16xf32>
    %433 = vector.extract_strided_slice %429 {offsets = [0, 48], sizes = [2, 16], strides = [1, 1]} : vector<2x64xf32> to vector<2x16xf32>
    %434 = arith.mulf %431, %413 : vector<2x16xf32>
    %435 = arith.mulf %430, %432 : vector<2x16xf32>
    %436 = arith.addf %434, %435 : vector<2x16xf32>
    %437 = math.tanh %436 : vector<2x16xf32>
    %438 = arith.mulf %433, %437 : vector<2x16xf32>
    %439 = tpu.concatenate %277, %300, %323, %346, %369, %392, %415, %438 in 0 : vector<2x16xf32>, vector<2x16xf32>, vector<2x16xf32>, vector<2x16xf32>, vector<2x16xf32>, vector<2x16xf32>, vector<2x16xf32>, vector<2x16xf32> -> vector<16x16xf32>
    %c0_79 = arith.constant 0 : index
    %c0_80 = arith.constant 0 : index
    %c0_81 = arith.constant 0 : index
    %440 = vector.load %arg15[%c0_79, %c0_80, %c0_81] : memref<3x16x8xf32, #tpu.memory_space<vmem>>, vector<1x16x8xf32>
    %441 = vector.shape_cast %440 : vector<1x16x8xf32> to vector<16x8xf32>
    %cst_82 = arith.constant dense<0.000000e+00> : vector<16x8xf32>
    %442 = tpu.matmul %439, %441, %cst_82 {dimension_numbers = #tpu.dot_dimension_numbers<[1], [0], [0], [1], [0, 0, 1, 1], [], []>} : vector<16x16xf32>, vector<16x8xf32>, vector<16x8xf32> -> vector<16x8xf32>
    %c0_83 = arith.constant 0 : index
    %c0_84 = arith.constant 0 : index
    %c0_85 = arith.constant 0 : index
    %443 = vector.load %arg16[%c0_83, %c0_84, %c0_85] : memref<3x1x8xf32, #tpu.memory_space<vmem>>, vector<1x1x8xf32>
    %444 = vector.shape_cast %443 : vector<1x1x8xf32> to vector<1x8xf32>
    %445 = vector.broadcast %444 : vector<1x8xf32> to vector<16x8xf32>
    %446 = arith.addf %442, %445 : vector<16x8xf32>
    %c0_86 = arith.constant 0 : index
    %c0_87 = arith.constant 0 : index
    %c0_88 = arith.constant 0 : index
    %447 = vector.load %arg17[%c0_86, %c0_87, %c0_88] : memref<3x8x1xf32, #tpu.memory_space<vmem>>, vector<1x8x1xf32>
    %448 = vector.shape_cast %447 : vector<1x8x1xf32> to vector<8x1xf32>
    %cst_89 = arith.constant dense<0.000000e+00> : vector<16x1xf32>
    %449 = tpu.matmul %446, %448, %cst_89 {dimension_numbers = #tpu.dot_dimension_numbers<[1], [0], [0], [1], [0, 0, 1, 1], [], []>} : vector<16x8xf32>, vector<8x1xf32>, vector<16x1xf32> -> vector<16x1xf32>
    %c0_90 = arith.constant 0 : index
    %c0_91 = arith.constant 0 : index
    %c0_92 = arith.constant 0 : index
    %450 = vector.load %arg18[%c0_90, %c0_91, %c0_92] : memref<3x1x1xf32, #tpu.memory_space<vmem>>, vector<1x1x1xf32>
    %451 = vector.shape_cast %450 : vector<1x1x1xf32> to vector<1x1xf32>
    %452 = vector.broadcast %451 : vector<1x1xf32> to vector<16x1xf32>
    %453 = arith.addf %449, %452 : vector<16x1xf32>
    %c0_93 = arith.constant 0 : index
    %c1 = arith.constant 1 : index
    %454 = vector.load %arg2[%c0_93, %c1] : memref<16x3xf32, #tpu.memory_space<vmem>>, vector<16x1xf32>
    %c1_94 = arith.constant 1 : index
    %c0_95 = arith.constant 0 : index
    %c0_96 = arith.constant 0 : index
    %455 = vector.load %arg10[%c1_94, %c0_95, %c0_96] : memref<3x2x8xf32, #tpu.memory_space<vmem>>, vector<1x2x8xf32>
    %456 = vector.shape_cast %455 : vector<1x2x8xf32> to vector<2x8xf32>
    %457 = vector.extract_strided_slice %456 {offsets = [0, 0], sizes = [1, 8], strides = [1, 1]} : vector<2x8xf32> to vector<1x8xf32>
    %458 = vector.broadcast %453 : vector<16x1xf32> to vector<16x8xf32>
    %459 = vector.broadcast %457 : vector<1x8xf32> to vector<16x8xf32>
    %460 = arith.mulf %458, %459 : vector<16x8xf32>
    %461 = vector.extract_strided_slice %456 {offsets = [1, 0], sizes = [1, 8], strides = [1, 1]} : vector<2x8xf32> to vector<1x8xf32>
    %462 = vector.broadcast %454 : vector<16x1xf32> to vector<16x8xf32>
    %463 = vector.broadcast %461 : vector<1x8xf32> to vector<16x8xf32>
    %464 = arith.mulf %462, %463 : vector<16x8xf32>
    %465 = arith.addf %460, %464 : vector<16x8xf32>
    %c1_97 = arith.constant 1 : index
    %c0_98 = arith.constant 0 : index
    %c0_99 = arith.constant 0 : index
    %466 = vector.load %arg11[%c1_97, %c0_98, %c0_99] : memref<3x1x8xf32, #tpu.memory_space<vmem>>, vector<1x1x8xf32>
    %467 = vector.shape_cast %466 : vector<1x1x8xf32> to vector<1x8xf32>
    %468 = vector.broadcast %467 : vector<1x8xf32> to vector<16x8xf32>
    %469 = arith.addf %465, %468 : vector<16x8xf32>
    %c1_100 = arith.constant 1 : index
    %c0_101 = arith.constant 0 : index
    %c0_102 = arith.constant 0 : index
    %470 = vector.load %arg12[%c1_100, %c0_101, %c0_102] : memref<3x8x64xf32, #tpu.memory_space<vmem>>, vector<1x8x64xf32>
    %471 = vector.shape_cast %470 : vector<1x8x64xf32> to vector<8x64xf32>
    %cst_103 = arith.constant dense<0.000000e+00> : vector<16x64xf32>
    %472 = tpu.matmul %469, %471, %cst_103 {dimension_numbers = #tpu.dot_dimension_numbers<[1], [0], [0], [1], [0, 0, 1, 1], [], []>} : vector<16x8xf32>, vector<8x64xf32>, vector<16x64xf32> -> vector<16x64xf32>
    %c1_104 = arith.constant 1 : index
    %c0_105 = arith.constant 0 : index
    %c0_106 = arith.constant 0 : index
    %473 = vector.load %arg14[%c1_104, %c0_105, %c0_106] : memref<3x1x64xf32, #tpu.memory_space<vmem>>, vector<1x1x64xf32>
    %474 = vector.shape_cast %473 : vector<1x1x64xf32> to vector<1x64xf32>
    %475 = vector.broadcast %474 : vector<1x64xf32> to vector<16x64xf32>
    %476 = arith.addf %472, %475 : vector<16x64xf32>
    %c1_107 = arith.constant 1 : index
    %c0_108 = arith.constant 0 : index
    %c0_109 = arith.constant 0 : index
    %477 = vector.load %arg13[%c1_107, %c0_108, %c0_109] : memref<3x16x64xf32, #tpu.memory_space<vmem>>, vector<1x16x64xf32>
    %478 = vector.shape_cast %477 : vector<1x16x64xf32> to vector<16x64xf32>
    %479 = tpu.iota {dimensions = array<i32: 1>} : vector<1x64xi32>
    %c32_i32_110 = arith.constant 32 : i32
    %480 = vector.broadcast %c32_i32_110 : i32 to vector<1x64xi32>
    %481 = arith.cmpi sge, %479, %480 : vector<1x64xi32>
    %c48_i32_111 = arith.constant 48 : i32
    %482 = vector.broadcast %c48_i32_111 : i32 to vector<1x64xi32>
    %483 = arith.cmpi slt, %479, %482 : vector<1x64xi32>
    %484 = arith.andi %481, %483 : vector<1x64xi1>
    %cst_112 = arith.constant 2.000000e+00 : f32
    %cst_113 = arith.constant 1.000000e+00 : f32
    %485 = vector.broadcast %cst_112 : f32 to vector<1x64xf32>
    %486 = vector.broadcast %cst_113 : f32 to vector<1x64xf32>
    %487 = arith.select %484, %485, %486 : vector<1x64xi1>, vector<1x64xf32>
    %cst_114 = arith.constant -1.000000e+00 : f32
    %cst_115 = arith.constant 0.000000e+00 : f32
    %488 = vector.broadcast %cst_114 : f32 to vector<1x64xf32>
    %489 = vector.broadcast %cst_115 : f32 to vector<1x64xf32>
    %490 = arith.select %484, %488, %489 : vector<1x64xi1>, vector<1x64xf32>
    %cst_116 = arith.constant 0.000000e+00 : f32
    %491 = vector.broadcast %cst_116 : f32 to vector<2x16xf32>
    %cst_117 = arith.constant 0.000000e+00 : f32
    %492 = vector.broadcast %cst_117 : f32 to vector<2x16xf32>
    %493 = vector.extract_strided_slice %476 {offsets = [0, 0], sizes = [2, 64], strides = [1, 1]} : vector<16x64xf32> to vector<2x64xf32>
    %cst_118 = arith.constant dense<0.000000e+00> : vector<2x64xf32>
    %494 = tpu.matmul %491, %478, %cst_118 {dimension_numbers = #tpu.dot_dimension_numbers<[1], [0], [0], [1], [0, 0, 1, 1], [], []>} : vector<2x16xf32>, vector<16x64xf32>, vector<2x64xf32> -> vector<2x64xf32>
    %495 = arith.addf %493, %494 : vector<2x64xf32>
    %496 = vector.broadcast %487 : vector<1x64xf32> to vector<2x64xf32>
    %497 = arith.mulf %495, %496 : vector<2x64xf32>
    %498 = arith.negf %497 : vector<2x64xf32>
    %499 = math.exp %498 : vector<2x64xf32>
    %cst_119 = arith.constant 1.000000e+00 : f32
    %500 = vector.broadcast %cst_119 : f32 to vector<2x64xf32>
    %501 = arith.addf %500, %499 : vector<2x64xf32>
    %502 = arith.divf %500, %501 : vector<2x64xf32>
    %503 = vector.broadcast %487 : vector<1x64xf32> to vector<2x64xf32>
    %504 = arith.mulf %502, %503 : vector<2x64xf32>
    %505 = vector.broadcast %490 : vector<1x64xf32> to vector<2x64xf32>
    %506 = arith.addf %504, %505 : vector<2x64xf32>
    %507 = vector.extract_strided_slice %506 {offsets = [0, 0], sizes = [2, 16], strides = [1, 1]} : vector<2x64xf32> to vector<2x16xf32>
    %508 = vector.extract_strided_slice %506 {offsets = [0, 16], sizes = [2, 16], strides = [1, 1]} : vector<2x64xf32> to vector<2x16xf32>
    %509 = vector.extract_strided_slice %506 {offsets = [0, 32], sizes = [2, 16], strides = [1, 1]} : vector<2x64xf32> to vector<2x16xf32>
    %510 = vector.extract_strided_slice %506 {offsets = [0, 48], sizes = [2, 16], strides = [1, 1]} : vector<2x64xf32> to vector<2x16xf32>
    %511 = arith.mulf %508, %492 : vector<2x16xf32>
    %512 = arith.mulf %507, %509 : vector<2x16xf32>
    %513 = arith.addf %511, %512 : vector<2x16xf32>
    %514 = math.tanh %513 : vector<2x16xf32>
    %515 = arith.mulf %510, %514 : vector<2x16xf32>
    %516 = vector.extract_strided_slice %476 {offsets = [2, 0], sizes = [2, 64], strides = [1, 1]} : vector<16x64xf32> to vector<2x64xf32>
    %cst_120 = arith.constant dense<0.000000e+00> : vector<2x64xf32>
    %517 = tpu.matmul %515, %478, %cst_120 {dimension_numbers = #tpu.dot_dimension_numbers<[1], [0], [0], [1], [0, 0, 1, 1], [], []>} : vector<2x16xf32>, vector<16x64xf32>, vector<2x64xf32> -> vector<2x64xf32>
    %518 = arith.addf %516, %517 : vector<2x64xf32>
    %519 = vector.broadcast %487 : vector<1x64xf32> to vector<2x64xf32>
    %520 = arith.mulf %518, %519 : vector<2x64xf32>
    %521 = arith.negf %520 : vector<2x64xf32>
    %522 = math.exp %521 : vector<2x64xf32>
    %cst_121 = arith.constant 1.000000e+00 : f32
    %523 = vector.broadcast %cst_121 : f32 to vector<2x64xf32>
    %524 = arith.addf %523, %522 : vector<2x64xf32>
    %525 = arith.divf %523, %524 : vector<2x64xf32>
    %526 = vector.broadcast %487 : vector<1x64xf32> to vector<2x64xf32>
    %527 = arith.mulf %525, %526 : vector<2x64xf32>
    %528 = vector.broadcast %490 : vector<1x64xf32> to vector<2x64xf32>
    %529 = arith.addf %527, %528 : vector<2x64xf32>
    %530 = vector.extract_strided_slice %529 {offsets = [0, 0], sizes = [2, 16], strides = [1, 1]} : vector<2x64xf32> to vector<2x16xf32>
    %531 = vector.extract_strided_slice %529 {offsets = [0, 16], sizes = [2, 16], strides = [1, 1]} : vector<2x64xf32> to vector<2x16xf32>
    %532 = vector.extract_strided_slice %529 {offsets = [0, 32], sizes = [2, 16], strides = [1, 1]} : vector<2x64xf32> to vector<2x16xf32>
    %533 = vector.extract_strided_slice %529 {offsets = [0, 48], sizes = [2, 16], strides = [1, 1]} : vector<2x64xf32> to vector<2x16xf32>
    %534 = arith.mulf %531, %513 : vector<2x16xf32>
    %535 = arith.mulf %530, %532 : vector<2x16xf32>
    %536 = arith.addf %534, %535 : vector<2x16xf32>
    %537 = math.tanh %536 : vector<2x16xf32>
    %538 = arith.mulf %533, %537 : vector<2x16xf32>
    %539 = vector.extract_strided_slice %476 {offsets = [4, 0], sizes = [2, 64], strides = [1, 1]} : vector<16x64xf32> to vector<2x64xf32>
    %cst_122 = arith.constant dense<0.000000e+00> : vector<2x64xf32>
    %540 = tpu.matmul %538, %478, %cst_122 {dimension_numbers = #tpu.dot_dimension_numbers<[1], [0], [0], [1], [0, 0, 1, 1], [], []>} : vector<2x16xf32>, vector<16x64xf32>, vector<2x64xf32> -> vector<2x64xf32>
    %541 = arith.addf %539, %540 : vector<2x64xf32>
    %542 = vector.broadcast %487 : vector<1x64xf32> to vector<2x64xf32>
    %543 = arith.mulf %541, %542 : vector<2x64xf32>
    %544 = arith.negf %543 : vector<2x64xf32>
    %545 = math.exp %544 : vector<2x64xf32>
    %cst_123 = arith.constant 1.000000e+00 : f32
    %546 = vector.broadcast %cst_123 : f32 to vector<2x64xf32>
    %547 = arith.addf %546, %545 : vector<2x64xf32>
    %548 = arith.divf %546, %547 : vector<2x64xf32>
    %549 = vector.broadcast %487 : vector<1x64xf32> to vector<2x64xf32>
    %550 = arith.mulf %548, %549 : vector<2x64xf32>
    %551 = vector.broadcast %490 : vector<1x64xf32> to vector<2x64xf32>
    %552 = arith.addf %550, %551 : vector<2x64xf32>
    %553 = vector.extract_strided_slice %552 {offsets = [0, 0], sizes = [2, 16], strides = [1, 1]} : vector<2x64xf32> to vector<2x16xf32>
    %554 = vector.extract_strided_slice %552 {offsets = [0, 16], sizes = [2, 16], strides = [1, 1]} : vector<2x64xf32> to vector<2x16xf32>
    %555 = vector.extract_strided_slice %552 {offsets = [0, 32], sizes = [2, 16], strides = [1, 1]} : vector<2x64xf32> to vector<2x16xf32>
    %556 = vector.extract_strided_slice %552 {offsets = [0, 48], sizes = [2, 16], strides = [1, 1]} : vector<2x64xf32> to vector<2x16xf32>
    %557 = arith.mulf %554, %536 : vector<2x16xf32>
    %558 = arith.mulf %553, %555 : vector<2x16xf32>
    %559 = arith.addf %557, %558 : vector<2x16xf32>
    %560 = math.tanh %559 : vector<2x16xf32>
    %561 = arith.mulf %556, %560 : vector<2x16xf32>
    %562 = vector.extract_strided_slice %476 {offsets = [6, 0], sizes = [2, 64], strides = [1, 1]} : vector<16x64xf32> to vector<2x64xf32>
    %cst_124 = arith.constant dense<0.000000e+00> : vector<2x64xf32>
    %563 = tpu.matmul %561, %478, %cst_124 {dimension_numbers = #tpu.dot_dimension_numbers<[1], [0], [0], [1], [0, 0, 1, 1], [], []>} : vector<2x16xf32>, vector<16x64xf32>, vector<2x64xf32> -> vector<2x64xf32>
    %564 = arith.addf %562, %563 : vector<2x64xf32>
    %565 = vector.broadcast %487 : vector<1x64xf32> to vector<2x64xf32>
    %566 = arith.mulf %564, %565 : vector<2x64xf32>
    %567 = arith.negf %566 : vector<2x64xf32>
    %568 = math.exp %567 : vector<2x64xf32>
    %cst_125 = arith.constant 1.000000e+00 : f32
    %569 = vector.broadcast %cst_125 : f32 to vector<2x64xf32>
    %570 = arith.addf %569, %568 : vector<2x64xf32>
    %571 = arith.divf %569, %570 : vector<2x64xf32>
    %572 = vector.broadcast %487 : vector<1x64xf32> to vector<2x64xf32>
    %573 = arith.mulf %571, %572 : vector<2x64xf32>
    %574 = vector.broadcast %490 : vector<1x64xf32> to vector<2x64xf32>
    %575 = arith.addf %573, %574 : vector<2x64xf32>
    %576 = vector.extract_strided_slice %575 {offsets = [0, 0], sizes = [2, 16], strides = [1, 1]} : vector<2x64xf32> to vector<2x16xf32>
    %577 = vector.extract_strided_slice %575 {offsets = [0, 16], sizes = [2, 16], strides = [1, 1]} : vector<2x64xf32> to vector<2x16xf32>
    %578 = vector.extract_strided_slice %575 {offsets = [0, 32], sizes = [2, 16], strides = [1, 1]} : vector<2x64xf32> to vector<2x16xf32>
    %579 = vector.extract_strided_slice %575 {offsets = [0, 48], sizes = [2, 16], strides = [1, 1]} : vector<2x64xf32> to vector<2x16xf32>
    %580 = arith.mulf %577, %559 : vector<2x16xf32>
    %581 = arith.mulf %576, %578 : vector<2x16xf32>
    %582 = arith.addf %580, %581 : vector<2x16xf32>
    %583 = math.tanh %582 : vector<2x16xf32>
    %584 = arith.mulf %579, %583 : vector<2x16xf32>
    %585 = vector.extract_strided_slice %476 {offsets = [8, 0], sizes = [2, 64], strides = [1, 1]} : vector<16x64xf32> to vector<2x64xf32>
    %cst_126 = arith.constant dense<0.000000e+00> : vector<2x64xf32>
    %586 = tpu.matmul %584, %478, %cst_126 {dimension_numbers = #tpu.dot_dimension_numbers<[1], [0], [0], [1], [0, 0, 1, 1], [], []>} : vector<2x16xf32>, vector<16x64xf32>, vector<2x64xf32> -> vector<2x64xf32>
    %587 = arith.addf %585, %586 : vector<2x64xf32>
    %588 = vector.broadcast %487 : vector<1x64xf32> to vector<2x64xf32>
    %589 = arith.mulf %587, %588 : vector<2x64xf32>
    %590 = arith.negf %589 : vector<2x64xf32>
    %591 = math.exp %590 : vector<2x64xf32>
    %cst_127 = arith.constant 1.000000e+00 : f32
    %592 = vector.broadcast %cst_127 : f32 to vector<2x64xf32>
    %593 = arith.addf %592, %591 : vector<2x64xf32>
    %594 = arith.divf %592, %593 : vector<2x64xf32>
    %595 = vector.broadcast %487 : vector<1x64xf32> to vector<2x64xf32>
    %596 = arith.mulf %594, %595 : vector<2x64xf32>
    %597 = vector.broadcast %490 : vector<1x64xf32> to vector<2x64xf32>
    %598 = arith.addf %596, %597 : vector<2x64xf32>
    %599 = vector.extract_strided_slice %598 {offsets = [0, 0], sizes = [2, 16], strides = [1, 1]} : vector<2x64xf32> to vector<2x16xf32>
    %600 = vector.extract_strided_slice %598 {offsets = [0, 16], sizes = [2, 16], strides = [1, 1]} : vector<2x64xf32> to vector<2x16xf32>
    %601 = vector.extract_strided_slice %598 {offsets = [0, 32], sizes = [2, 16], strides = [1, 1]} : vector<2x64xf32> to vector<2x16xf32>
    %602 = vector.extract_strided_slice %598 {offsets = [0, 48], sizes = [2, 16], strides = [1, 1]} : vector<2x64xf32> to vector<2x16xf32>
    %603 = arith.mulf %600, %582 : vector<2x16xf32>
    %604 = arith.mulf %599, %601 : vector<2x16xf32>
    %605 = arith.addf %603, %604 : vector<2x16xf32>
    %606 = math.tanh %605 : vector<2x16xf32>
    %607 = arith.mulf %602, %606 : vector<2x16xf32>
    %608 = vector.extract_strided_slice %476 {offsets = [10, 0], sizes = [2, 64], strides = [1, 1]} : vector<16x64xf32> to vector<2x64xf32>
    %cst_128 = arith.constant dense<0.000000e+00> : vector<2x64xf32>
    %609 = tpu.matmul %607, %478, %cst_128 {dimension_numbers = #tpu.dot_dimension_numbers<[1], [0], [0], [1], [0, 0, 1, 1], [], []>} : vector<2x16xf32>, vector<16x64xf32>, vector<2x64xf32> -> vector<2x64xf32>
    %610 = arith.addf %608, %609 : vector<2x64xf32>
    %611 = vector.broadcast %487 : vector<1x64xf32> to vector<2x64xf32>
    %612 = arith.mulf %610, %611 : vector<2x64xf32>
    %613 = arith.negf %612 : vector<2x64xf32>
    %614 = math.exp %613 : vector<2x64xf32>
    %cst_129 = arith.constant 1.000000e+00 : f32
    %615 = vector.broadcast %cst_129 : f32 to vector<2x64xf32>
    %616 = arith.addf %615, %614 : vector<2x64xf32>
    %617 = arith.divf %615, %616 : vector<2x64xf32>
    %618 = vector.broadcast %487 : vector<1x64xf32> to vector<2x64xf32>
    %619 = arith.mulf %617, %618 : vector<2x64xf32>
    %620 = vector.broadcast %490 : vector<1x64xf32> to vector<2x64xf32>
    %621 = arith.addf %619, %620 : vector<2x64xf32>
    %622 = vector.extract_strided_slice %621 {offsets = [0, 0], sizes = [2, 16], strides = [1, 1]} : vector<2x64xf32> to vector<2x16xf32>
    %623 = vector.extract_strided_slice %621 {offsets = [0, 16], sizes = [2, 16], strides = [1, 1]} : vector<2x64xf32> to vector<2x16xf32>
    %624 = vector.extract_strided_slice %621 {offsets = [0, 32], sizes = [2, 16], strides = [1, 1]} : vector<2x64xf32> to vector<2x16xf32>
    %625 = vector.extract_strided_slice %621 {offsets = [0, 48], sizes = [2, 16], strides = [1, 1]} : vector<2x64xf32> to vector<2x16xf32>
    %626 = arith.mulf %623, %605 : vector<2x16xf32>
    %627 = arith.mulf %622, %624 : vector<2x16xf32>
    %628 = arith.addf %626, %627 : vector<2x16xf32>
    %629 = math.tanh %628 : vector<2x16xf32>
    %630 = arith.mulf %625, %629 : vector<2x16xf32>
    %631 = vector.extract_strided_slice %476 {offsets = [12, 0], sizes = [2, 64], strides = [1, 1]} : vector<16x64xf32> to vector<2x64xf32>
    %cst_130 = arith.constant dense<0.000000e+00> : vector<2x64xf32>
    %632 = tpu.matmul %630, %478, %cst_130 {dimension_numbers = #tpu.dot_dimension_numbers<[1], [0], [0], [1], [0, 0, 1, 1], [], []>} : vector<2x16xf32>, vector<16x64xf32>, vector<2x64xf32> -> vector<2x64xf32>
    %633 = arith.addf %631, %632 : vector<2x64xf32>
    %634 = vector.broadcast %487 : vector<1x64xf32> to vector<2x64xf32>
    %635 = arith.mulf %633, %634 : vector<2x64xf32>
    %636 = arith.negf %635 : vector<2x64xf32>
    %637 = math.exp %636 : vector<2x64xf32>
    %cst_131 = arith.constant 1.000000e+00 : f32
    %638 = vector.broadcast %cst_131 : f32 to vector<2x64xf32>
    %639 = arith.addf %638, %637 : vector<2x64xf32>
    %640 = arith.divf %638, %639 : vector<2x64xf32>
    %641 = vector.broadcast %487 : vector<1x64xf32> to vector<2x64xf32>
    %642 = arith.mulf %640, %641 : vector<2x64xf32>
    %643 = vector.broadcast %490 : vector<1x64xf32> to vector<2x64xf32>
    %644 = arith.addf %642, %643 : vector<2x64xf32>
    %645 = vector.extract_strided_slice %644 {offsets = [0, 0], sizes = [2, 16], strides = [1, 1]} : vector<2x64xf32> to vector<2x16xf32>
    %646 = vector.extract_strided_slice %644 {offsets = [0, 16], sizes = [2, 16], strides = [1, 1]} : vector<2x64xf32> to vector<2x16xf32>
    %647 = vector.extract_strided_slice %644 {offsets = [0, 32], sizes = [2, 16], strides = [1, 1]} : vector<2x64xf32> to vector<2x16xf32>
    %648 = vector.extract_strided_slice %644 {offsets = [0, 48], sizes = [2, 16], strides = [1, 1]} : vector<2x64xf32> to vector<2x16xf32>
    %649 = arith.mulf %646, %628 : vector<2x16xf32>
    %650 = arith.mulf %645, %647 : vector<2x16xf32>
    %651 = arith.addf %649, %650 : vector<2x16xf32>
    %652 = math.tanh %651 : vector<2x16xf32>
    %653 = arith.mulf %648, %652 : vector<2x16xf32>
    %654 = vector.extract_strided_slice %476 {offsets = [14, 0], sizes = [2, 64], strides = [1, 1]} : vector<16x64xf32> to vector<2x64xf32>
    %cst_132 = arith.constant dense<0.000000e+00> : vector<2x64xf32>
    %655 = tpu.matmul %653, %478, %cst_132 {dimension_numbers = #tpu.dot_dimension_numbers<[1], [0], [0], [1], [0, 0, 1, 1], [], []>} : vector<2x16xf32>, vector<16x64xf32>, vector<2x64xf32> -> vector<2x64xf32>
    %656 = arith.addf %654, %655 : vector<2x64xf32>
    %657 = vector.broadcast %487 : vector<1x64xf32> to vector<2x64xf32>
    %658 = arith.mulf %656, %657 : vector<2x64xf32>
    %659 = arith.negf %658 : vector<2x64xf32>
    %660 = math.exp %659 : vector<2x64xf32>
    %cst_133 = arith.constant 1.000000e+00 : f32
    %661 = vector.broadcast %cst_133 : f32 to vector<2x64xf32>
    %662 = arith.addf %661, %660 : vector<2x64xf32>
    %663 = arith.divf %661, %662 : vector<2x64xf32>
    %664 = vector.broadcast %487 : vector<1x64xf32> to vector<2x64xf32>
    %665 = arith.mulf %663, %664 : vector<2x64xf32>
    %666 = vector.broadcast %490 : vector<1x64xf32> to vector<2x64xf32>
    %667 = arith.addf %665, %666 : vector<2x64xf32>
    %668 = vector.extract_strided_slice %667 {offsets = [0, 0], sizes = [2, 16], strides = [1, 1]} : vector<2x64xf32> to vector<2x16xf32>
    %669 = vector.extract_strided_slice %667 {offsets = [0, 16], sizes = [2, 16], strides = [1, 1]} : vector<2x64xf32> to vector<2x16xf32>
    %670 = vector.extract_strided_slice %667 {offsets = [0, 32], sizes = [2, 16], strides = [1, 1]} : vector<2x64xf32> to vector<2x16xf32>
    %671 = vector.extract_strided_slice %667 {offsets = [0, 48], sizes = [2, 16], strides = [1, 1]} : vector<2x64xf32> to vector<2x16xf32>
    %672 = arith.mulf %669, %651 : vector<2x16xf32>
    %673 = arith.mulf %668, %670 : vector<2x16xf32>
    %674 = arith.addf %672, %673 : vector<2x16xf32>
    %675 = math.tanh %674 : vector<2x16xf32>
    %676 = arith.mulf %671, %675 : vector<2x16xf32>
    %677 = tpu.concatenate %515, %538, %561, %584, %607, %630, %653, %676 in 0 : vector<2x16xf32>, vector<2x16xf32>, vector<2x16xf32>, vector<2x16xf32>, vector<2x16xf32>, vector<2x16xf32>, vector<2x16xf32>, vector<2x16xf32> -> vector<16x16xf32>
    %c1_134 = arith.constant 1 : index
    %c0_135 = arith.constant 0 : index
    %c0_136 = arith.constant 0 : index
    %678 = vector.load %arg15[%c1_134, %c0_135, %c0_136] : memref<3x16x8xf32, #tpu.memory_space<vmem>>, vector<1x16x8xf32>
    %679 = vector.shape_cast %678 : vector<1x16x8xf32> to vector<16x8xf32>
    %cst_137 = arith.constant dense<0.000000e+00> : vector<16x8xf32>
    %680 = tpu.matmul %677, %679, %cst_137 {dimension_numbers = #tpu.dot_dimension_numbers<[1], [0], [0], [1], [0, 0, 1, 1], [], []>} : vector<16x16xf32>, vector<16x8xf32>, vector<16x8xf32> -> vector<16x8xf32>
    %c1_138 = arith.constant 1 : index
    %c0_139 = arith.constant 0 : index
    %c0_140 = arith.constant 0 : index
    %681 = vector.load %arg16[%c1_138, %c0_139, %c0_140] : memref<3x1x8xf32, #tpu.memory_space<vmem>>, vector<1x1x8xf32>
    %682 = vector.shape_cast %681 : vector<1x1x8xf32> to vector<1x8xf32>
    %683 = vector.broadcast %682 : vector<1x8xf32> to vector<16x8xf32>
    %684 = arith.addf %680, %683 : vector<16x8xf32>
    %c1_141 = arith.constant 1 : index
    %c0_142 = arith.constant 0 : index
    %c0_143 = arith.constant 0 : index
    %685 = vector.load %arg17[%c1_141, %c0_142, %c0_143] : memref<3x8x1xf32, #tpu.memory_space<vmem>>, vector<1x8x1xf32>
    %686 = vector.shape_cast %685 : vector<1x8x1xf32> to vector<8x1xf32>
    %cst_144 = arith.constant dense<0.000000e+00> : vector<16x1xf32>
    %687 = tpu.matmul %684, %686, %cst_144 {dimension_numbers = #tpu.dot_dimension_numbers<[1], [0], [0], [1], [0, 0, 1, 1], [], []>} : vector<16x8xf32>, vector<8x1xf32>, vector<16x1xf32> -> vector<16x1xf32>
    %c1_145 = arith.constant 1 : index
    %c0_146 = arith.constant 0 : index
    %c0_147 = arith.constant 0 : index
    %688 = vector.load %arg18[%c1_145, %c0_146, %c0_147] : memref<3x1x1xf32, #tpu.memory_space<vmem>>, vector<1x1x1xf32>
    %689 = vector.shape_cast %688 : vector<1x1x1xf32> to vector<1x1xf32>
    %690 = vector.broadcast %689 : vector<1x1xf32> to vector<16x1xf32>
    %691 = arith.addf %687, %690 : vector<16x1xf32>
    %c0_148 = arith.constant 0 : index
    %c2 = arith.constant 2 : index
    %692 = vector.load %arg2[%c0_148, %c2] : memref<16x3xf32, #tpu.memory_space<vmem>>, vector<16x1xf32>
    %c2_149 = arith.constant 2 : index
    %c0_150 = arith.constant 0 : index
    %c0_151 = arith.constant 0 : index
    %693 = vector.load %arg10[%c2_149, %c0_150, %c0_151] : memref<3x2x8xf32, #tpu.memory_space<vmem>>, vector<1x2x8xf32>
    %694 = vector.shape_cast %693 : vector<1x2x8xf32> to vector<2x8xf32>
    %695 = vector.extract_strided_slice %694 {offsets = [0, 0], sizes = [1, 8], strides = [1, 1]} : vector<2x8xf32> to vector<1x8xf32>
    %696 = vector.broadcast %691 : vector<16x1xf32> to vector<16x8xf32>
    %697 = vector.broadcast %695 : vector<1x8xf32> to vector<16x8xf32>
    %698 = arith.mulf %696, %697 : vector<16x8xf32>
    %699 = vector.extract_strided_slice %694 {offsets = [1, 0], sizes = [1, 8], strides = [1, 1]} : vector<2x8xf32> to vector<1x8xf32>
    %700 = vector.broadcast %692 : vector<16x1xf32> to vector<16x8xf32>
    %701 = vector.broadcast %699 : vector<1x8xf32> to vector<16x8xf32>
    %702 = arith.mulf %700, %701 : vector<16x8xf32>
    %703 = arith.addf %698, %702 : vector<16x8xf32>
    %c2_152 = arith.constant 2 : index
    %c0_153 = arith.constant 0 : index
    %c0_154 = arith.constant 0 : index
    %704 = vector.load %arg11[%c2_152, %c0_153, %c0_154] : memref<3x1x8xf32, #tpu.memory_space<vmem>>, vector<1x1x8xf32>
    %705 = vector.shape_cast %704 : vector<1x1x8xf32> to vector<1x8xf32>
    %706 = vector.broadcast %705 : vector<1x8xf32> to vector<16x8xf32>
    %707 = arith.addf %703, %706 : vector<16x8xf32>
    %c2_155 = arith.constant 2 : index
    %c0_156 = arith.constant 0 : index
    %c0_157 = arith.constant 0 : index
    %708 = vector.load %arg12[%c2_155, %c0_156, %c0_157] : memref<3x8x64xf32, #tpu.memory_space<vmem>>, vector<1x8x64xf32>
    %709 = vector.shape_cast %708 : vector<1x8x64xf32> to vector<8x64xf32>
    %cst_158 = arith.constant dense<0.000000e+00> : vector<16x64xf32>
    %710 = tpu.matmul %707, %709, %cst_158 {dimension_numbers = #tpu.dot_dimension_numbers<[1], [0], [0], [1], [0, 0, 1, 1], [], []>} : vector<16x8xf32>, vector<8x64xf32>, vector<16x64xf32> -> vector<16x64xf32>
    %c2_159 = arith.constant 2 : index
    %c0_160 = arith.constant 0 : index
    %c0_161 = arith.constant 0 : index
    %711 = vector.load %arg14[%c2_159, %c0_160, %c0_161] : memref<3x1x64xf32, #tpu.memory_space<vmem>>, vector<1x1x64xf32>
    %712 = vector.shape_cast %711 : vector<1x1x64xf32> to vector<1x64xf32>
    %713 = vector.broadcast %712 : vector<1x64xf32> to vector<16x64xf32>
    %714 = arith.addf %710, %713 : vector<16x64xf32>
    %c2_162 = arith.constant 2 : index
    %c0_163 = arith.constant 0 : index
    %c0_164 = arith.constant 0 : index
    %715 = vector.load %arg13[%c2_162, %c0_163, %c0_164] : memref<3x16x64xf32, #tpu.memory_space<vmem>>, vector<1x16x64xf32>
    %716 = vector.shape_cast %715 : vector<1x16x64xf32> to vector<16x64xf32>
    %717 = tpu.iota {dimensions = array<i32: 1>} : vector<1x64xi32>
    %c32_i32_165 = arith.constant 32 : i32
    %718 = vector.broadcast %c32_i32_165 : i32 to vector<1x64xi32>
    %719 = arith.cmpi sge, %717, %718 : vector<1x64xi32>
    %c48_i32_166 = arith.constant 48 : i32
    %720 = vector.broadcast %c48_i32_166 : i32 to vector<1x64xi32>
    %721 = arith.cmpi slt, %717, %720 : vector<1x64xi32>
    %722 = arith.andi %719, %721 : vector<1x64xi1>
    %cst_167 = arith.constant 2.000000e+00 : f32
    %cst_168 = arith.constant 1.000000e+00 : f32
    %723 = vector.broadcast %cst_167 : f32 to vector<1x64xf32>
    %724 = vector.broadcast %cst_168 : f32 to vector<1x64xf32>
    %725 = arith.select %722, %723, %724 : vector<1x64xi1>, vector<1x64xf32>
    %cst_169 = arith.constant -1.000000e+00 : f32
    %cst_170 = arith.constant 0.000000e+00 : f32
    %726 = vector.broadcast %cst_169 : f32 to vector<1x64xf32>
    %727 = vector.broadcast %cst_170 : f32 to vector<1x64xf32>
    %728 = arith.select %722, %726, %727 : vector<1x64xi1>, vector<1x64xf32>
    %cst_171 = arith.constant 0.000000e+00 : f32
    %729 = vector.broadcast %cst_171 : f32 to vector<2x16xf32>
    %cst_172 = arith.constant 0.000000e+00 : f32
    %730 = vector.broadcast %cst_172 : f32 to vector<2x16xf32>
    %731 = vector.extract_strided_slice %714 {offsets = [0, 0], sizes = [2, 64], strides = [1, 1]} : vector<16x64xf32> to vector<2x64xf32>
    %cst_173 = arith.constant dense<0.000000e+00> : vector<2x64xf32>
    %732 = tpu.matmul %729, %716, %cst_173 {dimension_numbers = #tpu.dot_dimension_numbers<[1], [0], [0], [1], [0, 0, 1, 1], [], []>} : vector<2x16xf32>, vector<16x64xf32>, vector<2x64xf32> -> vector<2x64xf32>
    %733 = arith.addf %731, %732 : vector<2x64xf32>
    %734 = vector.broadcast %725 : vector<1x64xf32> to vector<2x64xf32>
    %735 = arith.mulf %733, %734 : vector<2x64xf32>
    %736 = arith.negf %735 : vector<2x64xf32>
    %737 = math.exp %736 : vector<2x64xf32>
    %cst_174 = arith.constant 1.000000e+00 : f32
    %738 = vector.broadcast %cst_174 : f32 to vector<2x64xf32>
    %739 = arith.addf %738, %737 : vector<2x64xf32>
    %740 = arith.divf %738, %739 : vector<2x64xf32>
    %741 = vector.broadcast %725 : vector<1x64xf32> to vector<2x64xf32>
    %742 = arith.mulf %740, %741 : vector<2x64xf32>
    %743 = vector.broadcast %728 : vector<1x64xf32> to vector<2x64xf32>
    %744 = arith.addf %742, %743 : vector<2x64xf32>
    %745 = vector.extract_strided_slice %744 {offsets = [0, 0], sizes = [2, 16], strides = [1, 1]} : vector<2x64xf32> to vector<2x16xf32>
    %746 = vector.extract_strided_slice %744 {offsets = [0, 16], sizes = [2, 16], strides = [1, 1]} : vector<2x64xf32> to vector<2x16xf32>
    %747 = vector.extract_strided_slice %744 {offsets = [0, 32], sizes = [2, 16], strides = [1, 1]} : vector<2x64xf32> to vector<2x16xf32>
    %748 = vector.extract_strided_slice %744 {offsets = [0, 48], sizes = [2, 16], strides = [1, 1]} : vector<2x64xf32> to vector<2x16xf32>
    %749 = arith.mulf %746, %730 : vector<2x16xf32>
    %750 = arith.mulf %745, %747 : vector<2x16xf32>
    %751 = arith.addf %749, %750 : vector<2x16xf32>
    %752 = math.tanh %751 : vector<2x16xf32>
    %753 = arith.mulf %748, %752 : vector<2x16xf32>
    %754 = vector.extract_strided_slice %714 {offsets = [2, 0], sizes = [2, 64], strides = [1, 1]} : vector<16x64xf32> to vector<2x64xf32>
    %cst_175 = arith.constant dense<0.000000e+00> : vector<2x64xf32>
    %755 = tpu.matmul %753, %716, %cst_175 {dimension_numbers = #tpu.dot_dimension_numbers<[1], [0], [0], [1], [0, 0, 1, 1], [], []>} : vector<2x16xf32>, vector<16x64xf32>, vector<2x64xf32> -> vector<2x64xf32>
    %756 = arith.addf %754, %755 : vector<2x64xf32>
    %757 = vector.broadcast %725 : vector<1x64xf32> to vector<2x64xf32>
    %758 = arith.mulf %756, %757 : vector<2x64xf32>
    %759 = arith.negf %758 : vector<2x64xf32>
    %760 = math.exp %759 : vector<2x64xf32>
    %cst_176 = arith.constant 1.000000e+00 : f32
    %761 = vector.broadcast %cst_176 : f32 to vector<2x64xf32>
    %762 = arith.addf %761, %760 : vector<2x64xf32>
    %763 = arith.divf %761, %762 : vector<2x64xf32>
    %764 = vector.broadcast %725 : vector<1x64xf32> to vector<2x64xf32>
    %765 = arith.mulf %763, %764 : vector<2x64xf32>
    %766 = vector.broadcast %728 : vector<1x64xf32> to vector<2x64xf32>
    %767 = arith.addf %765, %766 : vector<2x64xf32>
    %768 = vector.extract_strided_slice %767 {offsets = [0, 0], sizes = [2, 16], strides = [1, 1]} : vector<2x64xf32> to vector<2x16xf32>
    %769 = vector.extract_strided_slice %767 {offsets = [0, 16], sizes = [2, 16], strides = [1, 1]} : vector<2x64xf32> to vector<2x16xf32>
    %770 = vector.extract_strided_slice %767 {offsets = [0, 32], sizes = [2, 16], strides = [1, 1]} : vector<2x64xf32> to vector<2x16xf32>
    %771 = vector.extract_strided_slice %767 {offsets = [0, 48], sizes = [2, 16], strides = [1, 1]} : vector<2x64xf32> to vector<2x16xf32>
    %772 = arith.mulf %769, %751 : vector<2x16xf32>
    %773 = arith.mulf %768, %770 : vector<2x16xf32>
    %774 = arith.addf %772, %773 : vector<2x16xf32>
    %775 = math.tanh %774 : vector<2x16xf32>
    %776 = arith.mulf %771, %775 : vector<2x16xf32>
    %777 = vector.extract_strided_slice %714 {offsets = [4, 0], sizes = [2, 64], strides = [1, 1]} : vector<16x64xf32> to vector<2x64xf32>
    %cst_177 = arith.constant dense<0.000000e+00> : vector<2x64xf32>
    %778 = tpu.matmul %776, %716, %cst_177 {dimension_numbers = #tpu.dot_dimension_numbers<[1], [0], [0], [1], [0, 0, 1, 1], [], []>} : vector<2x16xf32>, vector<16x64xf32>, vector<2x64xf32> -> vector<2x64xf32>
    %779 = arith.addf %777, %778 : vector<2x64xf32>
    %780 = vector.broadcast %725 : vector<1x64xf32> to vector<2x64xf32>
    %781 = arith.mulf %779, %780 : vector<2x64xf32>
    %782 = arith.negf %781 : vector<2x64xf32>
    %783 = math.exp %782 : vector<2x64xf32>
    %cst_178 = arith.constant 1.000000e+00 : f32
    %784 = vector.broadcast %cst_178 : f32 to vector<2x64xf32>
    %785 = arith.addf %784, %783 : vector<2x64xf32>
    %786 = arith.divf %784, %785 : vector<2x64xf32>
    %787 = vector.broadcast %725 : vector<1x64xf32> to vector<2x64xf32>
    %788 = arith.mulf %786, %787 : vector<2x64xf32>
    %789 = vector.broadcast %728 : vector<1x64xf32> to vector<2x64xf32>
    %790 = arith.addf %788, %789 : vector<2x64xf32>
    %791 = vector.extract_strided_slice %790 {offsets = [0, 0], sizes = [2, 16], strides = [1, 1]} : vector<2x64xf32> to vector<2x16xf32>
    %792 = vector.extract_strided_slice %790 {offsets = [0, 16], sizes = [2, 16], strides = [1, 1]} : vector<2x64xf32> to vector<2x16xf32>
    %793 = vector.extract_strided_slice %790 {offsets = [0, 32], sizes = [2, 16], strides = [1, 1]} : vector<2x64xf32> to vector<2x16xf32>
    %794 = vector.extract_strided_slice %790 {offsets = [0, 48], sizes = [2, 16], strides = [1, 1]} : vector<2x64xf32> to vector<2x16xf32>
    %795 = arith.mulf %792, %774 : vector<2x16xf32>
    %796 = arith.mulf %791, %793 : vector<2x16xf32>
    %797 = arith.addf %795, %796 : vector<2x16xf32>
    %798 = math.tanh %797 : vector<2x16xf32>
    %799 = arith.mulf %794, %798 : vector<2x16xf32>
    %800 = vector.extract_strided_slice %714 {offsets = [6, 0], sizes = [2, 64], strides = [1, 1]} : vector<16x64xf32> to vector<2x64xf32>
    %cst_179 = arith.constant dense<0.000000e+00> : vector<2x64xf32>
    %801 = tpu.matmul %799, %716, %cst_179 {dimension_numbers = #tpu.dot_dimension_numbers<[1], [0], [0], [1], [0, 0, 1, 1], [], []>} : vector<2x16xf32>, vector<16x64xf32>, vector<2x64xf32> -> vector<2x64xf32>
    %802 = arith.addf %800, %801 : vector<2x64xf32>
    %803 = vector.broadcast %725 : vector<1x64xf32> to vector<2x64xf32>
    %804 = arith.mulf %802, %803 : vector<2x64xf32>
    %805 = arith.negf %804 : vector<2x64xf32>
    %806 = math.exp %805 : vector<2x64xf32>
    %cst_180 = arith.constant 1.000000e+00 : f32
    %807 = vector.broadcast %cst_180 : f32 to vector<2x64xf32>
    %808 = arith.addf %807, %806 : vector<2x64xf32>
    %809 = arith.divf %807, %808 : vector<2x64xf32>
    %810 = vector.broadcast %725 : vector<1x64xf32> to vector<2x64xf32>
    %811 = arith.mulf %809, %810 : vector<2x64xf32>
    %812 = vector.broadcast %728 : vector<1x64xf32> to vector<2x64xf32>
    %813 = arith.addf %811, %812 : vector<2x64xf32>
    %814 = vector.extract_strided_slice %813 {offsets = [0, 0], sizes = [2, 16], strides = [1, 1]} : vector<2x64xf32> to vector<2x16xf32>
    %815 = vector.extract_strided_slice %813 {offsets = [0, 16], sizes = [2, 16], strides = [1, 1]} : vector<2x64xf32> to vector<2x16xf32>
    %816 = vector.extract_strided_slice %813 {offsets = [0, 32], sizes = [2, 16], strides = [1, 1]} : vector<2x64xf32> to vector<2x16xf32>
    %817 = vector.extract_strided_slice %813 {offsets = [0, 48], sizes = [2, 16], strides = [1, 1]} : vector<2x64xf32> to vector<2x16xf32>
    %818 = arith.mulf %815, %797 : vector<2x16xf32>
    %819 = arith.mulf %814, %816 : vector<2x16xf32>
    %820 = arith.addf %818, %819 : vector<2x16xf32>
    %821 = math.tanh %820 : vector<2x16xf32>
    %822 = arith.mulf %817, %821 : vector<2x16xf32>
    %823 = vector.extract_strided_slice %714 {offsets = [8, 0], sizes = [2, 64], strides = [1, 1]} : vector<16x64xf32> to vector<2x64xf32>
    %cst_181 = arith.constant dense<0.000000e+00> : vector<2x64xf32>
    %824 = tpu.matmul %822, %716, %cst_181 {dimension_numbers = #tpu.dot_dimension_numbers<[1], [0], [0], [1], [0, 0, 1, 1], [], []>} : vector<2x16xf32>, vector<16x64xf32>, vector<2x64xf32> -> vector<2x64xf32>
    %825 = arith.addf %823, %824 : vector<2x64xf32>
    %826 = vector.broadcast %725 : vector<1x64xf32> to vector<2x64xf32>
    %827 = arith.mulf %825, %826 : vector<2x64xf32>
    %828 = arith.negf %827 : vector<2x64xf32>
    %829 = math.exp %828 : vector<2x64xf32>
    %cst_182 = arith.constant 1.000000e+00 : f32
    %830 = vector.broadcast %cst_182 : f32 to vector<2x64xf32>
    %831 = arith.addf %830, %829 : vector<2x64xf32>
    %832 = arith.divf %830, %831 : vector<2x64xf32>
    %833 = vector.broadcast %725 : vector<1x64xf32> to vector<2x64xf32>
    %834 = arith.mulf %832, %833 : vector<2x64xf32>
    %835 = vector.broadcast %728 : vector<1x64xf32> to vector<2x64xf32>
    %836 = arith.addf %834, %835 : vector<2x64xf32>
    %837 = vector.extract_strided_slice %836 {offsets = [0, 0], sizes = [2, 16], strides = [1, 1]} : vector<2x64xf32> to vector<2x16xf32>
    %838 = vector.extract_strided_slice %836 {offsets = [0, 16], sizes = [2, 16], strides = [1, 1]} : vector<2x64xf32> to vector<2x16xf32>
    %839 = vector.extract_strided_slice %836 {offsets = [0, 32], sizes = [2, 16], strides = [1, 1]} : vector<2x64xf32> to vector<2x16xf32>
    %840 = vector.extract_strided_slice %836 {offsets = [0, 48], sizes = [2, 16], strides = [1, 1]} : vector<2x64xf32> to vector<2x16xf32>
    %841 = arith.mulf %838, %820 : vector<2x16xf32>
    %842 = arith.mulf %837, %839 : vector<2x16xf32>
    %843 = arith.addf %841, %842 : vector<2x16xf32>
    %844 = math.tanh %843 : vector<2x16xf32>
    %845 = arith.mulf %840, %844 : vector<2x16xf32>
    %846 = vector.extract_strided_slice %714 {offsets = [10, 0], sizes = [2, 64], strides = [1, 1]} : vector<16x64xf32> to vector<2x64xf32>
    %cst_183 = arith.constant dense<0.000000e+00> : vector<2x64xf32>
    %847 = tpu.matmul %845, %716, %cst_183 {dimension_numbers = #tpu.dot_dimension_numbers<[1], [0], [0], [1], [0, 0, 1, 1], [], []>} : vector<2x16xf32>, vector<16x64xf32>, vector<2x64xf32> -> vector<2x64xf32>
    %848 = arith.addf %846, %847 : vector<2x64xf32>
    %849 = vector.broadcast %725 : vector<1x64xf32> to vector<2x64xf32>
    %850 = arith.mulf %848, %849 : vector<2x64xf32>
    %851 = arith.negf %850 : vector<2x64xf32>
    %852 = math.exp %851 : vector<2x64xf32>
    %cst_184 = arith.constant 1.000000e+00 : f32
    %853 = vector.broadcast %cst_184 : f32 to vector<2x64xf32>
    %854 = arith.addf %853, %852 : vector<2x64xf32>
    %855 = arith.divf %853, %854 : vector<2x64xf32>
    %856 = vector.broadcast %725 : vector<1x64xf32> to vector<2x64xf32>
    %857 = arith.mulf %855, %856 : vector<2x64xf32>
    %858 = vector.broadcast %728 : vector<1x64xf32> to vector<2x64xf32>
    %859 = arith.addf %857, %858 : vector<2x64xf32>
    %860 = vector.extract_strided_slice %859 {offsets = [0, 0], sizes = [2, 16], strides = [1, 1]} : vector<2x64xf32> to vector<2x16xf32>
    %861 = vector.extract_strided_slice %859 {offsets = [0, 16], sizes = [2, 16], strides = [1, 1]} : vector<2x64xf32> to vector<2x16xf32>
    %862 = vector.extract_strided_slice %859 {offsets = [0, 32], sizes = [2, 16], strides = [1, 1]} : vector<2x64xf32> to vector<2x16xf32>
    %863 = vector.extract_strided_slice %859 {offsets = [0, 48], sizes = [2, 16], strides = [1, 1]} : vector<2x64xf32> to vector<2x16xf32>
    %864 = arith.mulf %861, %843 : vector<2x16xf32>
    %865 = arith.mulf %860, %862 : vector<2x16xf32>
    %866 = arith.addf %864, %865 : vector<2x16xf32>
    %867 = math.tanh %866 : vector<2x16xf32>
    %868 = arith.mulf %863, %867 : vector<2x16xf32>
    %869 = vector.extract_strided_slice %714 {offsets = [12, 0], sizes = [2, 64], strides = [1, 1]} : vector<16x64xf32> to vector<2x64xf32>
    %cst_185 = arith.constant dense<0.000000e+00> : vector<2x64xf32>
    %870 = tpu.matmul %868, %716, %cst_185 {dimension_numbers = #tpu.dot_dimension_numbers<[1], [0], [0], [1], [0, 0, 1, 1], [], []>} : vector<2x16xf32>, vector<16x64xf32>, vector<2x64xf32> -> vector<2x64xf32>
    %871 = arith.addf %869, %870 : vector<2x64xf32>
    %872 = vector.broadcast %725 : vector<1x64xf32> to vector<2x64xf32>
    %873 = arith.mulf %871, %872 : vector<2x64xf32>
    %874 = arith.negf %873 : vector<2x64xf32>
    %875 = math.exp %874 : vector<2x64xf32>
    %cst_186 = arith.constant 1.000000e+00 : f32
    %876 = vector.broadcast %cst_186 : f32 to vector<2x64xf32>
    %877 = arith.addf %876, %875 : vector<2x64xf32>
    %878 = arith.divf %876, %877 : vector<2x64xf32>
    %879 = vector.broadcast %725 : vector<1x64xf32> to vector<2x64xf32>
    %880 = arith.mulf %878, %879 : vector<2x64xf32>
    %881 = vector.broadcast %728 : vector<1x64xf32> to vector<2x64xf32>
    %882 = arith.addf %880, %881 : vector<2x64xf32>
    %883 = vector.extract_strided_slice %882 {offsets = [0, 0], sizes = [2, 16], strides = [1, 1]} : vector<2x64xf32> to vector<2x16xf32>
    %884 = vector.extract_strided_slice %882 {offsets = [0, 16], sizes = [2, 16], strides = [1, 1]} : vector<2x64xf32> to vector<2x16xf32>
    %885 = vector.extract_strided_slice %882 {offsets = [0, 32], sizes = [2, 16], strides = [1, 1]} : vector<2x64xf32> to vector<2x16xf32>
    %886 = vector.extract_strided_slice %882 {offsets = [0, 48], sizes = [2, 16], strides = [1, 1]} : vector<2x64xf32> to vector<2x16xf32>
    %887 = arith.mulf %884, %866 : vector<2x16xf32>
    %888 = arith.mulf %883, %885 : vector<2x16xf32>
    %889 = arith.addf %887, %888 : vector<2x16xf32>
    %890 = math.tanh %889 : vector<2x16xf32>
    %891 = arith.mulf %886, %890 : vector<2x16xf32>
    %892 = vector.extract_strided_slice %714 {offsets = [14, 0], sizes = [2, 64], strides = [1, 1]} : vector<16x64xf32> to vector<2x64xf32>
    %cst_187 = arith.constant dense<0.000000e+00> : vector<2x64xf32>
    %893 = tpu.matmul %891, %716, %cst_187 {dimension_numbers = #tpu.dot_dimension_numbers<[1], [0], [0], [1], [0, 0, 1, 1], [], []>} : vector<2x16xf32>, vector<16x64xf32>, vector<2x64xf32> -> vector<2x64xf32>
    %894 = arith.addf %892, %893 : vector<2x64xf32>
    %895 = vector.broadcast %725 : vector<1x64xf32> to vector<2x64xf32>
    %896 = arith.mulf %894, %895 : vector<2x64xf32>
    %897 = arith.negf %896 : vector<2x64xf32>
    %898 = math.exp %897 : vector<2x64xf32>
    %cst_188 = arith.constant 1.000000e+00 : f32
    %899 = vector.broadcast %cst_188 : f32 to vector<2x64xf32>
    %900 = arith.addf %899, %898 : vector<2x64xf32>
    %901 = arith.divf %899, %900 : vector<2x64xf32>
    %902 = vector.broadcast %725 : vector<1x64xf32> to vector<2x64xf32>
    %903 = arith.mulf %901, %902 : vector<2x64xf32>
    %904 = vector.broadcast %728 : vector<1x64xf32> to vector<2x64xf32>
    %905 = arith.addf %903, %904 : vector<2x64xf32>
    %906 = vector.extract_strided_slice %905 {offsets = [0, 0], sizes = [2, 16], strides = [1, 1]} : vector<2x64xf32> to vector<2x16xf32>
    %907 = vector.extract_strided_slice %905 {offsets = [0, 16], sizes = [2, 16], strides = [1, 1]} : vector<2x64xf32> to vector<2x16xf32>
    %908 = vector.extract_strided_slice %905 {offsets = [0, 32], sizes = [2, 16], strides = [1, 1]} : vector<2x64xf32> to vector<2x16xf32>
    %909 = vector.extract_strided_slice %905 {offsets = [0, 48], sizes = [2, 16], strides = [1, 1]} : vector<2x64xf32> to vector<2x16xf32>
    %910 = arith.mulf %907, %889 : vector<2x16xf32>
    %911 = arith.mulf %906, %908 : vector<2x16xf32>
    %912 = arith.addf %910, %911 : vector<2x16xf32>
    %913 = math.tanh %912 : vector<2x16xf32>
    %914 = arith.mulf %909, %913 : vector<2x16xf32>
    %915 = tpu.concatenate %753, %776, %799, %822, %845, %868, %891, %914 in 0 : vector<2x16xf32>, vector<2x16xf32>, vector<2x16xf32>, vector<2x16xf32>, vector<2x16xf32>, vector<2x16xf32>, vector<2x16xf32>, vector<2x16xf32> -> vector<16x16xf32>
    %c2_189 = arith.constant 2 : index
    %c0_190 = arith.constant 0 : index
    %c0_191 = arith.constant 0 : index
    %916 = vector.load %arg15[%c2_189, %c0_190, %c0_191] : memref<3x16x8xf32, #tpu.memory_space<vmem>>, vector<1x16x8xf32>
    %917 = vector.shape_cast %916 : vector<1x16x8xf32> to vector<16x8xf32>
    %cst_192 = arith.constant dense<0.000000e+00> : vector<16x8xf32>
    %918 = tpu.matmul %915, %917, %cst_192 {dimension_numbers = #tpu.dot_dimension_numbers<[1], [0], [0], [1], [0, 0, 1, 1], [], []>} : vector<16x16xf32>, vector<16x8xf32>, vector<16x8xf32> -> vector<16x8xf32>
    %c2_193 = arith.constant 2 : index
    %c0_194 = arith.constant 0 : index
    %c0_195 = arith.constant 0 : index
    %919 = vector.load %arg16[%c2_193, %c0_194, %c0_195] : memref<3x1x8xf32, #tpu.memory_space<vmem>>, vector<1x1x8xf32>
    %920 = vector.shape_cast %919 : vector<1x1x8xf32> to vector<1x8xf32>
    %921 = vector.broadcast %920 : vector<1x8xf32> to vector<16x8xf32>
    %922 = arith.addf %918, %921 : vector<16x8xf32>
    %c2_196 = arith.constant 2 : index
    %c0_197 = arith.constant 0 : index
    %c0_198 = arith.constant 0 : index
    %923 = vector.load %arg17[%c2_196, %c0_197, %c0_198] : memref<3x8x1xf32, #tpu.memory_space<vmem>>, vector<1x8x1xf32>
    %924 = vector.shape_cast %923 : vector<1x8x1xf32> to vector<8x1xf32>
    %cst_199 = arith.constant dense<0.000000e+00> : vector<16x1xf32>
    %925 = tpu.matmul %922, %924, %cst_199 {dimension_numbers = #tpu.dot_dimension_numbers<[1], [0], [0], [1], [0, 0, 1, 1], [], []>} : vector<16x8xf32>, vector<8x1xf32>, vector<16x1xf32> -> vector<16x1xf32>
    %c2_200 = arith.constant 2 : index
    %c0_201 = arith.constant 0 : index
    %c0_202 = arith.constant 0 : index
    %926 = vector.load %arg18[%c2_200, %c0_201, %c0_202] : memref<3x1x1xf32, #tpu.memory_space<vmem>>, vector<1x1x1xf32>
    %927 = vector.shape_cast %926 : vector<1x1x1xf32> to vector<1x1xf32>
    %928 = vector.broadcast %927 : vector<1x1xf32> to vector<16x1xf32>
    %929 = arith.addf %925, %928 : vector<16x1xf32>
    %930 = tpu.concatenate %215, %453, %691, %929 in 1 : vector<16x1xf32>, vector<16x1xf32>, vector<16x1xf32>, vector<16x1xf32> -> vector<16x4xf32>
    %c0_203 = arith.constant 0 : index
    %c0_204 = arith.constant 0 : index
    %931 = vector.load %arg19[%c0_203, %c0_204] : memref<16x4xf32, #tpu.memory_space<vmem>>, vector<16x4xf32>
    tpu.vector_store %arg19[%c0_203, %c0_204], %930 {strides = array<i32>} : memref<16x4xf32, #tpu.memory_space<vmem>>, vector<16x4xf32>,
    return
  }
  func.func @transform_0(%arg0: i32) -> (i32, i32) {
    %c0_i32 = arith.constant 0 : i32
    %c0_i32_0 = arith.constant 0 : i32
    %c0_i32_1 = arith.constant 0 : i32
    return %c0_i32, %c0_i32_0 : i32, i32
  }
  func.func @transform_1(%arg0: i32) -> (i32, i32) {
    %c0_i32 = arith.constant 0 : i32
    %c0_i32_0 = arith.constant 0 : i32
    %c0_i32_1 = arith.constant 0 : i32
    return %c0_i32, %c0_i32_0 : i32, i32
  }
  func.func @transform_2(%arg0: i32) -> (i32, i32) {
    %c0_i32 = arith.constant 0 : i32
    %c0_i32_0 = arith.constant 0 : i32
    %c0_i32_1 = arith.constant 0 : i32
    return %c0_i32, %c0_i32_0 : i32, i32
  }
  func.func @transform_3(%arg0: i32) -> (i32, i32) {
    %c0_i32 = arith.constant 0 : i32
    %c0_i32_0 = arith.constant 0 : i32
    %c0_i32_1 = arith.constant 0 : i32
    return %c0_i32, %c0_i32_0 : i32, i32
  }
  func.func @transform_4(%arg0: i32) -> (i32, i32) {
    %c0_i32 = arith.constant 0 : i32
    %c0_i32_0 = arith.constant 0 : i32
    %c0_i32_1 = arith.constant 0 : i32
    return %c0_i32, %c0_i32_0 : i32, i32
  }
  func.func @transform_5(%arg0: i32) -> (i32, i32) {
    %c0_i32 = arith.constant 0 : i32
    %c0_i32_0 = arith.constant 0 : i32
    %c0_i32_1 = arith.constant 0 : i32
    return %c0_i32, %c0_i32_0 : i32, i32
  }
  func.func @transform_6(%arg0: i32) -> (i32, i32) {
    %c0_i32 = arith.constant 0 : i32
    %c0_i32_0 = arith.constant 0 : i32
    %c0_i32_1 = arith.constant 0 : i32
    return %c0_i32, %c0_i32_0 : i32, i32
  }
  func.func @transform_7(%arg0: i32) -> (i32, i32) {
    %c0_i32 = arith.constant 0 : i32
    %c0_i32_0 = arith.constant 0 : i32
    %c0_i32_1 = arith.constant 0 : i32
    return %c0_i32, %c0_i32_0 : i32, i32
  }
  func.func @transform_8(%arg0: i32) -> (i32, i32) {
    %c0_i32 = arith.constant 0 : i32
    %c0_i32_0 = arith.constant 0 : i32
    %c0_i32_1 = arith.constant 0 : i32
    return %c0_i32, %c0_i32_0 : i32, i32
  }
  func.func @transform_9(%arg0: i32) -> (i32, i32, i32) {
    %c0_i32 = arith.constant 0 : i32
    %c0_i32_0 = arith.constant 0 : i32
    %c0_i32_1 = arith.constant 0 : i32
    %c0_i32_2 = arith.constant 0 : i32
    return %c0_i32, %c0_i32_0, %c0_i32_1 : i32, i32, i32
  }
  func.func @transform_10(%arg0: i32) -> (i32, i32, i32) {
    %c0_i32 = arith.constant 0 : i32
    %c0_i32_0 = arith.constant 0 : i32
    %c0_i32_1 = arith.constant 0 : i32
    %c0_i32_2 = arith.constant 0 : i32
    return %c0_i32, %c0_i32_0, %c0_i32_1 : i32, i32, i32
  }
  func.func @transform_11(%arg0: i32) -> (i32, i32, i32) {
    %c0_i32 = arith.constant 0 : i32
    %c0_i32_0 = arith.constant 0 : i32
    %c0_i32_1 = arith.constant 0 : i32
    %c0_i32_2 = arith.constant 0 : i32
    return %c0_i32, %c0_i32_0, %c0_i32_1 : i32, i32, i32
  }
  func.func @transform_12(%arg0: i32) -> (i32, i32, i32) {
    %c0_i32 = arith.constant 0 : i32
    %c0_i32_0 = arith.constant 0 : i32
    %c0_i32_1 = arith.constant 0 : i32
    %c0_i32_2 = arith.constant 0 : i32
    return %c0_i32, %c0_i32_0, %c0_i32_1 : i32, i32, i32
  }
  func.func @transform_13(%arg0: i32) -> (i32, i32, i32) {
    %c0_i32 = arith.constant 0 : i32
    %c0_i32_0 = arith.constant 0 : i32
    %c0_i32_1 = arith.constant 0 : i32
    %c0_i32_2 = arith.constant 0 : i32
    return %c0_i32, %c0_i32_0, %c0_i32_1 : i32, i32, i32
  }
  func.func @transform_14(%arg0: i32) -> (i32, i32, i32) {
    %c0_i32 = arith.constant 0 : i32
    %c0_i32_0 = arith.constant 0 : i32
    %c0_i32_1 = arith.constant 0 : i32
    %c0_i32_2 = arith.constant 0 : i32
    return %c0_i32, %c0_i32_0, %c0_i32_1 : i32, i32, i32
  }
  func.func @transform_15(%arg0: i32) -> (i32, i32, i32) {
    %c0_i32 = arith.constant 0 : i32
    %c0_i32_0 = arith.constant 0 : i32
    %c0_i32_1 = arith.constant 0 : i32
    %c0_i32_2 = arith.constant 0 : i32
    return %c0_i32, %c0_i32_0, %c0_i32_1 : i32, i32, i32
  }
  func.func @transform_16(%arg0: i32) -> (i32, i32, i32) {
    %c0_i32 = arith.constant 0 : i32
    %c0_i32_0 = arith.constant 0 : i32
    %c0_i32_1 = arith.constant 0 : i32
    %c0_i32_2 = arith.constant 0 : i32
    return %c0_i32, %c0_i32_0, %c0_i32_1 : i32, i32, i32
  }
  func.func @transform_17(%arg0: i32) -> (i32, i32, i32) {
    %c0_i32 = arith.constant 0 : i32
    %c0_i32_0 = arith.constant 0 : i32
    %c0_i32_1 = arith.constant 0 : i32
    %c0_i32_2 = arith.constant 0 : i32
    return %c0_i32, %c0_i32_0, %c0_i32_1 : i32, i32, i32
  }
  func.func @transform_18(%arg0: i32) -> (i32, i32) {
    %c0_i32 = arith.constant 0 : i32
    %c0_i32_0 = arith.constant 0 : i32
    %c0_i32_1 = arith.constant 0 : i32
    return %c0_i32, %c0_i32_0 : i32, i32
  }
}

</mosaic_0001>

<bundles_post_ra>
// kernel: inn_forward.1
= control target key start
LH: loop header
LB: loop body
LE: loop exit
PB: predicated region body
PF: predicated region fallthrough
CT: control target
= control target key end

     0   :  { %vm71_vm0 = vcmask 64512   ;;  %v5636_v0 = vmov 0.0   ;;  %vm5637_vm1 = vmmov 0   ;;  %v157_v8 = vlaneseq  ;;  %s5643_s30 = smov 16   ;;  %s6619_s2 = inlined_call_operand.vmem [shape: f32[8,128], index: 2, kind: input, shape index: {}]   ;;  %s6620_s3 = inlined_call_operand.vmem [shape: f32[32,128], index: 3, kind: input, shape index: {}]   ;;  %s6621_s0 = inlined_call_operand.vmem [shape: f32[16,8], index: 0, kind: input, shape index: {}]   ;;  %s6622_s4 = inlined_call_operand.vmem [shape: f32[1,128], index: 4, kind: input, shape index: {}]   ;;  %s6623_s5 = inlined_call_operand.vmem [shape: f32[32,16], index: 5, kind: input, shape index: {}]   ;;  %s6624_s7 = inlined_call_operand.vmem [shape: f32[16,1], index: 7, kind: input, shape index: {}]   ;;  %s6625_s8 = inlined_call_operand.<no memory space> [shape: f32[1,1], index: 8, kind: input, shape index: {}]   ;;  %s6626_s6 = inlined_call_operand.vmem [shape: f32[1,16], index: 6, kind: input, shape index: {}]   ;;  %s6627_s1 = inlined_call_operand.vmem [shape: f32[16,3], index: 1, kind: input, shape index: {}]   ;;  %s6628_s11 = inlined_call_operand.vmem [shape: f32[3,8,64], index: 11, kind: input, shape index: {}]   ;;  %s6629_s12 = inlined_call_operand.vmem [shape: f32[3,16,64], index: 12, kind: input, shape index: {}]   ;;  %s6630_s9 = inlined_call_operand.vmem [shape: f32[3,2,8], index: 9, kind: input, shape index: {}]   ;;  %s6631_s10 = inlined_call_operand.vmem [shape: f32[3,1,8], index: 10, kind: input, shape index: {}]   ;;  %s6632_s13 = inlined_call_operand.vmem [shape: f32[3,1,64], index: 13, kind: input, shape index: {}]   ;;  %s6633_s14 = inlined_call_operand.vmem [shape: f32[3,16,8], index: 14, kind: input, shape index: {}]   ;;  %s6634_s16 = inlined_call_operand.vmem [shape: f32[3,8,1], index: 16, kind: input, shape index: {}]   ;;  %s6635_s15 = inlined_call_operand.vmem [shape: f32[3,1,8], index: 15, kind: input, shape index: {}]   ;;  %s6636_s17 = inlined_call_operand.vmem [shape: f32[3,1,1], index: 17, kind: input, shape index: {}]   ;;  %s6637_s18 = inlined_call_operand.vmem [shape: f32[16,4], index: 18, kind: output, shape index: {}]  }
   0x1   :  { %6640 = sst [smem:[#allocation3_spill]] %s6619_s2  ;;  %5096 = vmatprep.subr.mxu1 %v5636_v0  ;;  %5104 = vmatprep.mubr.msk.f32.mxu1 %vm5637_vm1, %v5636_v0  ;;  %v5638_v11 = vmov 1.0   ;;  %v4815_v13 = vld [vmem:[%s6622_s4] ss:$0 sm:$0xff]  ;;  %s5639_s4 = smov 64   ;;  %vm164_vm8 = vcmask 261120  }
   0x2   :  { %6641 = sst [smem:[#allocation4_spill]] %s6620_s3  ;;  %v158_v9 = vand.u32 127, %v157_v8  ;;  %s5640_s2 = smov 32   ;;  %vm1023_vm9 = vcmask 1041408   ;;  %vm1025_vm10 = vcmask 1043456   ;;  %vm1027_vm11 = vcmask 1045504  }
   0x3   :  { %6642 = sst [smem:[#allocation5_spill]] %s6621_s0  ;;  %vm1137_vm12 = vcmask 130048   ;;  %vm4799_vm13 = vcmask 7168   ;;  %vm4805_vm14 = vcmask 23552   ;;  %vm4802_vm15 = vcmask 15360  }
   0x4   :  { %s6643_s29 = sld [smem:[#allocation3_spill]]  ;;  %vm1356_vm2 = vcmp.ge.s32.totalorder %v158_v9, 32  ;;  %vm1357_vm3 = vcmp.lt.s32.totalorder %v158_v9, 48  ;;  %vm159_vm5 = vcmp.ge.s32.totalorder %v158_v9, 64  ;;  %vm160_vm6 = vcmp.lt.s32.totalorder %v158_v9, 96 }
   0x5   :  { %s6644_s19 = sld [smem:[#allocation4_spill]]  ;;  %vm5810_vm4 = vmand %vm1356_vm2, %vm1357_vm3 }
   0x6   :  { %s6645_s21 = sld [smem:[#allocation5_spill]]  ;;  %v5816_v12 = vsel %vm5810_vm4, 2.0, %v5638_v11  ;;  %vm161_vm7 = vmand %vm159_vm5, %vm160_vm6 }
   0x7   :  { %v5825_v18 = vsel %vm161_vm7, 2.0, %v5638_v11  ;;  %v5830_v27 = vsel %vm161_vm7, -1.0, %v5636_v0 }
   0xa   :  { %v63_v1 = vld [vmem:[%s6643_s29] sm:$0xff]  ;;  %s5642_s29 = smov 96  }
   0xb   :  { %v5752_v2 = vld [vmem:[%s6644_s19 + $0x18] sm:$0xff]  ;;  %5091 = vmatprep.subr.mxu0 %v63_v1  ;;  %v5766_v5 = vld [vmem:[%s6644_s19 + $0x10] sm:$0xff]  ;;  %v5774_v6 = vld [vmem:[%s6644_s19 + $0x8] sm:$0xff] }
   0xc   :  { %v61_v3 = vld [vmem:[%s6645_s21] sm:$0xff]  ;;  %5097 = vmatpush3.msra.mxu1 %v5752_v2  ;;  %v62_v4 = vld [vmem:[%s6645_s21 + $0x8] sm:$0xff]  ;;  %5092 = vmatpush3.msra.mxu0 %v63_v1 }
   0xd   :  { %5093 = vmatprep.mubr.msk.f32.mxu0 %vm71_vm0, %v61_v3  ;;  %5098 = vmatprep.subr.mxu1 %v5636_v0  ;;  %v5782_v7 = vld [vmem:[%s6644_s19] sm:$0xff] }
   0xe   :  { %5094 = vmatmul.mubr.msk.f32.vlgmr.msra.gmra.mxu0 %vm71_vm0, %v62_v4  ;;  %5099 = vmatpush3.msra.mxu1 %v5766_v5 }
   0xf   :  { %5107 = vmatprep.subr.mxu0 %v5636_v0  ;;  %5100 = vmatprep.subr.mxu1 %v5636_v0 }
  0x10   :  { %5108 = vmatpush3.msra.mxu0 %v5752_v2  ;;  %5101 = vmatpush3.msra.mxu1 %v5774_v6 }
  0x11   :  { %5109 = vmatprep.subr.mxu0 %v5636_v0  ;;  %5102 = vmatprep.subr.mxu1 %v5636_v0 }
  0x12   :  { %5110 = vmatpush3.msra.mxu0 %v5766_v5  ;;  %5103 = vmatpush3.msra.mxu1 %v5782_v7 }
  0x13   :  { %5111 = vmatprep.subr.mxu0 %v5636_v0  ;;  %5105 = vmatmul.mubr.f32.vlgmr.msra.gmra.mxu1 %v5636_v0 }
  0x14   :  { %5112 = vmatpush3.msra.mxu0 %v5774_v6  ;;  %5115 = vmatprep.mubr.msk.f32.mxu0 %vm5637_vm1, %v5636_v0 }
  0x15   :  { %5113 = vmatprep.subr.mxu0 %v5636_v0  ;;  %5118 = vmatprep.subr.mxu1 %v5636_v0 }
  0x16   :  { %5114 = vmatpush3.msra.mxu0 %v5782_v7  ;;  %5119 = vmatpush3.msra.mxu1 %v5752_v2 }
  0x17   :  { %5126 = vmatprep.mubr.msk.f32.mxu1 %vm5637_vm1, %v5636_v0  ;;  %5120 = vmatprep.subr.mxu1 %v5636_v0 }
  0x18   :  { %5129 = vmatprep.subr.mxu0 %v5636_v0  ;;  %5121 = vmatpush3.msra.mxu1 %v5766_v5 }
  0x19   :  { %5122 = vmatprep.subr.mxu1 %v5636_v0 }
  0x1a   :  { %5123 = vmatpush3.msra.mxu1 %v5774_v6 }
  0x1b   :  { %5124 = vmatprep.subr.mxu1 %v5636_v0 }
  0x1c   :  { %5125 = vmatpush3.msra.mxu1 %v5782_v7 }
  0x1d   :  { %5140 = vmatprep.subr.mxu1 %v5636_v0 }
  0xce   :  { %v5095_v14 = vpop.f32.mrf.mxu0 }
  0xcf   :  { %v5821_v15 = vadd.f32 %v5095_v14, %v4815_v13 }
  0xd0   :  { %v144_v16 = vpop.f32.mrf.mxu0 }
  0xd1   :  { %v5823_v17 = vadd.f32 %v4815_v13, %v144_v16 }
  0xd3   :  { %v234_v19 = vpop.f32.mrf.mxu1 }
  0xd4   :  { %v238_v20 = vadd.f32 %v234_v19, %v5823_v17 }
  0xd5   :  { %v5106_v21 = vpop.f32.mrf.mxu1 }
  0xd6   :  { %v239_v22 = vmul.f32 %v238_v20, %v5825_v18 }
  0xd8   :  { %v4818_v23 = vmul.f32 -1.442695, %v239_v22 }
  0xda   :  { %5442 = vpow2.f32 %v4818_v23 }
  0xe7   :  { %v5443_v24 = vpop.eup %5442 }
  0xe8   :  { %v243_v25 = vadd.f32 1.0, %v5443_v24 }
  0xea   :  { %5444 = vrcp.f32 %v243_v25 }
  0xf7   :  { %v5445_v26 = vpop.eup %5444 }
  0xf8   :  { %v246_v28 = vmul.f32 %v5445_v26, %v5825_v18 }
  0xfa   :  { %v247_v29 = vadd.f32 %v246_v28, %v5830_v27 }
  0xfc   :  { %250 = vrot.lane.b32.xlu0 %v247_v29, %s5639_s4  ;;  %v248_v32 = vmul.f32 0.0, %v247_v29 }
 0x16e   :  { %v251_v30 = vpop.permute.xlu0 %250 }
 0x16f   :  { %v253_v31 = vmul.f32 %v251_v30, %v247_v29 }
 0x171   :  { %255 = vrot.lane.b32.xlu0 %v253_v31, %s5640_s2 }
 0x1e3   :  { %v256_v33 = vpop.permute.xlu0 %255 }
 0x1e4   :  { %v258_v34 = vadd.f32 %v256_v33, %v248_v32 }
 0x1e6   :  { %5446 = vtanh.f32 %v258_v34  ;;  %v354_v52 = vrot.slane %v258_v34, 6 }
 0x1f3   :  { %v5447_v35 = vpop.eup %5446 }
 0x1f4   :  { %261 = vrot.lane.b32.xlu1 %v5447_v35, %s5639_s4 }
 0x266   :  { %v262_v36 = vpop.permute.xlu1 %261 }
 0x267   :  { %v5837_v37 = vmul.f32 %v262_v36, %v247_v29 }
 0x269   :  { %266 = vrot.lane.b32.xlu1 %v5837_v37, %s5640_s2 }
 0x2db   :  { %v267_v38 = vpop.permute.xlu1 %266 }
 0x2dc   :  { %5116 = vmatmul.mubr.msk.f32.vlgmr.msra.gmra.mxu0 %vm164_vm8, %v267_v38 }
 0x2dd   :  { %5130 = vmatpush3.msra.mxu0 %v5752_v2  ;;  %5137 = vmatprep.mubr.msk.f32.mxu0 %vm5637_vm1, %v5636_v0 }
 0x2de   :  { %5131 = vmatprep.subr.mxu0 %v5636_v0 }
 0x2df   :  { %5132 = vmatpush3.msra.mxu0 %v5766_v5 }
 0x2e0   :  { %5133 = vmatprep.subr.mxu0 %v5636_v0 }
 0x2e1   :  { %5134 = vmatpush3.msra.mxu0 %v5774_v6 }
 0x2e2   :  { %5135 = vmatprep.subr.mxu0 %v5636_v0 }
 0x2e3   :  { %5136 = vmatpush3.msra.mxu0 %v5782_v7 }
 0x2e4   :  { %5151 = vmatprep.subr.mxu0 %v5636_v0 }
 0x39c   :  { %v336_v39 = vpop.f32.mrf.mxu0 }
 0x39d   :  { %v341_v40 = vrot.slane %v336_v39, 6 }
 0x39e   :  { %v5117_v41 = vpop.f32.mrf.mxu0 }
 0x39f   :  { %v343_v42 = vadd.f32 %v341_v40, %v5823_v17 }
 0x3a1   :  { %v344_v43 = vmul.f32 %v343_v42, %v5825_v18 }
 0x3a3   :  { %v4820_v44 = vmul.f32 -1.442695, %v344_v43 }
 0x3a5   :  { %5448 = vpow2.f32 %v4820_v44 }
 0x3b2   :  { %v5449_v45 = vpop.eup %5448 }
 0x3b3   :  { %v348_v46 = vadd.f32 1.0, %v5449_v45 }
 0x3b5   :  { %5450 = vrcp.f32 %v348_v46 }
 0x3c2   :  { %v5451_v47 = vpop.eup %5450 }
 0x3c3   :  { %v351_v48 = vmul.f32 %v5451_v47, %v5825_v18 }
 0x3c5   :  { %v352_v49 = vadd.f32 %v351_v48, %v5830_v27 }
 0x3c7   :  { %358 = vrot.lane.b32.xlu0 %v352_v49, %s5639_s4  ;;  %v356_v53 = vmul.f32 %v354_v52, %v352_v49 }
 0x439   :  { %v359_v50 = vpop.permute.xlu0 %358 }
 0x43a   :  { %v361_v51 = vmul.f32 %v359_v50, %v352_v49 }
 0x43c   :  { %363 = vrot.lane.b32.xlu1 %v361_v51, %s5640_s2 }
 0x4ae   :  { %v364_v54 = vpop.permute.xlu1 %363 }
 0x4af   :  { %v366_v55 = vadd.f32 %v364_v54, %v356_v53 }
 0x4b1   :  { %5452 = vtanh.f32 %v366_v55  ;;  %v463_v21 = vrot.slane %v366_v55, 6 }
 0x4be   :  { %v5453_v56 = vpop.eup %5452 }
 0x4bf   :  { %369 = vrot.lane.b32.xlu0 %v5453_v56, %s5639_s4 }
 0x531   :  { %v370_v57 = vpop.permute.xlu0 %369 }
 0x532   :  { %v372_v58 = vmul.f32 %v370_v57, %v352_v49 }
 0x534   :  { %v374_v59 = vrot.slane %v372_v58, 2  ;;  %v1024_v29 = vsel %vm1023_vm9, %v5837_v37, %v372_v58 }
 0x536   :  { %375 = vrot.lane.b32.xlu1 %v374_v59, %s5640_s2 }
 0x5a8   :  { %v376_v60 = vpop.permute.xlu1 %375 }
 0x5a9   :  { %5127 = vmatmul.mubr.msk.f32.vlgmr.msra.gmra.mxu1 %vm164_vm8, %v376_v60 }
 0x5aa   :  { %5141 = vmatpush3.msra.mxu1 %v5752_v2  ;;  %5148 = vmatprep.mubr.msk.f32.mxu1 %vm5637_vm1, %v5636_v0 }
 0x5ab   :  { %5142 = vmatprep.subr.mxu1 %v5636_v0 }
 0x5ac   :  { %5143 = vmatpush3.msra.mxu1 %v5766_v5 }
 0x5ad   :  { %5144 = vmatprep.subr.mxu1 %v5636_v0 }
 0x5ae   :  { %5145 = vmatpush3.msra.mxu1 %v5774_v6 }
 0x5af   :  { %5146 = vmatprep.subr.mxu1 %v5636_v0 }
 0x5b0   :  { %5147 = vmatpush3.msra.mxu1 %v5782_v7 }
 0x5b1   :  { %5162 = vmatprep.subr.mxu1 %v5636_v0 }
 0x669   :  { %v445_v61 = vpop.f32.mrf.mxu1 }
 0x66a   :  { %v450_v62 = vrot.slane %v445_v61, 4 }
 0x66b   :  { %v5128_v63 = vpop.f32.mrf.mxu1 }
 0x66c   :  { %v452_v1 = vadd.f32 %v450_v62, %v5823_v17 }
 0x66e   :  { %v453_v3 = vmul.f32 %v452_v1, %v5825_v18 }
 0x670   :  { %v4822_v4 = vmul.f32 -1.442695, %v453_v3 }
 0x672   :  { %5454 = vpow2.f32 %v4822_v4 }
 0x67f   :  { %v5455_v9 = vpop.eup %5454 }
 0x680   :  { %v457_v11 = vadd.f32 1.0, %v5455_v9 }
 0x682   :  { %5456 = vrcp.f32 %v457_v11 }
 0x68f   :  { %v5457_v13 = vpop.eup %5456 }
 0x690   :  { %v460_v14 = vmul.f32 %v5457_v13, %v5825_v18 }
 0x692   :  { %v461_v16 = vadd.f32 %v460_v14, %v5830_v27 }
 0x694   :  { %467 = vrot.lane.b32.xlu0 %v461_v16, %s5639_s4  ;;  %v465_v22 = vmul.f32 %v463_v21, %v461_v16 }
 0x706   :  { %v468_v19 = vpop.permute.xlu0 %467 }
 0x707   :  { %v470_v20 = vmul.f32 %v468_v19, %v461_v16 }
 0x709   :  { %472 = vrot.lane.b32.xlu1 %v470_v20, %s5640_s2 }
 0x77b   :  { %v473_v23 = vpop.permute.xlu1 %472 }
 0x77c   :  { %v475_v24 = vadd.f32 %v473_v23, %v465_v22 }
 0x77e   :  { %5458 = vtanh.f32 %v475_v24  ;;  %v572_v46 = vrot.slane %v475_v24, 6 }
 0x78b   :  { %v5459_v25 = vpop.eup %5458 }
 0x78c   :  { %478 = vrot.lane.b32.xlu0 %v5459_v25, %s5639_s4 }
 0x7fe   :  { %v479_v26 = vpop.permute.xlu0 %478 }
 0x7ff   :  { %v481_v28 = vmul.f32 %v479_v26, %v461_v16 }
 0x801   :  { %v483_v30 = vrot.slane %v481_v28, 4  ;;  %v1026_v31 = vsel %vm1025_vm10, %v1024_v29, %v481_v28 }
 0x803   :  { %484 = vrot.lane.b32.xlu1 %v483_v30, %s5640_s2 }
 0x875   :  { %v485_v32 = vpop.permute.xlu1 %484 }
 0x876   :  { %5138 = vmatmul.mubr.msk.f32.vlgmr.msra.gmra.mxu0 %vm164_vm8, %v485_v32 }
 0x877   :  { %5152 = vmatpush3.msra.mxu0 %v5752_v2  ;;  %5159 = vmatprep.mubr.msk.f32.mxu0 %vm5637_vm1, %v5636_v0 }
 0x878   :  { %5153 = vmatprep.subr.mxu0 %v5636_v0 }
 0x879   :  { %5154 = vmatpush3.msra.mxu0 %v5766_v5 }
 0x87a   :  { %5155 = vmatprep.subr.mxu0 %v5636_v0 }
 0x87b   :  { %5156 = vmatpush3.msra.mxu0 %v5774_v6 }
 0x87c   :  { %5157 = vmatprep.subr.mxu0 %v5636_v0 }
 0x87d   :  { %5158 = vmatpush3.msra.mxu0 %v5782_v7 }
 0x87e   :  { %5173 = vmatprep.subr.mxu0 %v5636_v0 }
 0x936   :  { %v554_v33 = vpop.f32.mrf.mxu0 }
 0x937   :  { %v559_v34 = vrot.slane %v554_v33, 2 }
 0x938   :  { %v5139_v35 = vpop.f32.mrf.mxu0 }
 0x939   :  { %v561_v36 = vadd.f32 %v559_v34, %v5823_v17 }
 0x93b   :  { %v562_v37 = vmul.f32 %v561_v36, %v5825_v18 }
 0x93d   :  { %v4824_v38 = vmul.f32 -1.442695, %v562_v37 }
 0x93f   :  { %5460 = vpow2.f32 %v4824_v38 }
 0x94c   :  { %v5461_v39 = vpop.eup %5460 }
 0x94d   :  { %v566_v40 = vadd.f32 1.0, %v5461_v39 }
 0x94f   :  { %5462 = vrcp.f32 %v566_v40 }
 0x95c   :  { %v5463_v41 = vpop.eup %5462 }
 0x95d   :  { %v569_v42 = vmul.f32 %v5463_v41, %v5825_v18 }
 0x95f   :  { %v570_v43 = vadd.f32 %v569_v42, %v5830_v27 }
 0x961   :  { %576 = vrot.lane.b32.xlu0 %v570_v43, %s5639_s4  ;;  %v574_v17 = vmul.f32 %v572_v46, %v570_v43 }
 0x9d3   :  { %v577_v44 = vpop.permute.xlu0 %576 }
 0x9d4   :  { %v579_v45 = vmul.f32 %v577_v44, %v570_v43 }
 0x9d6   :  { %581 = vrot.lane.b32.xlu1 %v579_v45, %s5640_s2 }
 0xa48   :  { %v582_v47 = vpop.permute.xlu1 %581 }
 0xa49   :  { %v584_v48 = vadd.f32 %v582_v47, %v574_v17 }
 0xa4b   :  { %5464 = vtanh.f32 %v584_v48  ;;  %v678_v9 = vrot.slane %v584_v48, 6 }
 0xa58   :  { %v5465_v49 = vpop.eup %5464 }
 0xa59   :  { %587 = vrot.lane.b32.xlu0 %v5465_v49, %s5639_s4 }
 0xacb   :  { %v588_v50 = vpop.permute.xlu0 %587 }
 0xacc   :  { %v590_v51 = vmul.f32 %v588_v50, %v570_v43 }
 0xace   :  { %v592_v52 = vrot.slane %v590_v51, 6  ;;  %v5901_v53 = vsel %vm1027_vm11, %v1026_v31, %v590_v51 }
 0xad0   :  { %593 = vrot.lane.b32.xlu1 %v592_v52, %s5640_s2 }
 0xb42   :  { %v594_v54 = vpop.permute.xlu1 %593 }
 0xb43   :  { %5149 = vmatmul.mubr.msk.f32.vlgmr.msra.gmra.mxu1 %vm164_vm8, %v594_v54 }
 0xb44   :  { %5163 = vmatpush3.msra.mxu1 %v5752_v2  ;;  %5170 = vmatprep.mubr.msk.f32.mxu1 %vm5637_vm1, %v5636_v0 }
 0xb45   :  { %5164 = vmatprep.subr.mxu1 %v5636_v0 }
 0xb46   :  { %5165 = vmatpush3.msra.mxu1 %v5766_v5 }
 0xb47   :  { %5166 = vmatprep.subr.mxu1 %v5636_v0 }
 0xb48   :  { %5167 = vmatpush3.msra.mxu1 %v5774_v6 }
 0xb49   :  { %5168 = vmatprep.subr.mxu1 %v5636_v0 }
 0xb4a   :  { %5169 = vmatpush3.msra.mxu1 %v5782_v7 }
 0xc03   :  { %v663_v55 = vpop.f32.mrf.mxu1 }
 0xc04   :  { %v667_v56 = vadd.f32 %v663_v55, %v5821_v15 }
 0xc05   :  { %v5150_v57 = vpop.f32.mrf.mxu1 }
 0xc06   :  { %v668_v58 = vmul.f32 %v667_v56, %v5825_v18 }
 0xc08   :  { %v4826_v59 = vmul.f32 -1.442695, %v668_v58 }
 0xc0a   :  { %5466 = vpow2.f32 %v4826_v59 }
 0xc17   :  { %v5467_v60 = vpop.eup %5466 }
 0xc18   :  { %v672_v61 = vadd.f32 1.0, %v5467_v60 }
 0xc1a   :  { %5468 = vrcp.f32 %v672_v61 }
 0xc27   :  { %v5469_v62 = vpop.eup %5468 }
 0xc28   :  { %v675_v63 = vmul.f32 %v5469_v62, %v5825_v18 }
 0xc2a   :  { %v676_v1 = vadd.f32 %v675_v63, %v5830_v27 }
 0xc2c   :  { %682 = vrot.lane.b32.xlu0 %v676_v1, %s5639_s4  ;;  %v680_v11 = vmul.f32 %v678_v9, %v676_v1 }
 0xc9e   :  { %v683_v3 = vpop.permute.xlu0 %682 }
 0xc9f   :  { %v685_v4 = vmul.f32 %v683_v3, %v676_v1 }
 0xca1   :  { %687 = vrot.lane.b32.xlu1 %v685_v4, %s5640_s2 }
 0xd13   :  { %v688_v13 = vpop.permute.xlu1 %687 }
 0xd14   :  { %v690_v14 = vadd.f32 %v688_v13, %v680_v11 }
 0xd16   :  { %5470 = vtanh.f32 %v690_v14  ;;  %v786_v32 = vrot.slane %v690_v14, 6 }
 0xd23   :  { %v5471_v16 = vpop.eup %5470 }
 0xd24   :  { %693 = vrot.lane.b32.xlu0 %v5471_v16, %s5639_s4 }
 0xd96   :  { %v694_v19 = vpop.permute.xlu0 %693 }
 0xd97   :  { %v5921_v20 = vmul.f32 %v694_v19, %v676_v1 }
 0xd99   :  { %698 = vrot.lane.b32.xlu1 %v5921_v20, %s5640_s2 }
 0xe0b   :  { %v699_v21 = vpop.permute.xlu1 %698 }
 0xe0c   :  { %5160 = vmatmul.mubr.msk.f32.vlgmr.msra.gmra.mxu0 %vm164_vm8, %v699_v21 }
 0xe0d   :  { %5174 = vmatpush3.msra.mxu0 %v5752_v2  ;;  %5181 = vmatprep.mubr.msk.f32.mxu0 %vm5637_vm1, %v5636_v0 }
 0xe0e   :  { %5175 = vmatprep.subr.mxu0 %v5636_v0 }
 0xe0f   :  { %5176 = vmatpush3.msra.mxu0 %v5766_v5 }
 0xe10   :  { %5177 = vmatprep.subr.mxu0 %v5636_v0 }
 0xe11   :  { %5178 = vmatpush3.msra.mxu0 %v5774_v6 }
 0xe12   :  { %5179 = vmatprep.subr.mxu0 %v5636_v0 }
 0xe13   :  { %5180 = vmatpush3.msra.mxu0 %v5782_v7 }
 0xecc   :  { %v768_v22 = vpop.f32.mrf.mxu0 }
 0xecd   :  { %v773_v23 = vrot.slane %v768_v22, 6 }
 0xece   :  { %v5161_v24 = vpop.f32.mrf.mxu0 }
 0xecf   :  { %v775_v2 = vadd.f32 %v773_v23, %v5821_v15 }
 0xed1   :  { %v776_v25 = vmul.f32 %v775_v2, %v5825_v18 }
 0xed3   :  { %v4828_v26 = vmul.f32 -1.442695, %v776_v25 }
 0xed5   :  { %5472 = vpow2.f32 %v4828_v26 }
 0xee2   :  { %v5473_v28 = vpop.eup %5472 }
 0xee3   :  { %v780_v29 = vadd.f32 1.0, %v5473_v28 }
 0xee5   :  { %5474 = vrcp.f32 %v780_v29  ;;  %v1032_v29 = vld [vmem:[%s6623_s5] sm:$0xff] }
 0xef2   :  { %v5475_v5 = vpop.eup %5474 }
 0xef3   :  { %v783_v30 = vmul.f32 %v5475_v5, %v5825_v18 }
 0xef5   :  { %v784_v6 = vadd.f32 %v783_v30, %v5830_v27 }
 0xef7   :  { %790 = vrot.lane.b32.xlu0 %v784_v6, %s5639_s4  ;;  %v788_v33 = vmul.f32 %v786_v32, %v784_v6  ;;  %v1129_v32 = vld [vmem:[%s6624_s7 + $0x8] sm:$0xff] }
 0xef8   :  { %5195 = vmatprep.subr.mxu0 %v1129_v32 }
 0xf69   :  { %v791_v7 = vpop.permute.xlu0 %790 }
 0xf6a   :  { %v793_v31 = vmul.f32 %v791_v7, %v784_v6 }
 0xf6c   :  { %795 = vrot.lane.b32.xlu1 %v793_v31, %s5640_s2 }
 0xfde   :  { %v796_v34 = vpop.permute.xlu1 %795 }
 0xfdf   :  { %v798_v35 = vadd.f32 %v796_v34, %v788_v33  ;;  %v1128_v33 = vld [vmem:[%s6624_s7] sm:$0xff]  ;;  %v23_v34 = vstv %s6625_s8 }
 0xfe0   :  { %24 = vst [vmem:[#allocation2] sm:$0x1] %v23_v34 }
 0xfe1   :  { %5476 = vtanh.f32 %v798_v35  ;;  %v895_v54 = vrot.slane %v798_v35, 6 }
 0xfee   :  { %v5477_v36 = vpop.eup %5476 }
 0xfef   :  { %801 = vrot.lane.b32.xlu0 %v5477_v36, %s5639_s4  ;;  %v4833_v36 = vld [vmem:[%s6626_s6] ss:$0 sm:$0xff] }
0x1061   :  { %v802_v37 = vpop.permute.xlu0 %801 }
0x1062   :  { %v804_v38 = vmul.f32 %v802_v37, %v784_v6 }
0x1064   :  { %v806_v39 = vrot.slane %v804_v38, 2  ;;  %v1029_v61 = vsel %vm1023_vm9, %v5921_v20, %v804_v38 }
0x1066   :  { %807 = vrot.lane.b32.xlu1 %v806_v39, %s5640_s2 }
0x10d8   :  { %v808_v40 = vpop.permute.xlu1 %807 }
0x10d9   :  { %5171 = vmatmul.mubr.msk.f32.vlgmr.msra.gmra.mxu1 %vm164_vm8, %v808_v40  ;;  %v5641_v40 = vmov 0  }
0x10da   :  { %5436 = vset.pattern.permute.xlu1 %v5641_v40  ;;  %5435 = vset.pattern.permute.xlu0 %v5641_v40 }
0x1199   :  { %v877_v41 = vpop.f32.mrf.mxu1 }
0x119a   :  { %v882_v42 = vrot.slane %v877_v41, 4  ;;  %v6003_v41 = vld [vmem:[%s6627_s1] sm:$0xff] }
0x119b   :  { %v5172_v43 = vpop.f32.mrf.mxu1 }
0x119c   :  { %v884_v44 = vadd.f32 %v882_v42, %v5821_v15  ;;  %v4836_v42 = vld [vmem:[#allocation2] ss:$0 sm:$0xff] }
0x119e   :  { %v885_v45 = vmul.f32 %v884_v44, %v5825_v18 }
0x11a0   :  { %v4830_v46 = vmul.f32 -1.442695, %v885_v45 }
0x11a2   :  { %5478 = vpow2.f32 %v4830_v46 }
0x11af   :  { %v5479_v17 = vpop.eup %5478 }
0x11b0   :  { %v889_v47 = vadd.f32 1.0, %v5479_v17  ;;  %v6015_v17 = vld [vmem:[%s6627_s1 + $0x8] sm:$0xff] }
0x11b2   :  { %5480 = vrcp.f32 %v889_v47  ;;  %v1265_v47 = vld [vmem:[%s6628_s11] sm:$0xff] }
0x11bf   :  { %v5481_v48 = vpop.eup %5480 }
0x11c0   :  { %v892_v49 = vmul.f32 %v5481_v48, %v5825_v18  ;;  %v6024_v48 = vld [vmem:[%s6629_s12 + $0x8] sm:$0xff] }
0x11c2   :  { %v893_v50 = vadd.f32 %v892_v49, %v5830_v27  ;;  %v6031_v49 = vld [vmem:[%s6629_s12] sm:$0xff] }
0x11c4   :  { %899 = vrot.lane.b32.xlu0 %v893_v50, %s5639_s4  ;;  %v897_v55 = vmul.f32 %v895_v54, %v893_v50 }
0x1236   :  { %v900_v51 = vpop.permute.xlu0 %899 }
0x1237   :  { %v902_v52 = vmul.f32 %v900_v51, %v893_v50 }
0x1239   :  { %904 = vrot.lane.b32.xlu1 %v902_v52, %s5640_s2  ;;  %v1221_v52 = vld [vmem:[%s6630_s9] sm:$0x3] }
0x12ab   :  { %v905_v56 = vpop.permute.xlu1 %904 }
0x12ac   :  { %v907_v57 = vadd.f32 %v905_v56, %v897_v55 }
0x12ae   :  { %5482 = vtanh.f32 %v907_v57 }
0x12bb   :  { %v5483_v58 = vpop.eup %5482 }
0x12bc   :  { %910 = vrot.lane.b32.xlu0 %v5483_v58, %s5639_s4 }
0x132e   :  { %v911_v59 = vpop.permute.xlu0 %910 }
0x132f   :  { %v913_v60 = vmul.f32 %v911_v59, %v893_v50  ;;  %v1233_v50 = vshrl.u32 %v157_v8, 7  ;;  %v4839_v8 = vld [vmem:[%s6631_s10] ss:$0 sm:$0xff] }
0x1331   :  { %v915_v62 = vrot.slane %v913_v60, 4  ;;  %v1030_v63 = vsel %vm1025_vm10, %v1029_v61, %v913_v60  ;;  %v6044_v51 = vsub.s32 1, %v1233_v50  ;;  %v6049_v54 = vsub.s32 0, %v1233_v50 }
0x1333   :  { %916 = vrot.lane.b32.xlu1 %v915_v62, %s5640_s2  ;;  %v1251_v55 = vrot.slane %v1221_v52, %v6044_v51  ;;  %v1235_v58 = vrot.slane %v1221_v52, %v6049_v54 }
0x13a5   :  { %v917_v1 = vpop.permute.xlu1 %916 }
0x13a6   :  { %5182 = vmatmul.mubr.msk.f32.vlgmr.msra.gmra.mxu0 %vm164_vm8, %v917_v1 }
0x13a7   :  { %5196 = vmatpush3.msra.mxu0 %v1129_v32 }
0x13a8   :  { %5197 = vmatprep.subr.mxu0 %v1128_v33 }
0x13a9   :  { %5198 = vmatpush3.msra.mxu0 %v1128_v33 }
0x13aa   :  { %5202 = vmatprep.subr.mxu0 %v1265_v47 }
0x1466   :  { %v986_v3 = vpop.f32.mrf.mxu0 }
0x1467   :  { %v991_v4 = vrot.slane %v986_v3, 2 }
0x1468   :  { %v5183_v9 = vpop.f32.mrf.mxu0 }
0x1469   :  { %v993_v11 = vadd.f32 %v991_v4, %v5821_v15  ;;  %v1004_v15 = vrot.slane %v907_v57, 6 }
0x146b   :  { %v994_v13 = vmul.f32 %v993_v11, %v5825_v18 }
0x146d   :  { %v4832_v14 = vmul.f32 -1.442695, %v994_v13 }
0x146f   :  { %5484 = vpow2.f32 %v4832_v14 }
0x147c   :  { %v5485_v16 = vpop.eup %5484 }
0x147d   :  { %v998_v19 = vadd.f32 1.0, %v5485_v16  ;;  %v4840_v16 = vld [vmem:[%s6632_s13] ss:$0 sm:$0xff] }
0x147f   :  { %5486 = vrcp.f32 %v998_v19 }
0x148c   :  { %v5487_v20 = vpop.eup %5486 }
0x148d   :  { %v1001_v21 = vmul.f32 %v5487_v20, %v5825_v18  ;;  %v1035_v18 = vld [vmem:[%s6623_s5 + $0x18] sm:$0xff] }
0x148e   :  { %5184 = vmatprep.subr.mxu1 %v1035_v18 }
0x148f   :  { %v1002_v22 = vadd.f32 %v1001_v21, %v5830_v27  ;;  %v1034_v27 = vld [vmem:[%s6623_s5 + $0x10] sm:$0xff]  ;;  %5185 = vmatpush3.msra.mxu1 %v1035_v18 }
0x1490   :  { %5186 = vmatprep.subr.mxu1 %v1034_v27 }
0x1491   :  { %1008 = vrot.lane.b32.xlu0 %v1002_v22, %s5639_s4  ;;  %v1006_v2 = vmul.f32 %v1004_v15, %v1002_v22  ;;  %5187 = vmatpush3.msra.mxu1 %v1034_v27 }
0x1503   :  { %v1009_v23 = vpop.permute.xlu0 %1008 }
0x1504   :  { %v1011_v24 = vmul.f32 %v1009_v23, %v1002_v22 }
0x1506   :  { %1013 = vrot.lane.b32.xlu1 %v1011_v24, %s5640_s2 }
0x150a   :  { %1045 = vrot.lane.b32.xlu1 %v5901_v53, %s5640_s2  ;;  %v1033_v53 = vld [vmem:[%s6623_s5 + $0x8] sm:$0xff]  ;;  %s5648_s5 = smov 2  }
0x150b   :  { %5188 = vmatprep.subr.mxu1 %v1033_v53 }
0x150c   :  { %5189 = vmatpush3.msra.mxu1 %v1033_v53 }
0x150d   :  { %5190 = vmatprep.subr.mxu1 %v1032_v29 }
0x150e   :  { %5191 = vmatpush3.msra.mxu1 %v1032_v29 }
0x150f   :  { %5207 = vmatprep.subr.mxu1 %v5636_v0 }
0x1578   :  { %v1014_v25 = vpop.permute.xlu1 %1013 }
0x1579   :  { %v1016_v26 = vadd.f32 %v1014_v25, %v1006_v2 }
0x157b   :  { %5488 = vtanh.f32 %v1016_v26 }
0x157c   :  { %v1046_v28 = vpop.permute.xlu1 %1045 }
0x157d   :  { %5192 = vmatprep.mubr.msk.f32.mxu1 %vm164_vm8, %v1046_v28  ;;  %v6076_v28 = vsel %vm5810_vm4, -1.0, %v5636_v0 }
0x1588   :  { %v5489_v5 = vpop.eup %5488 }
0x1589   :  { %1019 = vrot.lane.b32.xlu0 %v5489_v5, %s5639_s4  ;;  %s5644_s4 = smov 80  }
0x15fb   :  { %v1020_v30 = vpop.permute.xlu0 %1019 }
0x15fc   :  { %v1022_v6 = vmul.f32 %v1020_v30, %v1002_v22 }
0x15fe   :  { %v1031_v7 = vsel %vm1027_vm11, %v1030_v63, %v1022_v6 }
0x15ff   :  { %1047 = vrot.lane.b32.xlu0 %v1031_v7, %s5640_s2 }
0x1603   :  { %1240 = vperm.xlu0 %5435, %v6003_v41  }
0x1671   :  { %v1048_v31 = vpop.permute.xlu0 %1047 }
0x1672   :  { %5193 = vmatmul.mubr.msk.f32.vlgmr.msra.gmra.mxu1 %vm164_vm8, %v1048_v31 }
0x1673   :  { %5211 = vmatprep.mubr.msk.f32.mxu1 %vm5637_vm1, %v5636_v0  ;;  %5208 = vmatpush3.msra.mxu1 %v6024_v48 }
0x1674   :  { %5209 = vmatprep.subr.mxu1 %v5636_v0 }
0x1675   :  { %5210 = vmatpush3.msra.mxu1 %v6031_v49 }
0x1676   :  { %5212 = vmatmul.mubr.f32.vlgmr.msra.gmra.mxu1 %v5636_v0  ;;  %5221 = vmatprep.subr.mxu1 %v5636_v0 }
0x1677   :  { %5222 = vmatpush3.msra.mxu1 %v6024_v48  ;;  %5225 = vmatprep.mubr.msk.f32.mxu1 %vm5637_vm1, %v5636_v0 }
0x1678   :  { %5223 = vmatprep.subr.mxu1 %v5636_v0 }
0x1679   :  { %5224 = vmatpush3.msra.mxu1 %v6031_v49 }
0x167a   :  { %5235 = vmatprep.subr.mxu1 %v5636_v0 }
0x167e   :  { %v1241_v57 = vpop.permute.xlu0 %1240 }
0x167f   :  { %v1252_v59 = vmul.f32 %v1251_v55, %v1241_v57 }
0x1732   :  { %v5194_v35 = vpop.f32.mrf.mxu1 }
0x1733   :  { %v1125_v39 = vadd.f32 %v5194_v35, %v4833_v36 }
0x1734   :  { %v1119_v37 = vpop.f32.mrf.mxu1 }
0x1735   :  { %v1120_v38 = vadd.f32 %v4833_v36, %v1119_v37 }
0x1736   :  { %v1429_v13 = vpop.f32.mrf.mxu1 }
0x1737   :  { %5199 = vmatprep.mubr.msk.f32.mxu0 %vm1137_vm12, %v1120_v38 }
0x1738   :  { %5200 = vmatmul.mubr.msk.f32.vlgmr.msra.gmra.mxu0 %vm1137_vm12, %v1125_v39  ;;  %v5213_v14 = vpop.f32.mrf.mxu1 }
0x1739   :  { %5203 = vmatpush3.msra.mxu0 %v1265_v47 }
0x173a   :  { %5214 = vmatprep.subr.mxu0 %v5636_v0 }
0x17f8   :  { %v5201_v43 = vpop.f32.mrf.mxu0 }
0x17f9   :  { %v6006_v44 = vadd.f32 %v5201_v43, %v4836_v42 }
0x17fa   :  { %v1210_v45 = vpop.f32.mrf.mxu0 }
0x17fb   :  { %1229 = vperm.xlu1 %5436, %v6006_v44   ;;  %v6009_v46 = vadd.f32 %v4836_v42, %v1210_v45 }
0x17ff   :  { %1224 = vperm.xlu1 %5436, %v6009_v46  }
0x1803   :  { %1245 = vperm.xlu1 %5436, %v6015_v17  }
0x1876   :  { %v1230_v56 = vpop.permute.xlu1 %1229 }
0x1877   :  { %v1237_v1 = vmul.f32 %v1235_v58, %v1230_v56 }
0x187a   :  { %v1225_v60 = vpop.permute.xlu1 %1224 }
0x187b   :  { %v1236_v61 = vmul.f32 %v1235_v58, %v1225_v60 }
0x187d   :  { %v1254_v62 = vadd.f32 %v1252_v59, %v1236_v61 }
0x187e   :  { %v1246_v63 = vpop.permute.xlu1 %1245 }
0x187f   :  { %v1263_v3 = vadd.f32 %v4839_v8, %v1254_v62  ;;  %v1253_v4 = vmul.f32 %v1251_v55, %v1246_v63 }
0x1881   :  { %v1255_v9 = vadd.f32 %v1253_v4, %v1237_v1  ;;  %5204 = vmatprep.mubr.msk.f32.mxu0 %vm71_vm0, %v1263_v3 }
0x1883   :  { %v1264_v11 = vadd.f32 %v4839_v8, %v1255_v9 }
0x1885   :  { %5205 = vmatmul.mubr.msk.f32.vlgmr.msra.gmra.mxu0 %vm71_vm0, %v1264_v11 }
0x1886   :  { %5215 = vmatpush3.msra.mxu0 %v6024_v48  ;;  %5218 = vmatprep.mubr.msk.f32.mxu0 %vm5637_vm1, %v5636_v0 }
0x1887   :  { %5216 = vmatprep.subr.mxu0 %v5636_v0 }
0x1888   :  { %5217 = vmatpush3.msra.mxu0 %v6031_v49 }
0x1889   :  { %5228 = vmatprep.subr.mxu0 %v5636_v0 }
0x1945   :  { %v5206_v19 = vpop.f32.mrf.mxu0 }
0x1946   :  { %v6067_v20 = vadd.f32 %v5206_v19, %v4840_v16 }
0x1947   :  { %v1345_v21 = vpop.f32.mrf.mxu0 }
0x1948   :  { %v6069_v22 = vadd.f32 %v4840_v16, %v1345_v21 }
0x194a   :  { %v1433_v23 = vadd.f32 %v1429_v13, %v6069_v22 }
0x194c   :  { %v1434_v24 = vmul.f32 %v1433_v23, %v5816_v12 }
0x194e   :  { %v4843_v15 = vmul.f32 -1.442695, %v1434_v24 }
0x1950   :  { %5490 = vpow2.f32 %v4843_v15 }
0x195d   :  { %v5491_v2 = vpop.eup %5490 }
0x195e   :  { %v1438_v25 = vadd.f32 1.0, %v5491_v2 }
0x1960   :  { %5492 = vrcp.f32 %v1438_v25 }
0x196d   :  { %v5493_v26 = vpop.eup %5492 }
0x196e   :  { %v1441_v18 = vmul.f32 %v5493_v26, %v5816_v12 }
0x1970   :  { %v1442_v27 = vadd.f32 %v1441_v18, %v6076_v28 }
0x1972   :  { %1445 = vrot.lane.b32.xlu0 %v1442_v27, %s5642_s29  ;;  %v1443_v5 = vmul.f32 0.0, %v1442_v27 }
0x19e4   :  { %v1446_v53 = vpop.permute.xlu0 %1445 }
0x19e5   :  { %v1448_v29 = vmul.f32 %v1446_v53, %v1442_v27 }
0x19e7   :  { %1450 = vrot.lane.b32.xlu1 %v1448_v29, %s5643_s30 }
0x1a59   :  { %v1451_v30 = vpop.permute.xlu1 %1450 }
0x1a5a   :  { %v1453_v6 = vadd.f32 %v1451_v30, %v1443_v5 }
0x1a5c   :  { %5494 = vtanh.f32 %v1453_v6  ;;  %v1549_v55 = vrot.slane %v1453_v6, 6 }
0x1a69   :  { %v5495_v7 = vpop.eup %5494 }
0x1a6a   :  { %1456 = vrot.lane.b32.xlu0 %v5495_v7, %s5640_s2 }
0x1adc   :  { %v1457_v10 = vpop.permute.xlu0 %1456 }
0x1add   :  { %v6083_v31 = vmul.f32 %v1457_v10, %v1442_v27 }
0x1adf   :  { %1461 = vrot.lane.b32.xlu1 %v6083_v31, %s5644_s4 }
0x1b51   :  { %v1462_v32 = vpop.permute.xlu1 %1461 }
0x1b52   :  { %5219 = vmatmul.mubr.msk.f32.vlgmr.msra.gmra.mxu0 %vm1137_vm12, %v1462_v32 }
0x1b53   :  { %5229 = vmatpush3.msra.mxu0 %v6024_v48  ;;  %5232 = vmatprep.mubr.msk.f32.mxu0 %vm5637_vm1, %v5636_v0 }
0x1b54   :  { %5230 = vmatprep.subr.mxu0 %v5636_v0 }
0x1b55   :  { %5231 = vmatpush3.msra.mxu0 %v6031_v49 }
0x1b56   :  { %5242 = vmatprep.subr.mxu0 %v5636_v0 }
0x1c12   :  { %v1531_v33 = vpop.f32.mrf.mxu0 }
0x1c13   :  { %v1536_v34 = vrot.slane %v1531_v33, 6 }
0x1c14   :  { %v5220_v35 = vpop.f32.mrf.mxu0 }
0x1c15   :  { %v1538_v36 = vadd.f32 %v1536_v34, %v6069_v22 }
0x1c17   :  { %v1539_v37 = vmul.f32 %v1538_v36, %v5816_v12 }
0x1c19   :  { %v4845_v38 = vmul.f32 -1.442695, %v1539_v37 }
0x1c1b   :  { %5496 = vpow2.f32 %v4845_v38 }
0x1c28   :  { %v5497_v39 = vpop.eup %5496 }
0x1c29   :  { %v1543_v42 = vadd.f32 1.0, %v5497_v39 }
0x1c2b   :  { %5498 = vrcp.f32 %v1543_v42 }
0x1c38   :  { %v5499_v43 = vpop.eup %5498 }
0x1c39   :  { %v1546_v45 = vmul.f32 %v5499_v43, %v5816_v12 }
0x1c3b   :  { %v1547_v47 = vadd.f32 %v1546_v45, %v6076_v28 }
0x1c3d   :  { %1553 = vrot.lane.b32.xlu0 %v1547_v47, %s5642_s29  ;;  %v1551_v56 = vmul.f32 %v1549_v55, %v1547_v47 }
0x1caf   :  { %v1554_v50 = vpop.permute.xlu0 %1553 }
0x1cb0   :  { %v1556_v52 = vmul.f32 %v1554_v50, %v1547_v47 }
0x1cb2   :  { %1558 = vrot.lane.b32.xlu1 %v1556_v52, %s5643_s30 }
0x1d24   :  { %v1559_v57 = vpop.permute.xlu1 %1558 }
0x1d25   :  { %v1561_v58 = vadd.f32 %v1559_v57, %v1551_v56 }
0x1d27   :  { %5500 = vtanh.f32 %v1561_v58  ;;  %v1658_v15 = vrot.slane %v1561_v58, 6 }
0x1d34   :  { %v5501_v59 = vpop.eup %5500 }
0x1d35   :  { %1564 = vrot.lane.b32.xlu0 %v5501_v59, %s5640_s2 }
0x1da7   :  { %v1565_v60 = vpop.permute.xlu0 %1564 }
0x1da8   :  { %v1567_v61 = vmul.f32 %v1565_v60, %v1547_v47 }
0x1daa   :  { %v1569_v8 = vrot.slane %v1567_v61, 2  ;;  %v2218_v29 = vsel %vm1023_vm9, %v6083_v31, %v1567_v61 }
0x1dac   :  { %1570 = vrot.lane.b32.xlu1 %v1569_v8, %s5644_s4 }
0x1e1e   :  { %v1571_v62 = vpop.permute.xlu1 %1570 }
0x1e1f   :  { %5226 = vmatmul.mubr.msk.f32.vlgmr.msra.gmra.mxu1 %vm1137_vm12, %v1571_v62 }
0x1e20   :  { %5236 = vmatpush3.msra.mxu1 %v6024_v48  ;;  %5239 = vmatprep.mubr.msk.f32.mxu1 %vm5637_vm1, %v5636_v0 }
0x1e21   :  { %5237 = vmatprep.subr.mxu1 %v5636_v0 }
0x1e22   :  { %5238 = vmatpush3.msra.mxu1 %v6031_v49 }
0x1e23   :  { %5249 = vmatprep.subr.mxu1 %v5636_v0 }
0x1edf   :  { %v1640_v63 = vpop.f32.mrf.mxu1 }
0x1ee0   :  { %v1645_v1 = vrot.slane %v1640_v63, 4 }
0x1ee1   :  { %v5227_v3 = vpop.f32.mrf.mxu1 }
0x1ee2   :  { %v1647_v4 = vadd.f32 %v1645_v1, %v6069_v22 }
0x1ee4   :  { %v1648_v9 = vmul.f32 %v1647_v4, %v5816_v12 }
0x1ee6   :  { %v4847_v11 = vmul.f32 -1.442695, %v1648_v9 }
0x1ee8   :  { %5502 = vpow2.f32 %v4847_v11 }
0x1ef5   :  { %v5503_v13 = vpop.eup %5502 }
0x1ef6   :  { %v1652_v14 = vadd.f32 1.0, %v5503_v13 }
0x1ef8   :  { %5504 = vrcp.f32 %v1652_v14 }
0x1f05   :  { %v5505_v16 = vpop.eup %5504 }
0x1f06   :  { %v1655_v19 = vmul.f32 %v5505_v16, %v5816_v12 }
0x1f08   :  { %v1656_v21 = vadd.f32 %v1655_v19, %v6076_v28 }
0x1f0a   :  { %1662 = vrot.lane.b32.xlu0 %v1656_v21, %s5642_s29  ;;  %v1660_v2 = vmul.f32 %v1658_v15, %v1656_v21 }
0x1f7c   :  { %v1663_v23 = vpop.permute.xlu0 %1662 }
0x1f7d   :  { %v1665_v24 = vmul.f32 %v1663_v23, %v1656_v21 }
0x1f7f   :  { %1667 = vrot.lane.b32.xlu1 %v1665_v24, %s5643_s30 }
0x1ff1   :  { %v1668_v25 = vpop.permute.xlu1 %1667 }
0x1ff2   :  { %v1670_v26 = vadd.f32 %v1668_v25, %v1660_v2 }
0x1ff4   :  { %5506 = vtanh.f32 %v1670_v26  ;;  %v1767_v45 = vrot.slane %v1670_v26, 6 }
0x2001   :  { %v5507_v18 = vpop.eup %5506 }
0x2002   :  { %1673 = vrot.lane.b32.xlu0 %v5507_v18, %s5640_s2 }
0x2074   :  { %v1674_v27 = vpop.permute.xlu0 %1673 }
0x2075   :  { %v1676_v53 = vmul.f32 %v1674_v27, %v1656_v21 }
0x2077   :  { %v1678_v5 = vrot.slane %v1676_v53, 4  ;;  %v2219_v30 = vsel %vm1025_vm10, %v2218_v29, %v1676_v53 }
0x2079   :  { %1679 = vrot.lane.b32.xlu1 %v1678_v5, %s5644_s4 }
0x20eb   :  { %v1680_v6 = vpop.permute.xlu1 %1679 }
0x20ec   :  { %5233 = vmatmul.mubr.msk.f32.vlgmr.msra.gmra.mxu0 %vm1137_vm12, %v1680_v6 }
0x20ed   :  { %5243 = vmatpush3.msra.mxu0 %v6024_v48  ;;  %5246 = vmatprep.mubr.msk.f32.mxu0 %vm5637_vm1, %v5636_v0 }
0x20ee   :  { %5244 = vmatprep.subr.mxu0 %v5636_v0 }
0x20ef   :  { %5245 = vmatpush3.msra.mxu0 %v6031_v49 }
0x20f0   :  { %5256 = vmatprep.subr.mxu0 %v5636_v0 }
0x21ac   :  { %v1749_v7 = vpop.f32.mrf.mxu0 }
0x21ad   :  { %v1754_v10 = vrot.slane %v1749_v7, 2 }
0x21ae   :  { %v5234_v31 = vpop.f32.mrf.mxu0 }
0x21af   :  { %v1756_v32 = vadd.f32 %v1754_v10, %v6069_v22 }
0x21b1   :  { %v1757_v33 = vmul.f32 %v1756_v32, %v5816_v12 }
0x21b3   :  { %v4849_v34 = vmul.f32 -1.442695, %v1757_v33 }
0x21b5   :  { %5508 = vpow2.f32 %v4849_v34 }
0x21c2   :  { %v5509_v35 = vpop.eup %5508 }
0x21c3   :  { %v1761_v36 = vadd.f32 1.0, %v5509_v35 }
0x21c5   :  { %5510 = vrcp.f32 %v1761_v36 }
0x21d2   :  { %v5511_v37 = vpop.eup %5510 }
0x21d3   :  { %v1764_v38 = vmul.f32 %v5511_v37, %v5816_v12 }
0x21d5   :  { %v1765_v39 = vadd.f32 %v1764_v38, %v6076_v28 }
0x21d7   :  { %1771 = vrot.lane.b32.xlu0 %v1765_v39, %s5642_s29  ;;  %v1769_v22 = vmul.f32 %v1767_v45, %v1765_v39 }
0x2249   :  { %v1772_v42 = vpop.permute.xlu0 %1771 }
0x224a   :  { %v1774_v43 = vmul.f32 %v1772_v42, %v1765_v39 }
0x224c   :  { %1776 = vrot.lane.b32.xlu1 %v1774_v43, %s5643_s30 }
0x22be   :  { %v1777_v47 = vpop.permute.xlu1 %1776 }
0x22bf   :  { %v1779_v50 = vadd.f32 %v1777_v47, %v1769_v22 }
0x22c1   :  { %5512 = vtanh.f32 %v1779_v50  ;;  %v1873_v16 = vrot.slane %v1779_v50, 6 }
0x22ce   :  { %v5513_v52 = vpop.eup %5512 }
0x22cf   :  { %1782 = vrot.lane.b32.xlu0 %v5513_v52, %s5640_s2 }
0x2341   :  { %v1783_v55 = vpop.permute.xlu0 %1782 }
0x2342   :  { %v1785_v56 = vmul.f32 %v1783_v55, %v1765_v39 }
0x2344   :  { %v1787_v57 = vrot.slane %v1785_v56, 6  ;;  %v6135_v58 = vsel %vm1027_vm11, %v2219_v30, %v1785_v56 }
0x2346   :  { %1788 = vrot.lane.b32.xlu1 %v1787_v57, %s5644_s4 }
0x23b8   :  { %v1789_v59 = vpop.permute.xlu1 %1788 }
0x23b9   :  { %5240 = vmatmul.mubr.msk.f32.vlgmr.msra.gmra.mxu1 %vm1137_vm12, %v1789_v59 }
0x23ba   :  { %5250 = vmatpush3.msra.mxu1 %v6024_v48  ;;  %5253 = vmatprep.mubr.msk.f32.mxu1 %vm5637_vm1, %v5636_v0 }
0x23bb   :  { %5251 = vmatprep.subr.mxu1 %v5636_v0 }
0x23bc   :  { %5252 = vmatpush3.msra.mxu1 %v6031_v49 }
0x2479   :  { %v1858_v60 = vpop.f32.mrf.mxu1 }
0x247a   :  { %v1862_v61 = vadd.f32 %v1858_v60, %v6067_v20 }
0x247b   :  { %v5241_v8 = vpop.f32.mrf.mxu1 }
0x247c   :  { %v1863_v62 = vmul.f32 %v1862_v61, %v5816_v12 }
0x247e   :  { %v4851_v63 = vmul.f32 -1.442695, %v1863_v62 }
0x2480   :  { %5514 = vpow2.f32 %v4851_v63 }
0x248d   :  { %v5515_v1 = vpop.eup %5514 }
0x248e   :  { %v1867_v3 = vadd.f32 1.0, %v5515_v1 }
0x2490   :  { %5516 = vrcp.f32 %v1867_v3 }
0x249d   :  { %v5517_v4 = vpop.eup %5516 }
0x249e   :  { %v1870_v9 = vmul.f32 %v5517_v4, %v5816_v12 }
0x24a0   :  { %v1871_v11 = vadd.f32 %v1870_v9, %v6076_v28 }
0x24a2   :  { %1877 = vrot.lane.b32.xlu0 %v1871_v11, %s5642_s29  ;;  %v1875_v19 = vmul.f32 %v1873_v16, %v1871_v11 }
0x2514   :  { %v1878_v13 = vpop.permute.xlu0 %1877 }
0x2515   :  { %v1880_v14 = vmul.f32 %v1878_v13, %v1871_v11 }
0x2517   :  { %1882 = vrot.lane.b32.xlu1 %v1880_v14, %s5643_s30 }
0x2589   :  { %v1883_v21 = vpop.permute.xlu1 %1882 }
0x258a   :  { %v1885_v23 = vadd.f32 %v1883_v21, %v1875_v19 }
0x258c   :  { %5518 = vtanh.f32 %v1885_v23  ;;  %v1981_v32 = vrot.slane %v1885_v23, 6 }
0x2599   :  { %v5519_v24 = vpop.eup %5518 }
0x259a   :  { %1888 = vrot.lane.b32.xlu0 %v5519_v24, %s5640_s2 }
0x260c   :  { %v1889_v15 = vpop.permute.xlu0 %1888 }
0x260d   :  { %v6151_v2 = vmul.f32 %v1889_v15, %v1871_v11 }
0x260f   :  { %1893 = vrot.lane.b32.xlu1 %v6151_v2, %s5644_s4 }
0x2681   :  { %v1894_v25 = vpop.permute.xlu1 %1893 }
0x2682   :  { %5247 = vmatmul.mubr.msk.f32.vlgmr.msra.gmra.mxu0 %vm1137_vm12, %v1894_v25 }
0x2683   :  { %5257 = vmatpush3.msra.mxu0 %v6024_v48  ;;  %5260 = vmatprep.mubr.msk.f32.mxu0 %vm5637_vm1, %v5636_v0 }
0x2684   :  { %5258 = vmatprep.subr.mxu0 %v5636_v0 }
0x2685   :  { %5259 = vmatpush3.msra.mxu0 %v6031_v49 }
0x2742   :  { %v1963_v26 = vpop.f32.mrf.mxu0 }
0x2743   :  { %v1968_v18 = vrot.slane %v1963_v26, 6 }
0x2744   :  { %v5248_v27 = vpop.f32.mrf.mxu0 }
0x2745   :  { %v1970_v53 = vadd.f32 %v1968_v18, %v6067_v20 }
0x2747   :  { %v1971_v29 = vmul.f32 %v1970_v53, %v5816_v12 }
0x2749   :  { %v4853_v5 = vmul.f32 -1.442695, %v1971_v29 }
0x274b   :  { %5520 = vpow2.f32 %v4853_v5 }
0x2758   :  { %v5521_v30 = vpop.eup %5520 }
0x2759   :  { %v1975_v6 = vadd.f32 1.0, %v5521_v30 }
0x275b   :  { %5522 = vrcp.f32 %v1975_v6 }
0x2768   :  { %v5523_v48 = vpop.eup %5522 }
0x2769   :  { %v1978_v7 = vmul.f32 %v5523_v48, %v5816_v12 }
0x276b   :  { %v1979_v10 = vadd.f32 %v1978_v7, %v6076_v28 }
0x276d   :  { %1985 = vrot.lane.b32.xlu0 %v1979_v10, %s5642_s29  ;;  %v1983_v33 = vmul.f32 %v1981_v32, %v1979_v10 }
0x27df   :  { %v1986_v49 = vpop.permute.xlu0 %1985 }
0x27e0   :  { %v1988_v31 = vmul.f32 %v1986_v49, %v1979_v10  ;;  %v2225_v49 = vld [vmem:[%s6633_s14 + $0x8] sm:$0xff] }
0x27e1   :  { %5263 = vmatprep.subr.mxu1 %v2225_v49 }
0x27e2   :  { %1990 = vrot.lane.b32.xlu1 %v1988_v31, %s5643_s30  ;;  %v2224_v31 = vld [vmem:[%s6633_s14] sm:$0xff] }
0x2854   :  { %v1991_v34 = vpop.permute.xlu1 %1990 }
0x2855   :  { %v1993_v35 = vadd.f32 %v1991_v34, %v1983_v33 }
0x2857   :  { %5524 = vtanh.f32 %v1993_v35  ;;  %v2090_v62 = vrot.slane %v1993_v35, 6 }
0x2864   :  { %v5525_v36 = vpop.eup %5524 }
0x2865   :  { %1996 = vrot.lane.b32.xlu0 %v5525_v36, %s5640_s2  ;;  %v2318_v36 = vld [vmem:[%s6634_s16] sm:$0xff] }
0x2866   :  { %5270 = vmatprep.subr.mxu0 %v2318_v36 }
0x28d7   :  { %v1997_v37 = vpop.permute.xlu0 %1996 }
0x28d8   :  { %v1999_v38 = vmul.f32 %v1997_v37, %v1979_v10 }
0x28da   :  { %v2001_v39 = vrot.slane %v1999_v38, 2  ;;  %v2221_v13 = vsel %vm1023_vm9, %v6151_v2, %v1999_v38  ;;  %v4858_v38 = vld [vmem:[%s6635_s15] ss:$0 sm:$0xff] }
0x28dc   :  { %2002 = vrot.lane.b32.xlu1 %v2001_v39, %s5644_s4 }
0x294e   :  { %v2003_v42 = vpop.permute.xlu1 %2002 }
0x294f   :  { %5254 = vmatmul.mubr.msk.f32.vlgmr.msra.gmra.mxu1 %vm1137_vm12, %v2003_v42 }
0x2950   :  { %5264 = vmatpush3.msra.mxu1 %v2225_v49 }
0x2951   :  { %5265 = vmatprep.subr.mxu1 %v2224_v31 }
0x2952   :  { %5266 = vmatpush3.msra.mxu1 %v2224_v31 }
0x2a0f   :  { %v2072_v43 = vpop.f32.mrf.mxu1 }
0x2a10   :  { %v2077_v45 = vrot.slane %v2072_v43, 4 }
0x2a11   :  { %v5255_v22 = vpop.f32.mrf.mxu1 }
0x2a12   :  { %v2079_v47 = vadd.f32 %v2077_v45, %v6067_v20  ;;  %v5645_v45 = vmov 1   ;;  %v4861_v22 = vld [vmem:[%s6636_s17] ss:$0 sm:$0xff] }
0x2a13   :  { %5437 = vset.pattern.permute.xlu0 %v5645_v45 }
0x2a14   :  { %v2080_v50 = vmul.f32 %v2079_v47, %v5816_v12 }
0x2a16   :  { %v4855_v52 = vmul.f32 -1.442695, %v2080_v50 }
0x2a18   :  { %5526 = vpow2.f32 %v4855_v52 }
0x2a25   :  { %v5527_v55 = vpop.eup %5526 }
0x2a26   :  { %v2084_v56 = vadd.f32 1.0, %v5527_v55 }
0x2a28   :  { %5528 = vrcp.f32 %v2084_v56  ;;  %v4867_v56 = vld [vmem:[%s6628_s11 + $0x8] sm:$0xff] }
0x2a29   :  { %5275 = vmatprep.subr.mxu1 %v4867_v56 }
0x2a35   :  { %v5529_v57 = vpop.eup %5528 }
0x2a36   :  { %v2087_v59 = vmul.f32 %v5529_v57, %v5816_v12  ;;  %v6236_v57 = vld [vmem:[%s6629_s12 + $0x10] sm:$0xff] }
0x2a38   :  { %v2088_v60 = vadd.f32 %v2087_v59, %v6076_v28 }
0x2a3a   :  { %2094 = vrot.lane.b32.xlu0 %v2088_v60, %s5642_s29  ;;  %v2092_v63 = vmul.f32 %v2090_v62, %v2088_v60 }
0x2aac   :  { %v2095_v61 = vpop.permute.xlu0 %2094 }
0x2aad   :  { %v2097_v8 = vmul.f32 %v2095_v61, %v2088_v60 }
0x2aaf   :  { %2099 = vrot.lane.b32.xlu1 %v2097_v8, %s5643_s30 }
0x2b21   :  { %v2100_v1 = vpop.permute.xlu1 %2099 }
0x2b22   :  { %v2102_v3 = vadd.f32 %v2100_v1, %v2092_v63 }
0x2b24   :  { %5530 = vtanh.f32 %v2102_v3 }
0x2b31   :  { %v5531_v4 = vpop.eup %5530 }
0x2b32   :  { %2105 = vrot.lane.b32.xlu0 %v5531_v4, %s5640_s2 }
0x2ba4   :  { %v2106_v9 = vpop.permute.xlu0 %2105 }
0x2ba5   :  { %v2108_v11 = vmul.f32 %v2106_v9, %v2088_v60 }
0x2ba7   :  { %v2110_v14 = vrot.slane %v2108_v11, 4  ;;  %v2222_v16 = vsel %vm1025_vm10, %v2221_v13, %v2108_v11 }
0x2ba9   :  { %2111 = vrot.lane.b32.xlu1 %v2110_v14, %s5644_s4 }
0x2c1b   :  { %v2112_v19 = vpop.permute.xlu1 %2111 }
0x2c1c   :  { %5261 = vmatmul.mubr.msk.f32.vlgmr.msra.gmra.mxu0 %vm1137_vm12, %v2112_v19 }
0x2c1d   :  { %5271 = vmatpush3.msra.mxu0 %v2318_v36 }
0x2c1e   :  { %5280 = vmatprep.subr.mxu0 %v5636_v0 }
0x2cdc   :  { %v2181_v21 = vpop.f32.mrf.mxu0 }
0x2cdd   :  { %v2186_v23 = vrot.slane %v2181_v21, 2 }
0x2cde   :  { %v5262_v24 = vpop.f32.mrf.mxu0 }
0x2cdf   :  { %v2188_v15 = vadd.f32 %v2186_v23, %v6067_v20  ;;  %v2199_v20 = vrot.slane %v2102_v3, 6  ;;  %v4869_v23 = vld [vmem:[%s6632_s13 + $0x1] ss:$0 sm:$0xff] }
0x2ce1   :  { %v2189_v25 = vmul.f32 %v2188_v15, %v5816_v12 }
0x2ce3   :  { %v4857_v26 = vmul.f32 -1.442695, %v2189_v25 }
0x2ce5   :  { %5532 = vpow2.f32 %v4857_v26 }
0x2cf2   :  { %v5533_v18 = vpop.eup %5532 }
0x2cf3   :  { %v2193_v27 = vadd.f32 1.0, %v5533_v18 }
0x2cf5   :  { %5534 = vrcp.f32 %v2193_v27 }
0x2d02   :  { %v5535_v2 = vpop.eup %5534 }
0x2d03   :  { %v2196_v53 = vmul.f32 %v5535_v2, %v5816_v12 }
0x2d05   :  { %v2197_v29 = vadd.f32 %v2196_v53, %v6076_v28 }
0x2d07   :  { %2203 = vrot.lane.b32.xlu0 %v2197_v29, %s5642_s29  ;;  %v2201_v6 = vmul.f32 %v2199_v20, %v2197_v29 }
0x2d79   :  { %v2204_v5 = vpop.permute.xlu0 %2203 }
0x2d7a   :  { %v2206_v30 = vmul.f32 %v2204_v5, %v2197_v29 }
0x2d7c   :  { %2208 = vrot.lane.b32.xlu1 %v2206_v30, %s5643_s30 }
0x2d80   :  { %2235 = vrot.lane.b32.xlu1 %v6135_v58, %s5644_s4 }
0x2dee   :  { %v2209_v48 = vpop.permute.xlu1 %2208 }
0x2def   :  { %v2211_v7 = vadd.f32 %v2209_v48, %v2201_v6 }
0x2df1   :  { %5536 = vtanh.f32 %v2211_v7 }
0x2df2   :  { %v2236_v10 = vpop.permute.xlu1 %2235 }
0x2df3   :  { %5267 = vmatprep.mubr.msk.f32.mxu1 %vm1137_vm12, %v2236_v10 }
0x2dfe   :  { %v5537_v58 = vpop.eup %5536 }
0x2dff   :  { %2214 = vrot.lane.b32.xlu0 %v5537_v58, %s5640_s2 }
0x2e71   :  { %v2215_v32 = vpop.permute.xlu0 %2214 }
0x2e72   :  { %v2217_v33 = vmul.f32 %v2215_v32, %v2197_v29 }
0x2e74   :  { %v2223_v34 = vsel %vm1027_vm11, %v2222_v16, %v2217_v33 }
0x2e75   :  { %2237 = vrot.lane.b32.xlu0 %v2223_v34, %s5644_s4 }
0x2e79   :  { %2426 = vperm.xlu0 %5437, %v6003_v41   ;;  %v6229_v41 = vld [vmem:[%s6629_s12 + $0x18] sm:$0xff] }
0x2ee7   :  { %v2238_v35 = vpop.permute.xlu0 %2237 }
0x2ee8   :  { %5268 = vmatmul.mubr.msk.f32.vlgmr.msra.gmra.mxu1 %vm1137_vm12, %v2238_v35 }
0x2ee9   :  { %5276 = vmatpush3.msra.mxu1 %v4867_v56 }
0x2eea   :  { %5287 = vmatprep.subr.mxu1 %v5636_v0 }
0x2ef4   :  { %v2427_v61 = vpop.permute.xlu0 %2426 }
0x2fa8   :  { %v5269_v37 = vpop.f32.mrf.mxu1 }
0x2fa9   :  { %v2315_v43 = vadd.f32 %v5269_v37, %v4858_v38 }
0x2faa   :  { %v2309_v39 = vpop.f32.mrf.mxu1 }
0x2fab   :  { %v2310_v42 = vadd.f32 %v4858_v38, %v2309_v39 }
0x2fad   :  { %5272 = vmatprep.mubr.msk.f32.mxu0 %vm71_vm0, %v2310_v42 }
0x2fae   :  { %5273 = vmatmul.mubr.msk.f32.vlgmr.msra.gmra.mxu0 %vm71_vm0, %v2315_v43 }
0x2faf   :  { %5284 = vmatprep.mubr.msk.f32.mxu0 %vm5637_vm1, %v5636_v0  ;;  %5281 = vmatpush3.msra.mxu0 %v6229_v41 }
0x2fb0   :  { %5282 = vmatprep.subr.mxu0 %v5636_v0 }
0x2fb1   :  { %5283 = vmatpush3.msra.mxu0 %v6236_v57 }
0x2fb2   :  { %5285 = vmatmul.mubr.f32.vlgmr.msra.gmra.mxu0 %v5636_v0  ;;  %5294 = vmatprep.subr.mxu0 %v5636_v0 }
0x2fb3   :  { %5295 = vmatpush3.msra.mxu0 %v6229_v41  ;;  %5298 = vmatprep.mubr.msk.f32.mxu0 %vm5637_vm1, %v5636_v0 }
0x2fb4   :  { %5296 = vmatprep.subr.mxu0 %v5636_v0 }
0x2fb5   :  { %5297 = vmatpush3.msra.mxu0 %v6236_v57 }
0x2fb6   :  { %5308 = vmatprep.subr.mxu0 %v5636_v0 }
0x306e   :  { %v5274_v47 = vpop.f32.mrf.mxu0 }
0x306f   :  { %v6216_v50 = vadd.f32 %v5274_v47, %v4861_v22 }
0x3070   :  { %v2398_v52 = vpop.f32.mrf.mxu0 }
0x3071   :  { %2416 = vperm.xlu1 %5436, %v6216_v50   ;;  %v6219_v55 = vadd.f32 %v4861_v22, %v2398_v52 }
0x3072   :  { %v2611_v19 = vpop.f32.mrf.mxu0 }
0x3074   :  { %v5286_v21 = vpop.f32.mrf.mxu0 }
0x3075   :  { %2411 = vperm.xlu1 %5436, %v6219_v55  }
0x3079   :  { %5438 = vset.pattern.permute.xlu1 %v5645_v45 }
0x307a   :  { %2430 = vperm.xlu1 %5438, %v6015_v17   ;;  %v4864_v17 = vld [vmem:[%s6630_s9 + $0x2] sm:$0x3] }
0x307b   :  { %v2436_v59 = vrot.slane %v4864_v17, %v6044_v51  ;;  %v2422_v8 = vrot.slane %v4864_v17, %v6049_v54 }
0x307d   :  { %v2437_v62 = vmul.f32 %v2436_v59, %v2427_v61 }
0x307e   :  { %5440 = vset.pattern.permute.xlu1 %v5641_v40  ;;  %v4866_v40 = vld [vmem:[%s6631_s10 + $0x1] ss:$0 sm:$0xff] }
0x30ec   :  { %v2417_v60 = vpop.permute.xlu1 %2416 }
0x30ed   :  { %v2424_v11 = vmul.f32 %v2422_v8, %v2417_v60 }
0x30f0   :  { %v2412_v63 = vpop.permute.xlu1 %2411 }
0x30f1   :  { %v2423_v1 = vmul.f32 %v2422_v8, %v2412_v63 }
0x30f3   :  { %v2439_v3 = vadd.f32 %v2437_v62, %v2423_v1 }
0x30f5   :  { %v2449_v4 = vadd.f32 %v4866_v40, %v2439_v3  ;;  %v2431_v9 = vpop.permute.xlu1 %2430 }
0x30f6   :  { %v2438_v13 = vmul.f32 %v2436_v59, %v2431_v9 }
0x30f7   :  { %5277 = vmatprep.mubr.msk.f32.mxu1 %vm71_vm0, %v2449_v4 }
0x30f8   :  { %v2440_v14 = vadd.f32 %v2438_v13, %v2424_v11 }
0x30fa   :  { %v2450_v16 = vadd.f32 %v4866_v40, %v2440_v14 }
0x30fc   :  { %5278 = vmatmul.mubr.msk.f32.vlgmr.msra.gmra.mxu1 %vm71_vm0, %v2450_v16 }
0x30fd   :  { %5288 = vmatpush3.msra.mxu1 %v6229_v41  ;;  %5291 = vmatprep.mubr.msk.f32.mxu1 %vm5637_vm1, %v5636_v0 }
0x30fe   :  { %5289 = vmatprep.subr.mxu1 %v5636_v0 }
0x30ff   :  { %5290 = vmatpush3.msra.mxu1 %v6236_v57 }
0x3100   :  { %5301 = vmatprep.subr.mxu1 %v5636_v0 }
0x31bc   :  { %v5279_v24 = vpop.f32.mrf.mxu1 }
0x31bd   :  { %v6268_v15 = vadd.f32 %v5279_v24, %v4869_v23 }
0x31be   :  { %v2533_v25 = vpop.f32.mrf.mxu1 }
0x31bf   :  { %v6270_v26 = vadd.f32 %v4869_v23, %v2533_v25 }
0x31c1   :  { %v2615_v18 = vadd.f32 %v2611_v19, %v6270_v26 }
0x31c3   :  { %v2616_v27 = vmul.f32 %v2615_v18, %v5816_v12 }
0x31c5   :  { %v4874_v2 = vmul.f32 -1.442695, %v2616_v27 }
0x31c7   :  { %5538 = vpow2.f32 %v4874_v2 }
0x31d4   :  { %v5539_v53 = vpop.eup %5538 }
0x31d5   :  { %v2620_v29 = vadd.f32 1.0, %v5539_v53 }
0x31d7   :  { %5540 = vrcp.f32 %v2620_v29 }
0x31e4   :  { %v5541_v5 = vpop.eup %5540 }
0x31e5   :  { %v2623_v30 = vmul.f32 %v5541_v5, %v5816_v12 }
0x31e7   :  { %v2624_v20 = vadd.f32 %v2623_v30, %v6076_v28 }
0x31e9   :  { %2627 = vrot.lane.b32.xlu0 %v2624_v20, %s5642_s29  ;;  %v2625_v7 = vmul.f32 0.0, %v2624_v20 }
0x325b   :  { %v2628_v6 = vpop.permute.xlu0 %2627 }
0x325c   :  { %v2630_v48 = vmul.f32 %v2628_v6, %v2624_v20 }
0x325e   :  { %2632 = vrot.lane.b32.xlu1 %v2630_v48, %s5643_s30 }
0x32d0   :  { %v2633_v10 = vpop.permute.xlu1 %2632 }
0x32d1   :  { %v2635_v49 = vadd.f32 %v2633_v10, %v2625_v7 }
0x32d3   :  { %5542 = vtanh.f32 %v2635_v49  ;;  %v2731_v17 = vrot.slane %v2635_v49, 6 }
0x32e0   :  { %v5543_v31 = vpop.eup %5542 }
0x32e1   :  { %2638 = vrot.lane.b32.xlu0 %v5543_v31, %s5640_s2 }
0x3353   :  { %v2639_v58 = vpop.permute.xlu0 %2638 }
0x3354   :  { %v6279_v32 = vmul.f32 %v2639_v58, %v2624_v20 }
0x3356   :  { %2643 = vrot.lane.b32.xlu1 %v6279_v32, %s5644_s4 }
0x33c8   :  { %v2644_v33 = vpop.permute.xlu1 %2643 }
0x33c9   :  { %5292 = vmatmul.mubr.msk.f32.vlgmr.msra.gmra.mxu1 %vm1137_vm12, %v2644_v33 }
0x33ca   :  { %5302 = vmatpush3.msra.mxu1 %v6229_v41  ;;  %5305 = vmatprep.mubr.msk.f32.mxu1 %vm5637_vm1, %v5636_v0 }
0x33cb   :  { %5303 = vmatprep.subr.mxu1 %v5636_v0 }
0x33cc   :  { %5304 = vmatpush3.msra.mxu1 %v6236_v57 }
0x33cd   :  { %5315 = vmatprep.subr.mxu1 %v5636_v0 }
0x3489   :  { %v2713_v34 = vpop.f32.mrf.mxu1 }
0x348a   :  { %v2718_v35 = vrot.slane %v2713_v34, 6 }
0x348b   :  { %v5293_v36 = vpop.f32.mrf.mxu1 }
0x348c   :  { %v2720_v37 = vadd.f32 %v2718_v35, %v6270_v26 }
0x348e   :  { %v2721_v38 = vmul.f32 %v2720_v37, %v5816_v12 }
0x3490   :  { %v4876_v39 = vmul.f32 -1.442695, %v2721_v38 }
0x3492   :  { %5544 = vpow2.f32 %v4876_v39 }
0x349f   :  { %v5545_v42 = vpop.eup %5544 }
0x34a0   :  { %v2725_v43 = vadd.f32 1.0, %v5545_v42 }
0x34a2   :  { %5546 = vrcp.f32 %v2725_v43 }
0x34af   :  { %v5547_v45 = vpop.eup %5546 }
0x34b0   :  { %v2728_v22 = vmul.f32 %v5547_v45, %v5816_v12 }
0x34b2   :  { %v2729_v47 = vadd.f32 %v2728_v22, %v6076_v28 }
0x34b4   :  { %2735 = vrot.lane.b32.xlu0 %v2729_v47, %s5642_s29  ;;  %v2733_v59 = vmul.f32 %v2731_v17, %v2729_v47 }
0x3526   :  { %v2736_v52 = vpop.permute.xlu0 %2735 }
0x3527   :  { %v2738_v56 = vmul.f32 %v2736_v52, %v2729_v47 }
0x3529   :  { %2740 = vrot.lane.b32.xlu1 %v2738_v56, %s5643_s30 }
0x359b   :  { %v2741_v60 = vpop.permute.xlu1 %2740 }
0x359c   :  { %v2743_v61 = vadd.f32 %v2741_v60, %v2733_v59 }
0x359e   :  { %5548 = vtanh.f32 %v2743_v61  ;;  %v2840_v27 = vrot.slane %v2743_v61, 6 }
0x35ab   :  { %v5549_v8 = vpop.eup %5548 }
0x35ac   :  { %2746 = vrot.lane.b32.xlu0 %v5549_v8, %s5640_s2 }
0x361e   :  { %v2747_v62 = vpop.permute.xlu0 %2746 }
0x361f   :  { %v2749_v63 = vmul.f32 %v2747_v62, %v2729_v47 }
0x3621   :  { %v2751_v1 = vrot.slane %v2749_v63, 2  ;;  %v3400_v6 = vsel %vm1023_vm9, %v6279_v32, %v2749_v63 }
0x3623   :  { %2752 = vrot.lane.b32.xlu1 %v2751_v1, %s5644_s4 }
0x3695   :  { %v2753_v40 = vpop.permute.xlu1 %2752 }
0x3696   :  { %5299 = vmatmul.mubr.msk.f32.vlgmr.msra.gmra.mxu0 %vm1137_vm12, %v2753_v40 }
0x3697   :  { %5309 = vmatpush3.msra.mxu0 %v6229_v41  ;;  %5312 = vmatprep.mubr.msk.f32.mxu0 %vm5637_vm1, %v5636_v0 }
0x3698   :  { %5310 = vmatprep.subr.mxu0 %v5636_v0 }
0x3699   :  { %5311 = vmatpush3.msra.mxu0 %v6236_v57 }
0x369a   :  { %5322 = vmatprep.subr.mxu0 %v5636_v0 }
0x3756   :  { %v2822_v3 = vpop.f32.mrf.mxu0 }
0x3757   :  { %v2827_v4 = vrot.slane %v2822_v3, 4 }
0x3758   :  { %v5300_v9 = vpop.f32.mrf.mxu0 }
0x3759   :  { %v2829_v11 = vadd.f32 %v2827_v4, %v6270_v26 }
0x375b   :  { %v2830_v13 = vmul.f32 %v2829_v11, %v5816_v12 }
0x375d   :  { %v4878_v14 = vmul.f32 -1.442695, %v2830_v13 }
0x375f   :  { %5550 = vpow2.f32 %v4878_v14 }
0x376c   :  { %v5551_v16 = vpop.eup %5550 }
0x376d   :  { %v2834_v19 = vadd.f32 1.0, %v5551_v16 }
0x376f   :  { %5552 = vrcp.f32 %v2834_v19 }
0x377c   :  { %v5553_v21 = vpop.eup %5552 }
0x377d   :  { %v2837_v23 = vmul.f32 %v5553_v21, %v5816_v12 }
0x377f   :  { %v2838_v24 = vadd.f32 %v2837_v23, %v6076_v28 }
0x3781   :  { %2844 = vrot.lane.b32.xlu0 %v2838_v24, %s5642_s29  ;;  %v2842_v2 = vmul.f32 %v2840_v27, %v2838_v24 }
0x37f3   :  { %v2845_v25 = vpop.permute.xlu0 %2844 }
0x37f4   :  { %v2847_v18 = vmul.f32 %v2845_v25, %v2838_v24 }
0x37f6   :  { %2849 = vrot.lane.b32.xlu1 %v2847_v18, %s5643_s30 }
0x3868   :  { %v2850_v53 = vpop.permute.xlu1 %2849 }
0x3869   :  { %v2852_v29 = vadd.f32 %v2850_v53, %v2842_v2 }
0x386b   :  { %5554 = vtanh.f32 %v2852_v29  ;;  %v2949_v45 = vrot.slane %v2852_v29, 6 }
0x3878   :  { %v5555_v5 = vpop.eup %5554 }
0x3879   :  { %2855 = vrot.lane.b32.xlu0 %v5555_v5, %s5640_s2 }
0x38eb   :  { %v2856_v30 = vpop.permute.xlu0 %2855 }
0x38ec   :  { %v2858_v20 = vmul.f32 %v2856_v30, %v2838_v24 }
0x38ee   :  { %v2860_v48 = vrot.slane %v2858_v20, 4  ;;  %v3401_v7 = vsel %vm1025_vm10, %v3400_v6, %v2858_v20 }
0x38f0   :  { %2861 = vrot.lane.b32.xlu1 %v2860_v48, %s5644_s4 }
0x3962   :  { %v2862_v10 = vpop.permute.xlu1 %2861 }
0x3963   :  { %5306 = vmatmul.mubr.msk.f32.vlgmr.msra.gmra.mxu1 %vm1137_vm12, %v2862_v10 }
0x3964   :  { %5316 = vmatpush3.msra.mxu1 %v6229_v41  ;;  %5319 = vmatprep.mubr.msk.f32.mxu1 %vm5637_vm1, %v5636_v0 }
0x3965   :  { %5317 = vmatprep.subr.mxu1 %v5636_v0 }
0x3966   :  { %5318 = vmatpush3.msra.mxu1 %v6236_v57 }
0x3967   :  { %5329 = vmatprep.subr.mxu1 %v5636_v0 }
0x3a23   :  { %v2931_v49 = vpop.f32.mrf.mxu1 }
0x3a24   :  { %v2936_v31 = vrot.slane %v2931_v49, 2 }
0x3a25   :  { %v5307_v58 = vpop.f32.mrf.mxu1 }
0x3a26   :  { %v2938_v32 = vadd.f32 %v2936_v31, %v6270_v26 }
0x3a28   :  { %v2939_v33 = vmul.f32 %v2938_v32, %v5816_v12 }
0x3a2a   :  { %v4880_v34 = vmul.f32 -1.442695, %v2939_v33 }
0x3a2c   :  { %5556 = vpow2.f32 %v4880_v34 }
0x3a39   :  { %v5557_v35 = vpop.eup %5556 }
0x3a3a   :  { %v2943_v36 = vadd.f32 1.0, %v5557_v35 }
0x3a3c   :  { %5558 = vrcp.f32 %v2943_v36 }
0x3a49   :  { %v5559_v37 = vpop.eup %5558 }
0x3a4a   :  { %v2946_v38 = vmul.f32 %v5559_v37, %v5816_v12 }
0x3a4c   :  { %v2947_v39 = vadd.f32 %v2946_v38, %v6076_v28 }
0x3a4e   :  { %2953 = vrot.lane.b32.xlu0 %v2947_v39, %s5642_s29  ;;  %v2951_v26 = vmul.f32 %v2949_v45, %v2947_v39 }
0x3ac0   :  { %v2954_v42 = vpop.permute.xlu0 %2953 }
0x3ac1   :  { %v2956_v43 = vmul.f32 %v2954_v42, %v2947_v39 }
0x3ac3   :  { %2958 = vrot.lane.b32.xlu1 %v2956_v43, %s5643_s30 }
0x3b35   :  { %v2959_v22 = vpop.permute.xlu1 %2958 }
0x3b36   :  { %v2961_v47 = vadd.f32 %v2959_v22, %v2951_v26 }
0x3b38   :  { %5560 = vtanh.f32 %v2961_v47  ;;  %v3055_v19 = vrot.slane %v2961_v47, 6 }
0x3b45   :  { %v5561_v52 = vpop.eup %5560 }
0x3b46   :  { %2964 = vrot.lane.b32.xlu0 %v5561_v52, %s5640_s2 }
0x3bb8   :  { %v2965_v56 = vpop.permute.xlu0 %2964 }
0x3bb9   :  { %v2967_v17 = vmul.f32 %v2965_v56, %v2947_v39 }
0x3bbb   :  { %v2969_v59 = vrot.slane %v2967_v17, 6  ;;  %v6331_v60 = vsel %vm1027_vm11, %v3401_v7, %v2967_v17 }
0x3bbd   :  { %2970 = vrot.lane.b32.xlu1 %v2969_v59, %s5644_s4 }
0x3c2f   :  { %v2971_v61 = vpop.permute.xlu1 %2970 }
0x3c30   :  { %5313 = vmatmul.mubr.msk.f32.vlgmr.msra.gmra.mxu0 %vm1137_vm12, %v2971_v61 }
0x3c31   :  { %5323 = vmatpush3.msra.mxu0 %v6229_v41  ;;  %5326 = vmatprep.mubr.msk.f32.mxu0 %vm5637_vm1, %v5636_v0 }
0x3c32   :  { %5324 = vmatprep.subr.mxu0 %v5636_v0 }
0x3c33   :  { %5325 = vmatpush3.msra.mxu0 %v6236_v57 }
0x3cf0   :  { %v3040_v8 = vpop.f32.mrf.mxu0 }
0x3cf1   :  { %v3044_v62 = vadd.f32 %v3040_v8, %v6268_v15 }
0x3cf2   :  { %v5314_v63 = vpop.f32.mrf.mxu0 }
0x3cf3   :  { %v3045_v1 = vmul.f32 %v3044_v62, %v5816_v12 }
0x3cf5   :  { %v4882_v40 = vmul.f32 -1.442695, %v3045_v1 }
0x3cf7   :  { %5562 = vpow2.f32 %v4882_v40 }
0x3d04   :  { %v5563_v3 = vpop.eup %5562 }
0x3d05   :  { %v3049_v4 = vadd.f32 1.0, %v5563_v3 }
0x3d07   :  { %5564 = vrcp.f32 %v3049_v4 }
0x3d14   :  { %v5565_v9 = vpop.eup %5564 }
0x3d15   :  { %v3052_v11 = vmul.f32 %v5565_v9, %v5816_v12 }
0x3d17   :  { %v3053_v13 = vadd.f32 %v3052_v11, %v6076_v28 }
0x3d19   :  { %3059 = vrot.lane.b32.xlu0 %v3053_v13, %s5642_s29  ;;  %v3057_v21 = vmul.f32 %v3055_v19, %v3053_v13 }
0x3d8b   :  { %v3060_v14 = vpop.permute.xlu0 %3059 }
0x3d8c   :  { %v3062_v16 = vmul.f32 %v3060_v14, %v3053_v13 }
0x3d8e   :  { %3064 = vrot.lane.b32.xlu1 %v3062_v16, %s5643_s30 }
0x3e00   :  { %v3065_v23 = vpop.permute.xlu1 %3064 }
0x3e01   :  { %v3067_v24 = vadd.f32 %v3065_v23, %v3057_v21 }
0x3e03   :  { %5566 = vtanh.f32 %v3067_v24  ;;  %v3163_v58 = vrot.slane %v3067_v24, 6 }
0x3e10   :  { %v5567_v25 = vpop.eup %5566 }
0x3e11   :  { %3070 = vrot.lane.b32.xlu0 %v5567_v25, %s5640_s2 }
0x3e83   :  { %v3071_v18 = vpop.permute.xlu0 %3070 }
0x3e84   :  { %v6347_v27 = vmul.f32 %v3071_v18, %v3053_v13 }
0x3e86   :  { %3075 = vrot.lane.b32.xlu1 %v6347_v27, %s5644_s4 }
0x3ef8   :  { %v3076_v2 = vpop.permute.xlu1 %3075 }
0x3ef9   :  { %5320 = vmatmul.mubr.msk.f32.vlgmr.msra.gmra.mxu1 %vm1137_vm12, %v3076_v2 }
0x3efa   :  { %5330 = vmatpush3.msra.mxu1 %v6229_v41  ;;  %5333 = vmatprep.mubr.msk.f32.mxu1 %vm5637_vm1, %v5636_v0 }
0x3efb   :  { %5331 = vmatprep.subr.mxu1 %v5636_v0 }
0x3efc   :  { %5332 = vmatpush3.msra.mxu1 %v6236_v57 }
0x3fb9   :  { %v3145_v53 = vpop.f32.mrf.mxu1 }
0x3fba   :  { %v3150_v29 = vrot.slane %v3145_v53, 6 }
0x3fbb   :  { %v5321_v5 = vpop.f32.mrf.mxu1 }
0x3fbc   :  { %v3152_v30 = vadd.f32 %v3150_v29, %v6268_v15 }
0x3fbe   :  { %v3153_v20 = vmul.f32 %v3152_v30, %v5816_v12 }
0x3fc0   :  { %v4884_v6 = vmul.f32 -1.442695, %v3153_v20 }
0x3fc2   :  { %5568 = vpow2.f32 %v4884_v6 }
0x3fcf   :  { %v5569_v48 = vpop.eup %5568 }
0x3fd0   :  { %v3157_v7 = vadd.f32 1.0, %v5569_v48 }
0x3fd2   :  { %5570 = vrcp.f32 %v3157_v7 }
0x3fdf   :  { %v5571_v41 = vpop.eup %5570 }
0x3fe0   :  { %v3160_v10 = vmul.f32 %v5571_v41, %v5816_v12 }
0x3fe2   :  { %v3161_v49 = vadd.f32 %v3160_v10, %v6076_v28 }
0x3fe4   :  { %3167 = vrot.lane.b32.xlu0 %v3161_v49, %s5642_s29  ;;  %v3165_v32 = vmul.f32 %v3163_v58, %v3161_v49 }
0x4056   :  { %v3168_v57 = vpop.permute.xlu0 %3167 }
0x4057   :  { %v3170_v31 = vmul.f32 %v3168_v57, %v3161_v49  ;;  %v4889_v57 = vld [vmem:[%s6633_s14 + $0x10] sm:$0xff] }
0x4059   :  { %3172 = vrot.lane.b32.xlu1 %v3170_v31, %s5643_s30 }
0x40cb   :  { %v3173_v33 = vpop.permute.xlu1 %3172 }
0x40cc   :  { %v3175_v34 = vadd.f32 %v3173_v33, %v3165_v32 }
0x40ce   :  { %5572 = vtanh.f32 %v3175_v34  ;;  %v3272_v63 = vrot.slane %v3175_v34, 6  ;;  %v4895_v34 = vld [vmem:[%s6634_s16 + $0x8] sm:$0xff] }
0x40cf   :  { %5343 = vmatprep.subr.mxu1 %v4895_v34 }
0x40db   :  { %v5573_v35 = vpop.eup %5572 }
0x40dc   :  { %3178 = vrot.lane.b32.xlu0 %v5573_v35, %s5640_s2 }
0x414e   :  { %v3179_v36 = vpop.permute.xlu0 %3178 }
0x414f   :  { %v3181_v37 = vmul.f32 %v3179_v36, %v3161_v49  ;;  %v4890_v49 = vld [vmem:[%s6633_s14 + $0x18] sm:$0xff]  ;;  %v4892_v36 = vld [vmem:[%s6635_s15 + $0x1] ss:$0 sm:$0xff] }
0x4150   :  { %5336 = vmatprep.subr.mxu0 %v4890_v49 }
0x4151   :  { %v3183_v38 = vrot.slane %v3181_v37, 2  ;;  %v3403_v13 = vsel %vm1023_vm9, %v6347_v27, %v3181_v37 }
0x4153   :  { %3184 = vrot.lane.b32.xlu1 %v3183_v38, %s5644_s4 }
0x41c5   :  { %v3185_v39 = vpop.permute.xlu1 %3184 }
0x41c6   :  { %5327 = vmatmul.mubr.msk.f32.vlgmr.msra.gmra.mxu0 %vm1137_vm12, %v3185_v39 }
0x41c7   :  { %5337 = vmatpush3.msra.mxu0 %v4890_v49 }
0x41c8   :  { %5338 = vmatprep.subr.mxu0 %v4889_v57 }
0x41c9   :  { %5339 = vmatpush3.msra.mxu0 %v4889_v57 }
0x4286   :  { %v3254_v42 = vpop.f32.mrf.mxu0 }
0x4287   :  { %v3259_v43 = vrot.slane %v3254_v42, 4  ;;  %v5646_v42 = vmov 2  }
0x4288   :  { %v5328_v45 = vpop.f32.mrf.mxu0  ;;  %5439 = vset.pattern.permute.xlu0 %v5646_v42 }
0x4289   :  { %v3261_v26 = vadd.f32 %v3259_v43, %v6268_v15  ;;  %v5634_v43 = vld [vmem:[%s6627_s1] sm:$0xff] }
0x428a   :  { %v4897_v45 = vld [vmem:[%s6636_s17 + $0x1] ss:$0 sm:$0xff] }
0x428b   :  { %v3262_v22 = vmul.f32 %v3261_v26, %v5816_v12 }
0x428d   :  { %v4886_v47 = vmul.f32 -1.442695, %v3262_v22 }
0x428f   :  { %5574 = vpow2.f32 %v4886_v47 }
0x429c   :  { %v5575_v52 = vpop.eup %5574 }
0x429d   :  { %v3266_v56 = vadd.f32 1.0, %v5575_v52 }
0x429f   :  { %5576 = vrcp.f32 %v3266_v56  ;;  %v4903_v56 = vld [vmem:[%s6628_s11 + $0x10] sm:$0xff] }
0x42a0   :  { %5348 = vmatprep.subr.mxu0 %v4903_v56 }
0x42ac   :  { %v5577_v17 = vpop.eup %5576 }
0x42ad   :  { %v3269_v59 = vmul.f32 %v5577_v17, %v5816_v12  ;;  %v5635_v17 = vld [vmem:[%s6627_s1 + $0x8] sm:$0xff] }
0x42af   :  { %v3270_v61 = vadd.f32 %v3269_v59, %v6076_v28  ;;  %v6429_v59 = vld [vmem:[%s6629_s12 + $0x28] sm:$0xff] }
0x42b1   :  { %3276 = vrot.lane.b32.xlu0 %v3270_v61, %s5642_s29  ;;  %v3274_v1 = vmul.f32 %v3272_v63, %v3270_v61 }
0x4323   :  { %v3277_v8 = vpop.permute.xlu0 %3276 }
0x4324   :  { %v3279_v62 = vmul.f32 %v3277_v8, %v3270_v61  ;;  %v4900_v8 = vld [vmem:[%s6630_s9 + $0x4] sm:$0x3] }
0x4326   :  { %3281 = vrot.lane.b32.xlu1 %v3279_v62, %s5643_s30  ;;  %v3622_v62 = vrot.slane %v4900_v8, %v6044_v51 }
0x4398   :  { %v3282_v40 = vpop.permute.xlu1 %3281 }
0x4399   :  { %v3284_v3 = vadd.f32 %v3282_v40, %v3274_v1  ;;  %v3608_v40 = vrot.slane %v4900_v8, %v6049_v54 }
0x439b   :  { %5578 = vtanh.f32 %v3284_v3 }
0x43a8   :  { %v5579_v4 = vpop.eup %5578 }
0x43a9   :  { %3287 = vrot.lane.b32.xlu0 %v5579_v4, %s5640_s2 }
0x441b   :  { %v3288_v9 = vpop.permute.xlu0 %3287 }
0x441c   :  { %v3290_v11 = vmul.f32 %v3288_v9, %v3270_v61  ;;  %v6436_v61 = vld [vmem:[%s6629_s12 + $0x20] sm:$0xff] }
0x441e   :  { %v3292_v14 = vrot.slane %v3290_v11, 4  ;;  %v3404_v16 = vsel %vm1025_vm10, %v3403_v13, %v3290_v11  ;;  %v4902_v11 = vld [vmem:[%s6631_s10 + $0x2] ss:$0 sm:$0xff] }
0x4420   :  { %3293 = vrot.lane.b32.xlu1 %v3292_v14, %s5644_s4 }
0x4492   :  { %v3294_v19 = vpop.permute.xlu1 %3293 }
0x4493   :  { %5334 = vmatmul.mubr.msk.f32.vlgmr.msra.gmra.mxu1 %vm1137_vm12, %v3294_v19 }
0x4494   :  { %5344 = vmatpush3.msra.mxu1 %v4895_v34 }
0x4495   :  { %5353 = vmatprep.subr.mxu1 %v5636_v0 }
0x4553   :  { %v3363_v21 = vpop.f32.mrf.mxu1 }
0x4554   :  { %v3368_v23 = vrot.slane %v3363_v21, 2 }
0x4555   :  { %v5335_v24 = vpop.f32.mrf.mxu1 }
0x4556   :  { %v3370_v25 = vadd.f32 %v3368_v23, %v6268_v15  ;;  %v3381_v15 = vrot.slane %v3284_v3, 6 }
0x4558   :  { %v3371_v18 = vmul.f32 %v3370_v25, %v5816_v12  ;;  %v4905_v25 = vld [vmem:[%s6632_s13 + $0x2] ss:$0 sm:$0xff]  ;;  %s5647_s13 = smov 1  }
0x455a   :  { %v4888_v2 = vmul.f32 -1.442695, %v3371_v18 }
0x455c   :  { %5580 = vpow2.f32 %v4888_v2 }
0x4569   :  { %v5581_v53 = vpop.eup %5580 }
0x456a   :  { %v3375_v29 = vadd.f32 1.0, %v5581_v53 }
0x456c   :  { %5582 = vrcp.f32 %v3375_v29 }
0x4579   :  { %v5583_v27 = vpop.eup %5582 }
0x457a   :  { %v3378_v5 = vmul.f32 %v5583_v27, %v5816_v12 }
0x457c   :  { %v3379_v30 = vadd.f32 %v3378_v5, %v6076_v28 }
0x457e   :  { %3385 = vrot.lane.b32.xlu0 %v3379_v30, %s5642_s29  ;;  %v3383_v48 = vmul.f32 %v3381_v15, %v3379_v30 }
0x45f0   :  { %v3386_v20 = vpop.permute.xlu0 %3385 }
0x45f1   :  { %v3388_v6 = vmul.f32 %v3386_v20, %v3379_v30 }
0x45f3   :  { %3390 = vrot.lane.b32.xlu1 %v3388_v6, %s5643_s30 }
0x45f7   :  { %3419 = vrot.lane.b32.xlu1 %v6331_v60, %s5644_s4 }
0x4665   :  { %v3391_v7 = vpop.permute.xlu1 %3390 }
0x4666   :  { %v3393_v41 = vadd.f32 %v3391_v7, %v3383_v48 }
0x4668   :  { %5584 = vtanh.f32 %v3393_v41 }
0x4669   :  { %v3420_v10 = vpop.permute.xlu1 %3419 }
0x466a   :  { %5340 = vmatprep.mubr.msk.f32.mxu0 %vm1137_vm12, %v3420_v10 }
0x4675   :  { %v5585_v60 = vpop.eup %5584 }
0x4676   :  { %3396 = vrot.lane.b32.xlu0 %v5585_v60, %s5640_s2 }
0x46e8   :  { %v3397_v31 = vpop.permute.xlu0 %3396 }
0x46e9   :  { %v3399_v58 = vmul.f32 %v3397_v31, %v3379_v30 }
0x46eb   :  { %v3405_v32 = vsel %vm1027_vm11, %v3404_v16, %v3399_v58 }
0x46ec   :  { %3421 = vrot.lane.b32.xlu0 %v3405_v32, %s5644_s4 }
0x46f0   :  { %3612 = vperm.xlu0 %5439, %v5634_v43  }
0x475e   :  { %v3422_v33 = vpop.permute.xlu0 %3421 }
0x475f   :  { %5341 = vmatmul.mubr.msk.f32.vlgmr.msra.gmra.mxu0 %vm1137_vm12, %v3422_v33 }
0x4760   :  { %5349 = vmatpush3.msra.mxu0 %v4903_v56 }
0x4761   :  { %5360 = vmatprep.subr.mxu0 %v5636_v0 }
0x476b   :  { %v3613_v1 = vpop.permute.xlu0 %3612 }
0x476c   :  { %v3623_v3 = vmul.f32 %v3622_v62, %v3613_v1 }
0x481f   :  { %v5342_v35 = vpop.f32.mrf.mxu0 }
0x4820   :  { %v3499_v39 = vadd.f32 %v5342_v35, %v4892_v36 }
0x4821   :  { %v3493_v37 = vpop.f32.mrf.mxu0 }
0x4822   :  { %v3494_v38 = vadd.f32 %v4892_v36, %v3493_v37 }
0x4824   :  { %5345 = vmatprep.mubr.msk.f32.mxu1 %vm71_vm0, %v3494_v38 }
0x4825   :  { %5346 = vmatmul.mubr.msk.f32.vlgmr.msra.gmra.mxu1 %vm71_vm0, %v3499_v39 }
0x4826   :  { %5357 = vmatprep.mubr.msk.f32.mxu1 %vm5637_vm1, %v5636_v0  ;;  %5354 = vmatpush3.msra.mxu1 %v6429_v59 }
0x4827   :  { %5355 = vmatprep.subr.mxu1 %v5636_v0 }
0x4828   :  { %5356 = vmatpush3.msra.mxu1 %v6436_v61 }
0x4829   :  { %5358 = vmatmul.mubr.f32.vlgmr.msra.gmra.mxu1 %v5636_v0  ;;  %5367 = vmatprep.subr.mxu1 %v5636_v0 }
0x482a   :  { %5368 = vmatpush3.msra.mxu1 %v6429_v59  ;;  %5371 = vmatprep.mubr.msk.f32.mxu1 %vm5637_vm1, %v5636_v0 }
0x482b   :  { %5369 = vmatprep.subr.mxu1 %v5636_v0 }
0x482c   :  { %5370 = vmatpush3.msra.mxu1 %v6436_v61 }
0x482d   :  { %5381 = vmatprep.subr.mxu1 %v5636_v0 }
0x48e5   :  { %v5347_v26 = vpop.f32.mrf.mxu1 }
0x48e6   :  { %v6414_v22 = vadd.f32 %v5347_v26, %v4897_v45 }
0x48e7   :  { %v3584_v47 = vpop.f32.mrf.mxu1 }
0x48e8   :  { %3602 = vperm.xlu1 %5440, %v6414_v22   ;;  %v6417_v52 = vadd.f32 %v4897_v45, %v3584_v47 }
0x48e9   :  { %v3797_v54 = vpop.f32.mrf.mxu1 }
0x48eb   :  { %v5359_v24 = vpop.f32.mrf.mxu1 }
0x48ec   :  { %3597 = vperm.xlu1 %5440, %v6417_v52  }
0x48f0   :  { %5441 = vset.pattern.permute.xlu1 %v5646_v42 }
0x48f1   :  { %3616 = vperm.xlu1 %5441, %v5635_v17  }
0x4963   :  { %v3603_v63 = vpop.permute.xlu1 %3602 }
0x4964   :  { %v3610_v19 = vmul.f32 %v3608_v40, %v3603_v63 }
0x4967   :  { %v3598_v4 = vpop.permute.xlu1 %3597 }
0x4968   :  { %v3609_v9 = vmul.f32 %v3608_v40, %v3598_v4 }
0x496a   :  { %v3625_v13 = vadd.f32 %v3623_v3, %v3609_v9 }
0x496c   :  { %v3635_v14 = vadd.f32 %v4902_v11, %v3625_v13  ;;  %v3617_v16 = vpop.permute.xlu1 %3616 }
0x496d   :  { %v3624_v21 = vmul.f32 %v3622_v62, %v3617_v16 }
0x496e   :  { %5350 = vmatprep.mubr.msk.f32.mxu0 %vm71_vm0, %v3635_v14 }
0x496f   :  { %v3626_v23 = vadd.f32 %v3624_v21, %v3610_v19 }
0x4971   :  { %v3636_v51 = vadd.f32 %v4902_v11, %v3626_v23 }
0x4973   :  { %5351 = vmatmul.mubr.msk.f32.vlgmr.msra.gmra.mxu0 %vm71_vm0, %v3636_v51 }
0x4974   :  { %5361 = vmatpush3.msra.mxu0 %v6429_v59  ;;  %5364 = vmatprep.mubr.msk.f32.mxu0 %vm5637_vm1, %v5636_v0 }
0x4975   :  { %5362 = vmatprep.subr.mxu0 %v5636_v0 }
0x4976   :  { %5363 = vmatpush3.msra.mxu0 %v6436_v61 }
0x4977   :  { %5374 = vmatprep.subr.mxu0 %v5636_v0 }
0x4a33   :  { %v5352_v18 = vpop.f32.mrf.mxu0 }
0x4a34   :  { %v6467_v2 = vadd.f32 %v5352_v18, %v4905_v25 }
0x4a35   :  { %v3719_v53 = vpop.f32.mrf.mxu0 }
0x4a36   :  { %v6469_v29 = vadd.f32 %v4905_v25, %v3719_v53 }
0x4a38   :  { %v3801_v27 = vadd.f32 %v3797_v54, %v6469_v29 }
0x4a3a   :  { %v3802_v5 = vmul.f32 %v3801_v27, %v5816_v12 }
0x4a3c   :  { %v4910_v30 = vmul.f32 -1.442695, %v3802_v5 }
0x4a3e   :  { %5586 = vpow2.f32 %v4910_v30 }
0x4a4b   :  { %v5587_v20 = vpop.eup %5586 }
0x4a4c   :  { %v3806_v6 = vadd.f32 1.0, %v5587_v20 }
0x4a4e   :  { %5588 = vrcp.f32 %v3806_v6 }
0x4a5b   :  { %v5589_v15 = vpop.eup %5588 }
0x4a5c   :  { %v3809_v48 = vmul.f32 %v5589_v15, %v5816_v12 }
0x4a5e   :  { %v3810_v7 = vadd.f32 %v3809_v48, %v6076_v28 }
0x4a60   :  { %3813 = vrot.lane.b32.xlu0 %v3810_v7, %s5642_s29  ;;  %v3811_v49 = vmul.f32 0.0, %v3810_v7 }
0x4ad2   :  { %v3814_v41 = vpop.permute.xlu0 %3813 }
0x4ad3   :  { %v3816_v10 = vmul.f32 %v3814_v41, %v3810_v7 }
0x4ad5   :  { %3818 = vrot.lane.b32.xlu1 %v3816_v10, %s5643_s30 }
0x4b47   :  { %v3819_v57 = vpop.permute.xlu1 %3818 }
0x4b48   :  { %v3821_v60 = vadd.f32 %v3819_v57, %v3811_v49 }
0x4b4a   :  { %5590 = vtanh.f32 %v3821_v60  ;;  %v3917_v8 = vrot.slane %v3821_v60, 6 }
0x4b57   :  { %v5591_v31 = vpop.eup %5590 }
0x4b58   :  { %3824 = vrot.lane.b32.xlu0 %v5591_v31, %s5640_s2 }
0x4bca   :  { %v3825_v58 = vpop.permute.xlu0 %3824 }
0x4bcb   :  { %v6478_v32 = vmul.f32 %v3825_v58, %v3810_v7 }
0x4bcd   :  { %3829 = vrot.lane.b32.xlu1 %v6478_v32, %s5644_s4 }
0x4c3f   :  { %v3830_v33 = vpop.permute.xlu1 %3829 }
0x4c40   :  { %5365 = vmatmul.mubr.msk.f32.vlgmr.msra.gmra.mxu0 %vm1137_vm12, %v3830_v33 }
0x4c41   :  { %5375 = vmatpush3.msra.mxu0 %v6429_v59  ;;  %5378 = vmatprep.mubr.msk.f32.mxu0 %vm5637_vm1, %v5636_v0 }
0x4c42   :  { %5376 = vmatprep.subr.mxu0 %v5636_v0 }
0x4c43   :  { %5377 = vmatpush3.msra.mxu0 %v6436_v61 }
0x4c44   :  { %5388 = vmatprep.subr.mxu0 %v5636_v0 }
0x4d00   :  { %v3899_v34 = vpop.f32.mrf.mxu0 }
0x4d01   :  { %v3904_v35 = vrot.slane %v3899_v34, 6 }
0x4d02   :  { %v5366_v36 = vpop.f32.mrf.mxu0 }
0x4d03   :  { %v3906_v37 = vadd.f32 %v3904_v35, %v6469_v29 }
0x4d05   :  { %v3907_v38 = vmul.f32 %v3906_v37, %v5816_v12 }
0x4d07   :  { %v4912_v39 = vmul.f32 -1.442695, %v3907_v38 }
0x4d09   :  { %5592 = vpow2.f32 %v4912_v39 }
0x4d16   :  { %v5593_v42 = vpop.eup %5592 }
0x4d17   :  { %v3911_v43 = vadd.f32 1.0, %v5593_v42 }
0x4d19   :  { %5594 = vrcp.f32 %v3911_v43 }
0x4d26   :  { %v5595_v45 = vpop.eup %5594 }
0x4d27   :  { %v3914_v26 = vmul.f32 %v5595_v45, %v5816_v12 }
0x4d29   :  { %v3915_v47 = vadd.f32 %v3914_v26, %v6076_v28 }
0x4d2b   :  { %3921 = vrot.lane.b32.xlu0 %v3915_v47, %s5642_s29  ;;  %v3919_v62 = vmul.f32 %v3917_v8, %v3915_v47 }
0x4d9d   :  { %v3922_v56 = vpop.permute.xlu0 %3921 }
0x4d9e   :  { %v3924_v17 = vmul.f32 %v3922_v56, %v3915_v47 }
0x4da0   :  { %3926 = vrot.lane.b32.xlu1 %v3924_v17, %s5643_s30 }
0x4e12   :  { %v3927_v63 = vpop.permute.xlu1 %3926 }
0x4e13   :  { %v3929_v1 = vadd.f32 %v3927_v63, %v3919_v62 }
0x4e15   :  { %5596 = vtanh.f32 %v3929_v1  ;;  %v4026_v5 = vrot.slane %v3929_v1, 6 }
0x4e22   :  { %v5597_v40 = vpop.eup %5596 }
0x4e23   :  { %3932 = vrot.lane.b32.xlu0 %v5597_v40, %s5640_s2 }
0x4e95   :  { %v3933_v3 = vpop.permute.xlu0 %3932 }
0x4e96   :  { %v3935_v4 = vmul.f32 %v3933_v3, %v3915_v47 }
0x4e98   :  { %v3937_v9 = vrot.slane %v3935_v4, 2  ;;  %v4586_v41 = vsel %vm1023_vm9, %v6478_v32, %v3935_v4 }
0x4e9a   :  { %3938 = vrot.lane.b32.xlu1 %v3937_v9, %s5644_s4 }
0x4f0c   :  { %v3939_v11 = vpop.permute.xlu1 %3938 }
0x4f0d   :  { %5372 = vmatmul.mubr.msk.f32.vlgmr.msra.gmra.mxu1 %vm1137_vm12, %v3939_v11 }
0x4f0e   :  { %5382 = vmatpush3.msra.mxu1 %v6429_v59  ;;  %5385 = vmatprep.mubr.msk.f32.mxu1 %vm5637_vm1, %v5636_v0 }
0x4f0f   :  { %5383 = vmatprep.subr.mxu1 %v5636_v0 }
0x4f10   :  { %5384 = vmatpush3.msra.mxu1 %v6436_v61 }
0x4f11   :  { %5395 = vmatprep.subr.mxu1 %v5636_v0 }
0x4fcd   :  { %v4008_v13 = vpop.f32.mrf.mxu1 }
0x4fce   :  { %v4013_v14 = vrot.slane %v4008_v13, 4 }
0x4fcf   :  { %v5373_v16 = vpop.f32.mrf.mxu1 }
0x4fd0   :  { %v4015_v19 = vadd.f32 %v4013_v14, %v6469_v29 }
0x4fd2   :  { %v4016_v21 = vmul.f32 %v4015_v19, %v5816_v12 }
0x4fd4   :  { %v4914_v23 = vmul.f32 -1.442695, %v4016_v21 }
0x4fd6   :  { %5598 = vpow2.f32 %v4914_v23 }
0x4fe3   :  { %v5599_v51 = vpop.eup %5598 }
0x4fe4   :  { %v4020_v54 = vadd.f32 1.0, %v5599_v51 }
0x4fe6   :  { %5600 = vrcp.f32 %v4020_v54 }
0x4ff3   :  { %v5601_v24 = vpop.eup %5600 }
0x4ff4   :  { %v4023_v25 = vmul.f32 %v5601_v24, %v5816_v12 }
0x4ff6   :  { %v4024_v18 = vadd.f32 %v4023_v25, %v6076_v28 }
0x4ff8   :  { %4030 = vrot.lane.b32.xlu0 %v4024_v18, %s5642_s29  ;;  %v4028_v30 = vmul.f32 %v4026_v5, %v4024_v18 }
0x506a   :  { %v4031_v53 = vpop.permute.xlu0 %4030 }
0x506b   :  { %v4033_v27 = vmul.f32 %v4031_v53, %v4024_v18 }
0x506d   :  { %4035 = vrot.lane.b32.xlu1 %v4033_v27, %s5643_s30 }
0x50df   :  { %v4036_v20 = vpop.permute.xlu1 %4035 }
0x50e0   :  { %v4038_v6 = vadd.f32 %v4036_v20, %v4028_v30 }
0x50e2   :  { %5602 = vtanh.f32 %v4038_v6  ;;  %v4135_v45 = vrot.slane %v4038_v6, 6 }
0x50ef   :  { %v5603_v15 = vpop.eup %5602 }
0x50f0   :  { %4041 = vrot.lane.b32.xlu0 %v5603_v15, %s5640_s2 }
0x5162   :  { %v4042_v48 = vpop.permute.xlu0 %4041 }
0x5163   :  { %v4044_v7 = vmul.f32 %v4042_v48, %v4024_v18 }
0x5165   :  { %v4046_v10 = vrot.slane %v4044_v7, 4  ;;  %v4587_v49 = vsel %vm1025_vm10, %v4586_v41, %v4044_v7 }
0x5167   :  { %4047 = vrot.lane.b32.xlu1 %v4046_v10, %s5644_s4 }
0x51d9   :  { %v4048_v57 = vpop.permute.xlu1 %4047 }
0x51da   :  { %5379 = vmatmul.mubr.msk.f32.vlgmr.msra.gmra.mxu0 %vm1137_vm12, %v4048_v57 }
0x51db   :  { %5389 = vmatpush3.msra.mxu0 %v6429_v59  ;;  %5392 = vmatprep.mubr.msk.f32.mxu0 %vm5637_vm1, %v5636_v0 }
0x51dc   :  { %5390 = vmatprep.subr.mxu0 %v5636_v0 }
0x51dd   :  { %5391 = vmatpush3.msra.mxu0 %v6436_v61 }
0x51de   :  { %5402 = vmatprep.subr.mxu0 %v5636_v0 }
0x529a   :  { %v4117_v60 = vpop.f32.mrf.mxu0 }
0x529b   :  { %v4122_v31 = vrot.slane %v4117_v60, 2 }
0x529c   :  { %v5380_v58 = vpop.f32.mrf.mxu0 }
0x529d   :  { %v4124_v32 = vadd.f32 %v4122_v31, %v6469_v29 }
0x529f   :  { %v4125_v33 = vmul.f32 %v4124_v32, %v5816_v12 }
0x52a1   :  { %v4916_v34 = vmul.f32 -1.442695, %v4125_v33 }
0x52a3   :  { %5604 = vpow2.f32 %v4916_v34 }
0x52b0   :  { %v5605_v35 = vpop.eup %5604 }
0x52b1   :  { %v4129_v36 = vadd.f32 1.0, %v5605_v35 }
0x52b3   :  { %5606 = vrcp.f32 %v4129_v36 }
0x52c0   :  { %v5607_v37 = vpop.eup %5606 }
0x52c1   :  { %v4132_v38 = vmul.f32 %v5607_v37, %v5816_v12 }
0x52c3   :  { %v4133_v39 = vadd.f32 %v4132_v38, %v6076_v28 }
0x52c5   :  { %4139 = vrot.lane.b32.xlu0 %v4133_v39, %s5642_s29  ;;  %v4137_v29 = vmul.f32 %v4135_v45, %v4133_v39 }
0x5337   :  { %v4140_v42 = vpop.permute.xlu0 %4139 }
0x5338   :  { %v4142_v43 = vmul.f32 %v4140_v42, %v4133_v39 }
0x533a   :  { %4144 = vrot.lane.b32.xlu1 %v4142_v43, %s5643_s30 }
0x53ac   :  { %v4145_v26 = vpop.permute.xlu1 %4144 }
0x53ad   :  { %v4147_v47 = vadd.f32 %v4145_v26, %v4137_v29 }
0x53af   :  { %5608 = vtanh.f32 %v4147_v47  ;;  %v4241_v54 = vrot.slane %v4147_v47, 6 }
0x53bc   :  { %v5609_v56 = vpop.eup %5608 }
0x53bd   :  { %4150 = vrot.lane.b32.xlu0 %v5609_v56, %s5640_s2 }
0x542f   :  { %v4151_v17 = vpop.permute.xlu0 %4150 }
0x5430   :  { %v4153_v8 = vmul.f32 %v4151_v17, %v4133_v39 }
0x5432   :  { %v4155_v62 = vrot.slane %v4153_v8, 6  ;;  %v6530_v63 = vsel %vm1027_vm11, %v4587_v49, %v4153_v8 }
0x5434   :  { %4156 = vrot.lane.b32.xlu1 %v4155_v62, %s5644_s4 }
0x54a6   :  { %v4157_v1 = vpop.permute.xlu1 %4156 }
0x54a7   :  { %5386 = vmatmul.mubr.msk.f32.vlgmr.msra.gmra.mxu1 %vm1137_vm12, %v4157_v1 }
0x54a8   :  { %5396 = vmatpush3.msra.mxu1 %v6429_v59  ;;  %5399 = vmatprep.mubr.msk.f32.mxu1 %vm5637_vm1, %v5636_v0 }
0x54a9   :  { %5397 = vmatprep.subr.mxu1 %v5636_v0 }
0x54aa   :  { %5398 = vmatpush3.msra.mxu1 %v6436_v61 }
0x5567   :  { %v4226_v40 = vpop.f32.mrf.mxu1 }
0x5568   :  { %v4230_v3 = vadd.f32 %v4226_v40, %v6467_v2 }
0x5569   :  { %v5387_v4 = vpop.f32.mrf.mxu1 }
0x556a   :  { %v4231_v9 = vmul.f32 %v4230_v3, %v5816_v12 }
0x556c   :  { %v4918_v11 = vmul.f32 -1.442695, %v4231_v9 }
0x556e   :  { %5610 = vpow2.f32 %v4918_v11 }
0x557b   :  { %v5611_v13 = vpop.eup %5610 }
0x557c   :  { %v4235_v14 = vadd.f32 1.0, %v5611_v13 }
0x557e   :  { %5612 = vrcp.f32 %v4235_v14 }
0x558b   :  { %v5613_v16 = vpop.eup %5612 }
0x558c   :  { %v4238_v19 = vmul.f32 %v5613_v16, %v5816_v12 }
0x558e   :  { %v4239_v21 = vadd.f32 %v4238_v19, %v6076_v28 }
0x5590   :  { %4245 = vrot.lane.b32.xlu0 %v4239_v21, %s5642_s29  ;;  %v4243_v24 = vmul.f32 %v4241_v54, %v4239_v21 }
0x5602   :  { %v4246_v23 = vpop.permute.xlu0 %4245 }
0x5603   :  { %v4248_v51 = vmul.f32 %v4246_v23, %v4239_v21 }
0x5605   :  { %4250 = vrot.lane.b32.xlu1 %v4248_v51, %s5643_s30 }
0x5677   :  { %v4251_v25 = vpop.permute.xlu1 %4250 }
0x5678   :  { %v4253_v18 = vadd.f32 %v4251_v25, %v4243_v24 }
0x567a   :  { %5614 = vtanh.f32 %v4253_v18  ;;  %v4349_v31 = vrot.slane %v4253_v18, 6 }
0x5687   :  { %v5615_v53 = vpop.eup %5614 }
0x5688   :  { %4256 = vrot.lane.b32.xlu0 %v5615_v53, %s5640_s2 }
0x56fa   :  { %v4257_v27 = vpop.permute.xlu0 %4256 }
0x56fb   :  { %v6546_v5 = vmul.f32 %v4257_v27, %v4239_v21 }
0x56fd   :  { %4261 = vrot.lane.b32.xlu1 %v6546_v5, %s5644_s4 }
0x576f   :  { %v4262_v30 = vpop.permute.xlu1 %4261 }
0x5770   :  { %5393 = vmatmul.mubr.msk.f32.vlgmr.msra.gmra.mxu0 %vm1137_vm12, %v4262_v30 }
0x5771   :  { %5403 = vmatpush3.msra.mxu0 %v6429_v59  ;;  %5406 = vmatprep.mubr.msk.f32.mxu0 %vm5637_vm1, %v5636_v0 }
0x5772   :  { %5404 = vmatprep.subr.mxu0 %v5636_v0 }
0x5773   :  { %5405 = vmatpush3.msra.mxu0 %v6436_v61 }
0x5830   :  { %v4331_v20 = vpop.f32.mrf.mxu0 }
0x5831   :  { %v4336_v6 = vrot.slane %v4331_v20, 6 }
0x5832   :  { %v5394_v15 = vpop.f32.mrf.mxu0 }
0x5833   :  { %v4338_v48 = vadd.f32 %v4336_v6, %v6467_v2 }
0x5835   :  { %v4339_v7 = vmul.f32 %v4338_v48, %v5816_v12 }
0x5837   :  { %v4920_v41 = vmul.f32 -1.442695, %v4339_v7 }
0x5839   :  { %5616 = vpow2.f32 %v4920_v41 }
0x5846   :  { %v5617_v10 = vpop.eup %5616 }
0x5847   :  { %v4343_v49 = vadd.f32 1.0, %v5617_v10 }
0x5849   :  { %5618 = vrcp.f32 %v4343_v49  ;;  %v4926_v49 = vld [vmem:[%s6633_s14 + $0x28] sm:$0xff] }
0x584a   :  { %5409 = vmatprep.subr.mxu1 %v4926_v49 }
0x5856   :  { %v5619_v59 = vpop.eup %5618 }
0x5857   :  { %v4346_v57 = vmul.f32 %v5619_v59, %v5816_v12 }
0x5859   :  { %v4347_v60 = vadd.f32 %v4346_v57, %v6076_v28 }
0x585b   :  { %4353 = vrot.lane.b32.xlu0 %v4347_v60, %s5642_s29  ;;  %v4351_v58 = vmul.f32 %v4349_v31, %v4347_v60  ;;  %v4928_v31 = vld [vmem:[%s6635_s15 + $0x2] ss:$0 sm:$0xff] }
0x58cd   :  { %v4354_v0 = vpop.permute.xlu0 %4353 }
0x58ce   :  { %v4356_v61 = vmul.f32 %v4354_v0, %v4347_v60  ;;  %v4931_v0 = vld [vmem:[%s6634_s16 + $0x10] sm:$0xff]  ;;  %s5649_s16 = smov 3  }
0x58cf   :  { %5416 = vmatprep.subr.mxu0 %v4931_v0 }
0x58d0   :  { %4358 = vrot.lane.b32.xlu1 %v4356_v61, %s5643_s30 }
0x5942   :  { %v4359_v32 = vpop.permute.xlu1 %4358 }
0x5943   :  { %v4361_v33 = vadd.f32 %v4359_v32, %v4351_v58 }
0x5945   :  { %5620 = vtanh.f32 %v4361_v33  ;;  %v4458_v3 = vrot.slane %v4361_v33, 6 }
0x5952   :  { %v5621_v34 = vpop.eup %5620 }
0x5953   :  { %4364 = vrot.lane.b32.xlu0 %v5621_v34, %s5640_s2 }
0x59c5   :  { %v4365_v35 = vpop.permute.xlu0 %4364 }
0x59c6   :  { %v4367_v36 = vmul.f32 %v4365_v35, %v4347_v60 }
0x59c8   :  { %v4369_v37 = vrot.slane %v4367_v36, 2  ;;  %v4589_v19 = vsel %vm1023_vm9, %v6546_v5, %v4367_v36 }
0x59ca   :  { %4370 = vrot.lane.b32.xlu1 %v4369_v37, %s5644_s4 }
0x5a3c   :  { %v4371_v38 = vpop.permute.xlu1 %4370 }
0x5a3d   :  { %5400 = vmatmul.mubr.msk.f32.vlgmr.msra.gmra.mxu1 %vm1137_vm12, %v4371_v38 }
0x5a3e   :  { %5410 = vmatpush3.msra.mxu1 %v4926_v49 }
0x5afd   :  { %v4440_v39 = vpop.f32.mrf.mxu1 }
0x5afe   :  { %v4445_v42 = vrot.slane %v4440_v39, 4 }
0x5aff   :  { %v5401_v43 = vpop.f32.mrf.mxu1 }
0x5b00   :  { %v4447_v45 = vadd.f32 %v4445_v42, %v6467_v2 }
0x5b02   :  { %v4448_v29 = vmul.f32 %v4447_v45, %v5816_v12 }
0x5b04   :  { %v4922_v26 = vmul.f32 -1.442695, %v4448_v29 }
0x5b06   :  { %5622 = vpow2.f32 %v4922_v26 }
0x5b13   :  { %v5623_v47 = vpop.eup %5622 }
0x5b14   :  { %v4452_v56 = vadd.f32 1.0, %v5623_v47 }
0x5b16   :  { %5624 = vrcp.f32 %v4452_v56 }
0x5b23   :  { %v5625_v17 = vpop.eup %5624 }
0x5b24   :  { %v4455_v8 = vmul.f32 %v5625_v17, %v5816_v12 }
0x5b26   :  { %v4456_v62 = vadd.f32 %v4455_v8, %v6076_v28 }
0x5b28   :  { %4462 = vrot.lane.b32.xlu0 %v4456_v62, %s5642_s29  ;;  %v4460_v4 = vmul.f32 %v4458_v3, %v4456_v62 }
0x5b9a   :  { %v4463_v1 = vpop.permute.xlu0 %4462 }
0x5b9b   :  { %v4465_v40 = vmul.f32 %v4463_v1, %v4456_v62 }
0x5b9d   :  { %4467 = vrot.lane.b32.xlu1 %v4465_v40, %s5643_s30 }
0x5c0f   :  { %v4468_v9 = vpop.permute.xlu1 %4467 }
0x5c10   :  { %v4470_v11 = vadd.f32 %v4468_v9, %v4460_v4 }
0x5c12   :  { %5626 = vtanh.f32 %v4470_v11 }
0x5c1f   :  { %v5627_v13 = vpop.eup %5626 }
0x5c20   :  { %4473 = vrot.lane.b32.xlu0 %v5627_v13, %s5640_s2 }
0x5c92   :  { %v4474_v14 = vpop.permute.xlu0 %4473 }
0x5c93   :  { %v4476_v16 = vmul.f32 %v4474_v14, %v4456_v62 }
0x5c95   :  { %v4478_v21 = vrot.slane %v4476_v16, 4  ;;  %v4590_v23 = vsel %vm1025_vm10, %v4589_v19, %v4476_v16 }
0x5c97   :  { %4479 = vrot.lane.b32.xlu1 %v4478_v21, %s5644_s4 }
0x5d09   :  { %v4480_v51 = vpop.permute.xlu1 %4479 }
0x5d0a   :  { %5407 = vmatmul.mubr.msk.f32.vlgmr.msra.gmra.mxu0 %vm1137_vm12, %v4480_v51 }
0x5d0b   :  { %5417 = vmatpush3.msra.mxu0 %v4931_v0 }
0x5dca   :  { %v4549_v54 = vpop.f32.mrf.mxu0 }
0x5dcb   :  { %v4554_v24 = vrot.slane %v4549_v54, 2 }
0x5dcc   :  { %v5408_v25 = vpop.f32.mrf.mxu0 }
0x5dcd   :  { %v4556_v18 = vadd.f32 %v4554_v24, %v6467_v2  ;;  %v4567_v2 = vrot.slane %v4470_v11, 6 }
0x5dcf   :  { %v4557_v53 = vmul.f32 %v4556_v18, %v5816_v12 }
0x5dd1   :  { %v4924_v27 = vmul.f32 -1.442695, %v4557_v53 }
0x5dd3   :  { %5628 = vpow2.f32 %v4924_v27 }
0x5de0   :  { %v5629_v30 = vpop.eup %5628 }
0x5de1   :  { %v4561_v20 = vadd.f32 1.0, %v5629_v30 }
0x5de3   :  { %5630 = vrcp.f32 %v4561_v20 }
0x5df0   :  { %v5631_v5 = vpop.eup %5630 }
0x5df1   :  { %v4564_v6 = vmul.f32 %v5631_v5, %v5816_v12 }
0x5df3   :  { %v4565_v15 = vadd.f32 %v4564_v6, %v6076_v28 }
0x5df5   :  { %4571 = vrot.lane.b32.xlu0 %v4565_v15, %s5642_s29  ;;  %v4569_v41 = vmul.f32 %v4567_v2, %v4565_v15 }
0x5e67   :  { %v4572_v48 = vpop.permute.xlu0 %4571 }
0x5e68   :  { %v4574_v7 = vmul.f32 %v4572_v48, %v4565_v15 }
0x5e6a   :  { %4576 = vrot.lane.b32.xlu1 %v4574_v7, %s5643_s30 }
0x5e6e   :  { %4605 = vrot.lane.b32.xlu1 %v6530_v63, %s5644_s4  ;;  %v4925_v63 = vld [vmem:[%s6633_s14 + $0x20] sm:$0xff] }
0x5e6f   :  { %5411 = vmatprep.subr.mxu1 %v4925_v63 }
0x5e70   :  { %5412 = vmatpush3.msra.mxu1 %v4925_v63 }
0x5e72   :  { %4779 = vrot.lane.b32.xlu1 %v6219_v55, %s5647_s13 }
0x5e76   :  { %4785 = vrot.lane.b32.xlu1 %v6417_v52, %s5648_s5 }
0x5edc   :  { %v4577_v12 = vpop.permute.xlu1 %4576 }
0x5edd   :  { %v4579_v10 = vadd.f32 %v4577_v12, %v4569_v41 }
0x5edf   :  { %5632 = vtanh.f32 %v4579_v10 }
0x5ee0   :  { %v4606_v28 = vpop.permute.xlu1 %4605 }
0x5ee1   :  { %5413 = vmatprep.mubr.msk.f32.mxu1 %vm1137_vm12, %v4606_v28 }
0x5ee4   :  { %v4780_v38 = vpop.permute.xlu1 %4779 }
0x5ee5   :  { %v4800_v26 = vsel %vm4799_vm13, %v6009_v46, %v4780_v38 }
0x5ee8   :  { %v4786_v42 = vpop.permute.xlu1 %4785 }
0x5ee9   :  { %v4803_v56 = vsel %vm4802_vm15, %v4800_v26, %v4786_v42 }
0x5eec   :  { %v5633_v55 = vpop.eup %5632 }
0x5eed   :  { %4582 = vrot.lane.b32.xlu0 %v5633_v55, %s5640_s2 }
0x5f5f   :  { %v4583_v52 = vpop.permute.xlu0 %4582 }
0x5f60   :  { %v4585_v59 = vmul.f32 %v4583_v52, %v4565_v15 }
0x5f62   :  { %v4591_v57 = vsel %vm1027_vm11, %v4590_v23, %v4585_v59 }
0x5f63   :  { %4607 = vrot.lane.b32.xlu0 %v4591_v57, %s5644_s4 }
0x5f67   :  { %4781 = vrot.lane.b32.xlu0 %v6216_v50, %s5647_s13  ;;  %v4933_v50 = vld [vmem:[%s6636_s17 + $0x2] ss:$0 sm:$0xff] }
0x5f6b   :  { %4787 = vrot.lane.b32.xlu0 %v6414_v22, %s5648_s5 }
0x5fd5   :  { %v4608_v60 = vpop.permute.xlu0 %4607 }
0x5fd6   :  { %5414 = vmatmul.mubr.msk.f32.vlgmr.msra.gmra.mxu1 %vm1137_vm12, %v4608_v60 }
0x5fd9   :  { %v4782_v37 = vpop.permute.xlu0 %4781 }
0x5fda   :  { %v4801_v43 = vsel %vm4799_vm13, %v6006_v44, %v4782_v37 }
0x5fdd   :  { %v4788_v39 = vpop.permute.xlu0 %4787 }
0x5fde   :  { %v4804_v45 = vsel %vm4802_vm15, %v4801_v43, %v4788_v39 }
0x6096   :  { %v5415_v61 = vpop.f32.mrf.mxu1 }
0x6097   :  { %v4685_v33 = vadd.f32 %v5415_v61, %v4928_v31 }
0x6098   :  { %v4679_v58 = vpop.f32.mrf.mxu1 }
0x6099   :  { %v4680_v32 = vadd.f32 %v4928_v31, %v4679_v58 }
0x609b   :  { %5418 = vmatprep.mubr.msk.f32.mxu0 %vm71_vm0, %v4680_v32 }
0x609c   :  { %5419 = vmatmul.mubr.msk.f32.vlgmr.msra.gmra.mxu0 %vm71_vm0, %v4685_v33  ;;  %vm4808_vm0 = vcmask 31744  }
0x615c   :  { %v5420_v22 = vpop.f32.mrf.mxu0 }
0x615d   :  { %v4776_v34 = vadd.f32 %v5420_v22, %v4933_v50 }
0x615e   :  { %v4770_v35 = vpop.f32.mrf.mxu0 }
0x615f   :  { %v4771_v36 = vadd.f32 %v4933_v50, %v4770_v35  ;;  %4795 = vrot.lane.b32.xlu0 %v4776_v34, %s5649_s16 }
0x6161   :  { %4793 = vrot.lane.b32.xlu1 %v4771_v36, %s5649_s16 }
0x61d1   :  { %v4796_v29 = vpop.permute.xlu0 %4795 }
0x61d2   :  { %v4807_v47 = vsel %vm4805_vm14, %v4804_v45, %v4796_v29 }
0x61d3   :  { %4810 = vst.msk [vmem:[%s6637_s18 + $0x8] sm:$0xff] %vm4808_vm0, %v4807_v47  ;;  %v4794_v17 = vpop.permute.xlu1 %4793 }
0x61d4   :  { %v4806_v8 = vsel %vm4805_vm14, %v4803_v56, %v4794_v17 }
0x61d5   :  { %4809 = vst.msk [vmem:[%s6637_s18] sm:$0xff] %vm4808_vm0, %v4806_v8 }

</bundles_post_ra>
